<compile_context>
chip_gen: v6e
topology: v6e:2x2x1
jax: 0.10.0
libtpu: 0.0.40
codegen_flags: <defaults>
</compile_context>

<pallas_src>
import functools

import jax
import jax.numpy as jnp
from jax.experimental import pallas as pl
from jax.experimental.pallas import tpu as pltpu

EPS = 1e-5   # nn.BatchNorm2d default
LANE = 128   # TPU lane width


def _round_up(x, m):
    return (x + m - 1) // m * m


def _conv_acc(x_ref, w_ref, xpad_ref, col_ref, *, kh, kw, ph, pw):
    """Shared helper: 3x3 conv of one image as ONE full-depth MXU matmul (all in VMEM).

    x_ref    : (1, H, W, Cin)       unpadded NHWC input block
    w_ref    : (Kp, Coutp)          zero-padded (KH*KW*Cin -> 128, Cout -> 128) weights
    xpad_ref : (H+2ph, W+2pw, Cin)  VMEM scratch (halo handled here, not in the wrapper)
    col_ref  : (H*W, Kp)            VMEM scratch im2col matrix, lane-dense (Kp = 128)
    returns  : (H*W, Coutp) f32 conv output (never written to HBM)
    """
    _, H, W, Cin = x_ref.shape

    # Zero unconditionally every step: cheap, and stays correct when the batch grid
    # axis is split across TensorCores (a program_id==0 init would be skipped on the
    # second core, leaving NaN-able garbage in the padded columns / halo).
    xpad_ref[...] = jnp.zeros_like(xpad_ref)
    col_ref[...] = jnp.zeros_like(col_ref)
    xpad_ref[ph:ph + H, pw:pw + W, :] = x_ref[0]

    # im2col: one strided VMEM copy per tap.  Columns [kh*kw*Cin : Kp] stay zero, so the
    # single matmul below runs at full 128-deep contraction with a lane-dense LHS.
    # TODO(synk): for v5e, widen these Cin-lane stores (pre-interleave kw*Cin in the
    # wrapper or use pltpu.roll lane shifts) so the im2col build is not vst-bound.
    for i in range(kh):                       # static unroll (kh, kw known at trace time)
        for j in range(kw):
            t = i * kw + j
            col_ref[:, t * Cin:(t + 1) * Cin] = (
                xpad_ref[i:i + H, j:j + W, :].reshape(H * W, Cin))

    # One MXU matmul, f32 accumulation (matches PyTorch f32 semantics).
    # TODO(synk): optional bf16 cast of col/w (keep f32 accumulation) for v6e/v7x rate.
    return jnp.dot(col_ref[...], w_ref[...], preferred_element_type=jnp.float32)


def _conv_stats_kernel(x_ref, w_ref, pmean_ref, pm2_ref, xpad_ref, col_ref,
                       *, kh, kw, ph, pw):
    """Pass 1: per-image conv (VMEM-only) -> per-channel mean and M2 partials."""
    acc = _conv_acc(x_ref, w_ref, xpad_ref, col_ref, kh=kh, kw=kw, ph=ph, pw=pw)
    npix = acc.shape[0]
    mean = jnp.sum(acc, axis=0, keepdims=True) * (1.0 / npix)        # (1, Coutp)
    d = acc - mean
    pmean_ref[...] = mean[None]                                      # (1, 1, Coutp)
    pm2_ref[...] = jnp.sum(d * d, axis=0, keepdims=True)[None]       # (1, 1, Coutp)


def _conv_bn_relu_kernel(x_ref, w_ref, scale_ref, shift_ref, o_ref, xpad_ref, col_ref,
                         *, kh, kw, ph, pw, cout):
    """Pass 2: recompute conv, apply folded BN affine + ReLU, store NCHW-ready slab."""
    acc = _conv_acc(x_ref, w_ref, xpad_ref, col_ref, kh=kh, kw=kw, ph=ph, pw=pw)
    y = jnp.maximum(acc * scale_ref[...] + shift_ref[...], 0.0)      # (H*W, Coutp)
    # Fused channel-slice + NHWC->NCHW: one in-VMEM transpose, lane-dense (Cout, H*W)
    # store; the wrapper's reshape to (N, Cout, H, W) is free.
    o_ref[...] = y.T[:cout, :][None].astype(o_ref.dtype)


@jax.jit
def conv_norm_act(x_nchw, weight_oihw, gamma, beta):
    """PyTorch-layout in/out (NCHW / OIHW); stride=1, dilation=1, groups=1, bias=False."""
    N, Cin, H, W = x_nchw.shape
    Cout, _, KH, KW = weight_oihw.shape
    ph, pw = KH // 2, KW // 2                 # module default: padding = kernel_size // 2
    Kdim = KH * KW * Cin
    Kp = _round_up(Kdim, LANE)                # full MXU contraction depth
    Coutp = _round_up(Cout, LANE)             # lane-dense output channels in VMEM

    # NCHW -> NHWC (single small layout pass; each kernel then reads x exactly once).
    x = jnp.transpose(x_nchw, (0, 2, 3, 1)).astype(jnp.float32)

    # OIHW -> HWIO -> (KH*KW*Cin, Cout), zero-padded to (Kp, Coutp); stays VMEM-resident.
    w = jnp.transpose(weight_oihw, (2, 3, 1, 0)).reshape(Kdim, Cout).astype(jnp.float32)
    w = jnp.pad(w, ((0, Kp - Kdim), (0, Coutp - Cout)))

    cparams = pltpu.CompilerParams(
        dimension_semantics=("parallel",),
        vmem_limit_bytes=32 * 1024 * 1024)

    scratch = [
        pltpu.VMEM((H + 2 * ph, W + 2 * pw, Cin), jnp.float32),   # padded image
        pltpu.VMEM((H * W, Kp), jnp.float32),                     # im2col matrix
    ]

    # TODO(synk): for realistic H, W add a spatial row-block grid axis (overlapping halo
    # rows) so blocks + im2col scratch fit v7x's 64 MiB VMEM and feed both TensorCores.

    # ---- pass 1: conv in VMEM -> tiny per-image BN partials (no conv output to HBM) ----
    conv_stats = functools.partial(_conv_stats_kernel, kh=KH, kw=KW, ph=ph, pw=pw)
    pmean, pm2 = pl.pallas_call(
        conv_stats,
        out_shape=(
            jax.ShapeDtypeStruct((N, 1, Coutp), jnp.float32),
            jax.ShapeDtypeStruct((N, 1, Coutp), jnp.float32),
        ),
        grid_spec=pltpu.PrefetchScalarGridSpec(
            num_scalar_prefetch=0,
            grid=(N,),
            in_specs=[
                pl.BlockSpec((1, H, W, Cin), lambda n: (n, 0, 0, 0)),
                pl.BlockSpec((Kp, Coutp), lambda n: (0, 0)),       # weights stay resident
            ],
            out_specs=[
                pl.BlockSpec((1, 1, Coutp), lambda n: (n, 0, 0)),
                pl.BlockSpec((1, 1, Coutp), lambda n: (n, 0, 0)),
            ],
            scratch_shapes=scratch),
        compiler_params=cparams,
    )(x, w)

    # ---- combine per-image (mean, M2) partials: pooled (Welford-style) batch stats ----
    c = H * W
    count = N * c
    mean_n = pmean[:, 0, :]                                          # (N, Coutp)
    mean = jnp.mean(mean_n, axis=0)                                  # (Coutp,)
    m2 = jnp.sum(pm2[:, 0, :], axis=0) + c * jnp.sum((mean_n - mean) ** 2, axis=0)
    var = m2 / count                                                 # biased (training BN)

    gamma_p = jnp.pad(gamma.astype(jnp.float32), (0, Coutp - Cout))
    beta_p = jnp.pad(beta.astype(jnp.float32), (0, Coutp - Cout))
    scale = (gamma_p * jax.lax.rsqrt(var + EPS)).reshape(1, Coutp)
    shift = (beta_p - mean * scale[0]).reshape(1, Coutp)

    # ---- pass 2: recompute conv in VMEM, apply BN affine + ReLU, emit NCHW-ready slab ----
    conv_bn_relu = functools.partial(_conv_bn_relu_kernel,
                                     kh=KH, kw=KW, ph=ph, pw=pw, cout=Cout)
    out3 = pl.pallas_call(
        conv_bn_relu,
        out_shape=jax.ShapeDtypeStruct((N, Cout, H * W), x_nchw.dtype),
        grid_spec=pltpu.PrefetchScalarGridSpec(
            num_scalar_prefetch=0,
            grid=(N,),
            in_specs=[
                pl.BlockSpec((1, H, W, Cin), lambda n: (n, 0, 0, 0)),
                pl.BlockSpec((Kp, Coutp), lambda n: (0, 0)),
                pl.BlockSpec((1, Coutp), lambda n: (0, 0)),
                pl.BlockSpec((1, Coutp), lambda n: (0, 0)),
            ],
            out_specs=pl.BlockSpec((1, Cout, H * W), lambda n: (n, 0, 0)),
            scratch_shapes=scratch),
        compiler_params=cparams,
    )(x, w, scale, shift)

    # Free metadata reshape of a contiguous (N, Cout, H*W) slab to PyTorch NCHW.
    return out3.reshape(N, Cout, H, W)


def _reference(x_nchw, weight_oihw, gamma, beta, padding=1):
    """Plain-JAX reference for correctness checking."""
    y = jax.lax.conv_general_dilated(
        x_nchw.astype(jnp.float32), weight_oihw.astype(jnp.float32),
        window_strides=(1, 1), padding=[(padding, padding), (padding, padding)],
        dimension_numbers=("NCHW", "OIHW", "NCHW"))
    mean = jnp.mean(y, axis=(0, 2, 3), keepdims=True)
    var = jnp.mean((y - mean) ** 2, axis=(0, 2, 3), keepdims=True)
    y = (y - mean) * jax.lax.rsqrt(var + EPS)
    y = y * gamma.reshape(1, -1, 1, 1) + beta.reshape(1, -1, 1, 1)
    return jnp.maximum(y, 0.0)


if __name__ == "__main__":
    # Small shapes consistent with the module: N=2, Cin=4, H=W=16, Cout=8, k=3.
    N, Cin, H, W = 2, 4, 16, 16
    Cout, K = 8, 3

    key = jax.random.PRNGKey(0)
    kx, kw = jax.random.split(key)

    x = jax.random.normal(kx, (N, Cin, H, W), dtype=jnp.float32)
    weight = jax.random.normal(kw, (Cout, Cin, K, K), dtype=jnp.float32) * 0.1
    gamma = jnp.ones((Cout,), dtype=jnp.float32)   # BatchNorm2d default init
    beta = jnp.zeros((Cout,), dtype=jnp.float32)

    out = conv_norm_act(x, weight, gamma, beta)
    out = jax.block_until_ready(out)

    ref = jax.block_until_ready(_reference(x, weight, gamma, beta, padding=K // 2))
    assert out.shape == (N, Cout, H, W), out.shape
    assert jnp.allclose(out, ref, atol=1e-4, rtol=1e-4), float(jnp.max(jnp.abs(out - ref)))

    print("KERNEL_OK")
</pallas_src>

<mosaic_0001>
module attributes {stable_mosaic.version = 11 : i64} {
  func.func @_conv_stats_kernel(%arg0: i32, %arg1: memref<1x16x16x4xf32, #tpu.memory_space<vmem>>, %arg2: memref<128x128xf32, #tpu.memory_space<vmem>>, %arg3: memref<1x1x128xf32, #tpu.memory_space<vmem>>, %arg4: memref<1x1x128xf32, #tpu.memory_space<vmem>>, %arg5: memref<18x18x4xf32, #tpu.memory_space<vmem>>, %arg6: memref<256x128xf32, #tpu.memory_space<vmem>>) attributes {dimension_semantics = [#tpu.dimension_semantics<parallel>], iteration_bounds = array<i64: 2>, scalar_prefetch = 0 : i64, scratch_operands = 2 : i64, tpu.core_type = #tpu.core_type<tc>, window_params = [{transform_indices = @transform_0, window_bounds = array<i64: 1, 16, 16, 4>}, {pipeline_mode = #tpu.pipeline_mode<synchronous>, transform_indices = @transform_1, window_bounds = array<i64: 128, 128>}, {transform_indices = @transform_2, window_bounds = array<i64: 1, 1, 128>}, {transform_indices = @transform_3, window_bounds = array<i64: 1, 1, 128>}]} {
    %cst = arith.constant 0.000000e+00 : f32
    %0 = vector.broadcast %cst : f32 to vector<18x18x4xf32>
    %c0 = arith.constant 0 : index
    %c0_0 = arith.constant 0 : index
    %c0_1 = arith.constant 0 : index
    %1 = vector.load %arg5[%c0, %c0_0, %c0_1] : memref<18x18x4xf32, #tpu.memory_space<vmem>>, vector<18x18x4xf32>
    tpu.vector_store %arg5[%c0, %c0_0, %c0_1], %0 {strides = array<i32>} : memref<18x18x4xf32, #tpu.memory_space<vmem>>, vector<18x18x4xf32>,
    %cst_2 = arith.constant 0.000000e+00 : f32
    %2 = vector.broadcast %cst_2 : f32 to vector<256x128xf32>
    %c0_3 = arith.constant 0 : index
    %c0_4 = arith.constant 0 : index
    %3 = vector.load %arg6[%c0_3, %c0_4] : memref<256x128xf32, #tpu.memory_space<vmem>>, vector<256x128xf32>
    tpu.vector_store %arg6[%c0_3, %c0_4], %2 {strides = array<i32>} : memref<256x128xf32, #tpu.memory_space<vmem>>, vector<256x128xf32>,
    %c0_5 = arith.constant 0 : index
    %c0_6 = arith.constant 0 : index
    %c0_7 = arith.constant 0 : index
    %c0_8 = arith.constant 0 : index
    %4 = vector.load %arg1[%c0_5, %c0_6, %c0_7, %c0_8] : memref<1x16x16x4xf32, #tpu.memory_space<vmem>>, vector<1x16x16x4xf32>
    %5 = vector.shape_cast %4 : vector<1x16x16x4xf32> to vector<16x16x4xf32>
    %c1 = arith.constant 1 : index
    %c1_9 = arith.constant 1 : index
    %c0_10 = arith.constant 0 : index
    %6 = vector.load %arg5[%c1, %c1_9, %c0_10] : memref<18x18x4xf32, #tpu.memory_space<vmem>>, vector<16x16x4xf32>
    tpu.vector_store %arg5[%c1, %c1_9, %c0_10], %5 {strides = array<i32>} : memref<18x18x4xf32, #tpu.memory_space<vmem>>, vector<16x16x4xf32>,
    %c0_11 = arith.constant 0 : index
    %c0_12 = arith.constant 0 : index
    %c0_13 = arith.constant 0 : index
    %7 = vector.load %arg5[%c0_11, %c0_12, %c0_13] : memref<18x18x4xf32, #tpu.memory_space<vmem>>, vector<16x16x4xf32>
    %8 = vector.shape_cast %7 : vector<16x16x4xf32> to vector<256x4xf32>
    %c0_14 = arith.constant 0 : index
    %c0_15 = arith.constant 0 : index
    %9 = vector.load %arg6[%c0_14, %c0_15] : memref<256x128xf32, #tpu.memory_space<vmem>>, vector<256x4xf32>
    tpu.vector_store %arg6[%c0_14, %c0_15], %8 {strides = array<i32>} : memref<256x128xf32, #tpu.memory_space<vmem>>, vector<256x4xf32>,
    %c0_16 = arith.constant 0 : index
    %c1_17 = arith.constant 1 : index
    %c0_18 = arith.constant 0 : index
    %10 = vector.load %arg5[%c0_16, %c1_17, %c0_18] : memref<18x18x4xf32, #tpu.memory_space<vmem>>, vector<16x16x4xf32>
    %11 = vector.shape_cast %10 : vector<16x16x4xf32> to vector<256x4xf32>
    %c0_19 = arith.constant 0 : index
    %c4 = arith.constant 4 : index
    %12 = vector.load %arg6[%c0_19, %c4] : memref<256x128xf32, #tpu.memory_space<vmem>>, vector<256x4xf32>
    tpu.vector_store %arg6[%c0_19, %c4], %11 {strides = array<i32>} : memref<256x128xf32, #tpu.memory_space<vmem>>, vector<256x4xf32>,
    %c0_20 = arith.constant 0 : index
    %c2 = arith.constant 2 : index
    %c0_21 = arith.constant 0 : index
    %13 = vector.load %arg5[%c0_20, %c2, %c0_21] : memref<18x18x4xf32, #tpu.memory_space<vmem>>, vector<16x16x4xf32>
    %14 = vector.shape_cast %13 : vector<16x16x4xf32> to vector<256x4xf32>
    %c0_22 = arith.constant 0 : index
    %c8 = arith.constant 8 : index
    %15 = vector.load %arg6[%c0_22, %c8] : memref<256x128xf32, #tpu.memory_space<vmem>>, vector<256x4xf32>
    tpu.vector_store %arg6[%c0_22, %c8], %14 {strides = array<i32>} : memref<256x128xf32, #tpu.memory_space<vmem>>, vector<256x4xf32>,
    %c1_23 = arith.constant 1 : index
    %c0_24 = arith.constant 0 : index
    %c0_25 = arith.constant 0 : index
    %16 = vector.load %arg5[%c1_23, %c0_24, %c0_25] : memref<18x18x4xf32, #tpu.memory_space<vmem>>, vector<16x16x4xf32>
    %17 = vector.shape_cast %16 : vector<16x16x4xf32> to vector<256x4xf32>
    %c0_26 = arith.constant 0 : index
    %c12 = arith.constant 12 : index
    %18 = vector.load %arg6[%c0_26, %c12] : memref<256x128xf32, #tpu.memory_space<vmem>>, vector<256x4xf32>
    tpu.vector_store %arg6[%c0_26, %c12], %17 {strides = array<i32>} : memref<256x128xf32, #tpu.memory_space<vmem>>, vector<256x4xf32>,
    %c1_27 = arith.constant 1 : index
    %c1_28 = arith.constant 1 : index
    %c0_29 = arith.constant 0 : index
    %19 = vector.load %arg5[%c1_27, %c1_28, %c0_29] : memref<18x18x4xf32, #tpu.memory_space<vmem>>, vector<16x16x4xf32>
    %20 = vector.shape_cast %19 : vector<16x16x4xf32> to vector<256x4xf32>
    %c0_30 = arith.constant 0 : index
    %c16 = arith.constant 16 : index
    %21 = vector.load %arg6[%c0_30, %c16] : memref<256x128xf32, #tpu.memory_space<vmem>>, vector<256x4xf32>
    tpu.vector_store %arg6[%c0_30, %c16], %20 {strides = array<i32>} : memref<256x128xf32, #tpu.memory_space<vmem>>, vector<256x4xf32>,
    %c1_31 = arith.constant 1 : index
    %c2_32 = arith.constant 2 : index
    %c0_33 = arith.constant 0 : index
    %22 = vector.load %arg5[%c1_31, %c2_32, %c0_33] : memref<18x18x4xf32, #tpu.memory_space<vmem>>, vector<16x16x4xf32>
    %23 = vector.shape_cast %22 : vector<16x16x4xf32> to vector<256x4xf32>
    %c0_34 = arith.constant 0 : index
    %c20 = arith.constant 20 : index
    %24 = vector.load %arg6[%c0_34, %c20] : memref<256x128xf32, #tpu.memory_space<vmem>>, vector<256x4xf32>
    tpu.vector_store %arg6[%c0_34, %c20], %23 {strides = array<i32>} : memref<256x128xf32, #tpu.memory_space<vmem>>, vector<256x4xf32>,
    %c2_35 = arith.constant 2 : index
    %c0_36 = arith.constant 0 : index
    %c0_37 = arith.constant 0 : index
    %25 = vector.load %arg5[%c2_35, %c0_36, %c0_37] : memref<18x18x4xf32, #tpu.memory_space<vmem>>, vector<16x16x4xf32>
    %26 = vector.shape_cast %25 : vector<16x16x4xf32> to vector<256x4xf32>
    %c0_38 = arith.constant 0 : index
    %c24 = arith.constant 24 : index
    %27 = vector.load %arg6[%c0_38, %c24] : memref<256x128xf32, #tpu.memory_space<vmem>>, vector<256x4xf32>
    tpu.vector_store %arg6[%c0_38, %c24], %26 {strides = array<i32>} : memref<256x128xf32, #tpu.memory_space<vmem>>, vector<256x4xf32>,
    %c2_39 = arith.constant 2 : index
    %c1_40 = arith.constant 1 : index
    %c0_41 = arith.constant 0 : index
    %28 = vector.load %arg5[%c2_39, %c1_40, %c0_41] : memref<18x18x4xf32, #tpu.memory_space<vmem>>, vector<16x16x4xf32>
    %29 = vector.shape_cast %28 : vector<16x16x4xf32> to vector<256x4xf32>
    %c0_42 = arith.constant 0 : index
    %c28 = arith.constant 28 : index
    %30 = vector.load %arg6[%c0_42, %c28] : memref<256x128xf32, #tpu.memory_space<vmem>>, vector<256x4xf32>
    tpu.vector_store %arg6[%c0_42, %c28], %29 {strides = array<i32>} : memref<256x128xf32, #tpu.memory_space<vmem>>, vector<256x4xf32>,
    %c2_43 = arith.constant 2 : index
    %c2_44 = arith.constant 2 : index
    %c0_45 = arith.constant 0 : index
    %31 = vector.load %arg5[%c2_43, %c2_44, %c0_45] : memref<18x18x4xf32, #tpu.memory_space<vmem>>, vector<16x16x4xf32>
    %32 = vector.shape_cast %31 : vector<16x16x4xf32> to vector<256x4xf32>
    %c0_46 = arith.constant 0 : index
    %c32 = arith.constant 32 : index
    %33 = vector.load %arg6[%c0_46, %c32] : memref<256x128xf32, #tpu.memory_space<vmem>>, vector<256x4xf32>
    tpu.vector_store %arg6[%c0_46, %c32], %32 {strides = array<i32>} : memref<256x128xf32, #tpu.memory_space<vmem>>, vector<256x4xf32>,
    %c0_47 = arith.constant 0 : index
    %c0_48 = arith.constant 0 : index
    %34 = vector.load %arg6[%c0_47, %c0_48] : memref<256x128xf32, #tpu.memory_space<vmem>>, vector<256x128xf32>
    %c0_49 = arith.constant 0 : index
    %c0_50 = arith.constant 0 : index
    %35 = vector.load %arg2[%c0_49, %c0_50] : memref<128x128xf32, #tpu.memory_space<vmem>>, vector<128x128xf32>
    %cst_51 = arith.constant dense<0.000000e+00> : vector<256x128xf32>
    %36 = tpu.matmul %34, %35, %cst_51 {dimension_numbers = #tpu.dot_dimension_numbers<[1], [0], [0], [1], [0, 0, 1, 1], [], []>} : vector<256x128xf32>, vector<128x128xf32>, vector<256x128xf32> -> vector<256x128xf32>
    %cst_52 = arith.constant dense<0.000000e+00> : vector<128xf32>
    %37 = vector.multi_reduction <add>, %36, %cst_52 [0] : vector<256x128xf32> to vector<128xf32>
    %38 = vector.shape_cast %37 : vector<128xf32> to vector<1x128xf32>
    %cst_53 = arith.constant 3.906250e-03 : f32
    %39 = vector.broadcast %cst_53 : f32 to vector<1x128xf32>
    %40 = arith.mulf %38, %39 : vector<1x128xf32>
    %41 = vector.broadcast %40 : vector<1x128xf32> to vector<256x128xf32>
    %42 = arith.subf %36, %41 : vector<256x128xf32>
    %43 = vector.shape_cast %40 : vector<1x128xf32> to vector<1x1x128xf32>
    %c0_54 = arith.constant 0 : index
    %c0_55 = arith.constant 0 : index
    %c0_56 = arith.constant 0 : index
    %44 = vector.load %arg3[%c0_54, %c0_55, %c0_56] : memref<1x1x128xf32, #tpu.memory_space<vmem>>, vector<1x1x128xf32>
    tpu.vector_store %arg3[%c0_54, %c0_55, %c0_56], %43 {strides = array<i32>} : memref<1x1x128xf32, #tpu.memory_space<vmem>>, vector<1x1x128xf32>,
    %45 = arith.mulf %42, %42 : vector<256x128xf32>
    %cst_57 = arith.constant dense<0.000000e+00> : vector<128xf32>
    %46 = vector.multi_reduction <add>, %45, %cst_57 [0] : vector<256x128xf32> to vector<128xf32>
    %47 = vector.shape_cast %46 : vector<128xf32> to vector<1x128xf32>
    %48 = vector.shape_cast %47 : vector<1x128xf32> to vector<1x1x128xf32>
    %c0_58 = arith.constant 0 : index
    %c0_59 = arith.constant 0 : index
    %c0_60 = arith.constant 0 : index
    %49 = vector.load %arg4[%c0_58, %c0_59, %c0_60] : memref<1x1x128xf32, #tpu.memory_space<vmem>>, vector<1x1x128xf32>
    tpu.vector_store %arg4[%c0_58, %c0_59, %c0_60], %48 {strides = array<i32>} : memref<1x1x128xf32, #tpu.memory_space<vmem>>, vector<1x1x128xf32>,
    return
  }
  func.func @transform_0(%arg0: i32) -> (i32, i32, i32, i32) {
    %c0_i32 = arith.constant 0 : i32
    %c0_i32_0 = arith.constant 0 : i32
    %c0_i32_1 = arith.constant 0 : i32
    %c0_i32_2 = arith.constant 0 : i32
    return %arg0, %c0_i32, %c0_i32_0, %c0_i32_1 : i32, i32, i32, i32
  }
  func.func @transform_1(%arg0: i32) -> (i32, i32) {
    %c0_i32 = arith.constant 0 : i32
    %c0_i32_0 = arith.constant 0 : i32
    %c0_i32_1 = arith.constant 0 : i32
    return %c0_i32, %c0_i32_0 : i32, i32
  }
  func.func @transform_2(%arg0: i32) -> (i32, i32, i32) {
    %c0_i32 = arith.constant 0 : i32
    %c0_i32_0 = arith.constant 0 : i32
    %c0_i32_1 = arith.constant 0 : i32
    return %arg0, %c0_i32, %c0_i32_0 : i32, i32, i32
  }
  func.func @transform_3(%arg0: i32) -> (i32, i32, i32) {
    %c0_i32 = arith.constant 0 : i32
    %c0_i32_0 = arith.constant 0 : i32
    %c0_i32_1 = arith.constant 0 : i32
    return %arg0, %c0_i32, %c0_i32_0 : i32, i32, i32
  }
}

module attributes {stable_mosaic.version = 11 : i64} {
  func.func @_conv_bn_relu_kernel(%arg0: i32, %arg1: memref<1x16x16x4xf32, #tpu.memory_space<vmem>>, %arg2: memref<128x128xf32, #tpu.memory_space<vmem>>, %arg3: memref<1x128xf32, #tpu.memory_space<vmem>>, %arg4: memref<1x128xf32, #tpu.memory_space<vmem>>, %arg5: memref<1x8x256xf32, #tpu.memory_space<vmem>>, %arg6: memref<18x18x4xf32, #tpu.memory_space<vmem>>, %arg7: memref<256x128xf32, #tpu.memory_space<vmem>>) attributes {dimension_semantics = [#tpu.dimension_semantics<parallel>], iteration_bounds = array<i64: 2>, scalar_prefetch = 0 : i64, scratch_operands = 2 : i64, tpu.core_type = #tpu.core_type<tc>, window_params = [{transform_indices = @transform_0, window_bounds = array<i64: 1, 16, 16, 4>}, {pipeline_mode = #tpu.pipeline_mode<synchronous>, transform_indices = @transform_1, window_bounds = array<i64: 128, 128>}, {pipeline_mode = #tpu.pipeline_mode<synchronous>, transform_indices = @transform_2, window_bounds = array<i64: 1, 128>}, {pipeline_mode = #tpu.pipeline_mode<synchronous>, transform_indices = @transform_3, window_bounds = array<i64: 1, 128>}, {transform_indices = @transform_4, window_bounds = array<i64: 1, 8, 256>}]} {
    %cst = arith.constant 0.000000e+00 : f32
    %0 = vector.broadcast %cst : f32 to vector<18x18x4xf32>
    %c0 = arith.constant 0 : index
    %c0_0 = arith.constant 0 : index
    %c0_1 = arith.constant 0 : index
    %1 = vector.load %arg6[%c0, %c0_0, %c0_1] : memref<18x18x4xf32, #tpu.memory_space<vmem>>, vector<18x18x4xf32>
    tpu.vector_store %arg6[%c0, %c0_0, %c0_1], %0 {strides = array<i32>} : memref<18x18x4xf32, #tpu.memory_space<vmem>>, vector<18x18x4xf32>,
    %cst_2 = arith.constant 0.000000e+00 : f32
    %2 = vector.broadcast %cst_2 : f32 to vector<256x128xf32>
    %c0_3 = arith.constant 0 : index
    %c0_4 = arith.constant 0 : index
    %3 = vector.load %arg7[%c0_3, %c0_4] : memref<256x128xf32, #tpu.memory_space<vmem>>, vector<256x128xf32>
    tpu.vector_store %arg7[%c0_3, %c0_4], %2 {strides = array<i32>} : memref<256x128xf32, #tpu.memory_space<vmem>>, vector<256x128xf32>,
    %c0_5 = arith.constant 0 : index
    %c0_6 = arith.constant 0 : index
    %c0_7 = arith.constant 0 : index
    %c0_8 = arith.constant 0 : index
    %4 = vector.load %arg1[%c0_5, %c0_6, %c0_7, %c0_8] : memref<1x16x16x4xf32, #tpu.memory_space<vmem>>, vector<1x16x16x4xf32>
    %5 = vector.shape_cast %4 : vector<1x16x16x4xf32> to vector<16x16x4xf32>
    %c1 = arith.constant 1 : index
    %c1_9 = arith.constant 1 : index
    %c0_10 = arith.constant 0 : index
    %6 = vector.load %arg6[%c1, %c1_9, %c0_10] : memref<18x18x4xf32, #tpu.memory_space<vmem>>, vector<16x16x4xf32>
    tpu.vector_store %arg6[%c1, %c1_9, %c0_10], %5 {strides = array<i32>} : memref<18x18x4xf32, #tpu.memory_space<vmem>>, vector<16x16x4xf32>,
    %c0_11 = arith.constant 0 : index
    %c0_12 = arith.constant 0 : index
    %c0_13 = arith.constant 0 : index
    %7 = vector.load %arg6[%c0_11, %c0_12, %c0_13] : memref<18x18x4xf32, #tpu.memory_space<vmem>>, vector<16x16x4xf32>
    %8 = vector.shape_cast %7 : vector<16x16x4xf32> to vector<256x4xf32>
    %c0_14 = arith.constant 0 : index
    %c0_15 = arith.constant 0 : index
    %9 = vector.load %arg7[%c0_14, %c0_15] : memref<256x128xf32, #tpu.memory_space<vmem>>, vector<256x4xf32>
    tpu.vector_store %arg7[%c0_14, %c0_15], %8 {strides = array<i32>} : memref<256x128xf32, #tpu.memory_space<vmem>>, vector<256x4xf32>,
    %c0_16 = arith.constant 0 : index
    %c1_17 = arith.constant 1 : index
    %c0_18 = arith.constant 0 : index
    %10 = vector.load %arg6[%c0_16, %c1_17, %c0_18] : memref<18x18x4xf32, #tpu.memory_space<vmem>>, vector<16x16x4xf32>
    %11 = vector.shape_cast %10 : vector<16x16x4xf32> to vector<256x4xf32>
    %c0_19 = arith.constant 0 : index
    %c4 = arith.constant 4 : index
    %12 = vector.load %arg7[%c0_19, %c4] : memref<256x128xf32, #tpu.memory_space<vmem>>, vector<256x4xf32>
    tpu.vector_store %arg7[%c0_19, %c4], %11 {strides = array<i32>} : memref<256x128xf32, #tpu.memory_space<vmem>>, vector<256x4xf32>,
    %c0_20 = arith.constant 0 : index
    %c2 = arith.constant 2 : index
    %c0_21 = arith.constant 0 : index
    %13 = vector.load %arg6[%c0_20, %c2, %c0_21] : memref<18x18x4xf32, #tpu.memory_space<vmem>>, vector<16x16x4xf32>
    %14 = vector.shape_cast %13 : vector<16x16x4xf32> to vector<256x4xf32>
    %c0_22 = arith.constant 0 : index
    %c8 = arith.constant 8 : index
    %15 = vector.load %arg7[%c0_22, %c8] : memref<256x128xf32, #tpu.memory_space<vmem>>, vector<256x4xf32>
    tpu.vector_store %arg7[%c0_22, %c8], %14 {strides = array<i32>} : memref<256x128xf32, #tpu.memory_space<vmem>>, vector<256x4xf32>,
    %c1_23 = arith.constant 1 : index
    %c0_24 = arith.constant 0 : index
    %c0_25 = arith.constant 0 : index
    %16 = vector.load %arg6[%c1_23, %c0_24, %c0_25] : memref<18x18x4xf32, #tpu.memory_space<vmem>>, vector<16x16x4xf32>
    %17 = vector.shape_cast %16 : vector<16x16x4xf32> to vector<256x4xf32>
    %c0_26 = arith.constant 0 : index
    %c12 = arith.constant 12 : index
    %18 = vector.load %arg7[%c0_26, %c12] : memref<256x128xf32, #tpu.memory_space<vmem>>, vector<256x4xf32>
    tpu.vector_store %arg7[%c0_26, %c12], %17 {strides = array<i32>} : memref<256x128xf32, #tpu.memory_space<vmem>>, vector<256x4xf32>,
    %c1_27 = arith.constant 1 : index
    %c1_28 = arith.constant 1 : index
    %c0_29 = arith.constant 0 : index
    %19 = vector.load %arg6[%c1_27, %c1_28, %c0_29] : memref<18x18x4xf32, #tpu.memory_space<vmem>>, vector<16x16x4xf32>
    %20 = vector.shape_cast %19 : vector<16x16x4xf32> to vector<256x4xf32>
    %c0_30 = arith.constant 0 : index
    %c16 = arith.constant 16 : index
    %21 = vector.load %arg7[%c0_30, %c16] : memref<256x128xf32, #tpu.memory_space<vmem>>, vector<256x4xf32>
    tpu.vector_store %arg7[%c0_30, %c16], %20 {strides = array<i32>} : memref<256x128xf32, #tpu.memory_space<vmem>>, vector<256x4xf32>,
    %c1_31 = arith.constant 1 : index
    %c2_32 = arith.constant 2 : index
    %c0_33 = arith.constant 0 : index
    %22 = vector.load %arg6[%c1_31, %c2_32, %c0_33] : memref<18x18x4xf32, #tpu.memory_space<vmem>>, vector<16x16x4xf32>
    %23 = vector.shape_cast %22 : vector<16x16x4xf32> to vector<256x4xf32>
    %c0_34 = arith.constant 0 : index
    %c20 = arith.constant 20 : index
    %24 = vector.load %arg7[%c0_34, %c20] : memref<256x128xf32, #tpu.memory_space<vmem>>, vector<256x4xf32>
    tpu.vector_store %arg7[%c0_34, %c20], %23 {strides = array<i32>} : memref<256x128xf32, #tpu.memory_space<vmem>>, vector<256x4xf32>,
    %c2_35 = arith.constant 2 : index
    %c0_36 = arith.constant 0 : index
    %c0_37 = arith.constant 0 : index
    %25 = vector.load %arg6[%c2_35, %c0_36, %c0_37] : memref<18x18x4xf32, #tpu.memory_space<vmem>>, vector<16x16x4xf32>
    %26 = vector.shape_cast %25 : vector<16x16x4xf32> to vector<256x4xf32>
    %c0_38 = arith.constant 0 : index
    %c24 = arith.constant 24 : index
    %27 = vector.load %arg7[%c0_38, %c24] : memref<256x128xf32, #tpu.memory_space<vmem>>, vector<256x4xf32>
    tpu.vector_store %arg7[%c0_38, %c24], %26 {strides = array<i32>} : memref<256x128xf32, #tpu.memory_space<vmem>>, vector<256x4xf32>,
    %c2_39 = arith.constant 2 : index
    %c1_40 = arith.constant 1 : index
    %c0_41 = arith.constant 0 : index
    %28 = vector.load %arg6[%c2_39, %c1_40, %c0_41] : memref<18x18x4xf32, #tpu.memory_space<vmem>>, vector<16x16x4xf32>
    %29 = vector.shape_cast %28 : vector<16x16x4xf32> to vector<256x4xf32>
    %c0_42 = arith.constant 0 : index
    %c28 = arith.constant 28 : index
    %30 = vector.load %arg7[%c0_42, %c28] : memref<256x128xf32, #tpu.memory_space<vmem>>, vector<256x4xf32>
    tpu.vector_store %arg7[%c0_42, %c28], %29 {strides = array<i32>} : memref<256x128xf32, #tpu.memory_space<vmem>>, vector<256x4xf32>,
    %c2_43 = arith.constant 2 : index
    %c2_44 = arith.constant 2 : index
    %c0_45 = arith.constant 0 : index
    %31 = vector.load %arg6[%c2_43, %c2_44, %c0_45] : memref<18x18x4xf32, #tpu.memory_space<vmem>>, vector<16x16x4xf32>
    %32 = vector.shape_cast %31 : vector<16x16x4xf32> to vector<256x4xf32>
    %c0_46 = arith.constant 0 : index
    %c32 = arith.constant 32 : index
    %33 = vector.load %arg7[%c0_46, %c32] : memref<256x128xf32, #tpu.memory_space<vmem>>, vector<256x4xf32>
    tpu.vector_store %arg7[%c0_46, %c32], %32 {strides = array<i32>} : memref<256x128xf32, #tpu.memory_space<vmem>>, vector<256x4xf32>,
    %c0_47 = arith.constant 0 : index
    %c0_48 = arith.constant 0 : index
    %34 = vector.load %arg7[%c0_47, %c0_48] : memref<256x128xf32, #tpu.memory_space<vmem>>, vector<256x128xf32>
    %c0_49 = arith.constant 0 : index
    %c0_50 = arith.constant 0 : index
    %35 = vector.load %arg2[%c0_49, %c0_50] : memref<128x128xf32, #tpu.memory_space<vmem>>, vector<128x128xf32>
    %cst_51 = arith.constant dense<0.000000e+00> : vector<256x128xf32>
    %36 = tpu.matmul %34, %35, %cst_51 {dimension_numbers = #tpu.dot_dimension_numbers<[1], [0], [0], [1], [0, 0, 1, 1], [], []>} : vector<256x128xf32>, vector<128x128xf32>, vector<256x128xf32> -> vector<256x128xf32>
    %c0_52 = arith.constant 0 : index
    %c0_53 = arith.constant 0 : index
    %37 = vector.load %arg3[%c0_52, %c0_53] : memref<1x128xf32, #tpu.memory_space<vmem>>, vector<1x128xf32>
    %38 = vector.broadcast %37 : vector<1x128xf32> to vector<256x128xf32>
    %39 = arith.mulf %36, %38 : vector<256x128xf32>
    %c0_54 = arith.constant 0 : index
    %c0_55 = arith.constant 0 : index
    %40 = vector.load %arg4[%c0_54, %c0_55] : memref<1x128xf32, #tpu.memory_space<vmem>>, vector<1x128xf32>
    %41 = vector.broadcast %40 : vector<1x128xf32> to vector<256x128xf32>
    %42 = arith.addf %39, %41 : vector<256x128xf32>
    %cst_56 = arith.constant 0.000000e+00 : f32
    %43 = vector.broadcast %cst_56 : f32 to vector<256x128xf32>
    %44 = arith.maximumf %42, %43 : vector<256x128xf32>
    %45 = tpu.transpose %44, [1, 0] : vector<256x128xf32> -> vector<128x256xf32>
    %46 = vector.extract_strided_slice %45 {offsets = [0, 0], sizes = [8, 256], strides = [1, 1]} : vector<128x256xf32> to vector<8x256xf32>
    %47 = vector.shape_cast %46 : vector<8x256xf32> to vector<1x8x256xf32>
    %c0_57 = arith.constant 0 : index
    %c0_58 = arith.constant 0 : index
    %c0_59 = arith.constant 0 : index
    %48 = vector.load %arg5[%c0_57, %c0_58, %c0_59] : memref<1x8x256xf32, #tpu.memory_space<vmem>>, vector<1x8x256xf32>
    tpu.vector_store %arg5[%c0_57, %c0_58, %c0_59], %47 {strides = array<i32>} : memref<1x8x256xf32, #tpu.memory_space<vmem>>, vector<1x8x256xf32>,
    return
  }
  func.func @transform_0(%arg0: i32) -> (i32, i32, i32, i32) {
    %c0_i32 = arith.constant 0 : i32
    %c0_i32_0 = arith.constant 0 : i32
    %c0_i32_1 = arith.constant 0 : i32
    %c0_i32_2 = arith.constant 0 : i32
    return %arg0, %c0_i32, %c0_i32_0, %c0_i32_1 : i32, i32, i32, i32
  }
  func.func @transform_1(%arg0: i32) -> (i32, i32) {
    %c0_i32 = arith.constant 0 : i32
    %c0_i32_0 = arith.constant 0 : i32
    %c0_i32_1 = arith.constant 0 : i32
    return %c0_i32, %c0_i32_0 : i32, i32
  }
  func.func @transform_2(%arg0: i32) -> (i32, i32) {
    %c0_i32 = arith.constant 0 : i32
    %c0_i32_0 = arith.constant 0 : i32
    %c0_i32_1 = arith.constant 0 : i32
    return %c0_i32, %c0_i32_0 : i32, i32
  }
  func.func @transform_3(%arg0: i32) -> (i32, i32) {
    %c0_i32 = arith.constant 0 : i32
    %c0_i32_0 = arith.constant 0 : i32
    %c0_i32_1 = arith.constant 0 : i32
    return %c0_i32, %c0_i32_0 : i32, i32
  }
  func.func @transform_4(%arg0: i32) -> (i32, i32, i32) {
    %c0_i32 = arith.constant 0 : i32
    %c0_i32_0 = arith.constant 0 : i32
    %c0_i32_1 = arith.constant 0 : i32
    return %arg0, %c0_i32, %c0_i32_0 : i32, i32, i32
  }
}

</mosaic_0001>

<bundles_post_ra>
// kernel: conv_norm_act.2
= control target key start
LH: loop header
LB: loop body
LE: loop exit
PB: predicated region body
PF: predicated region fallthrough
CT: control target
= control target key end

     0   :  { %s2648_s12 = smov 0   ;;  %s3874_s0 = inlined_call_operand.vmem [shape: f32[2,16,16,4], index: 0, kind: input, shape index: {}]   ;;  %s3875_s1 = inlined_call_operand.vmem [shape: f32[128,128], index: 1, kind: input, shape index: {}]   ;;  %s3876_s2 = inlined_call_operand.vmem [shape: f32[2,1,128], index: 2, kind: output, shape index: {0}]   ;;  %s3877_s3 = inlined_call_operand.vmem [shape: f32[2,1,128], index: 3, kind: output, shape index: {1}]  }
   0x1 LB: > { %s2424_s13 = sadd.s32 4294967295, %s2617_s12   ;;  %p2428_p0 = scmp.ge.s32.totalorder %s2617_s12, 1  ;;  %s2617_s12 = sphi %s2648_s12, %s14_s12  }
   0x2   : > { %p140_p1 = scmp.lt.s32.totalorder %s2617_s12, 3 }
   0x4   : > { %p141_p2 = pnand %p2428_p0, %p140_p1 }
   0x5   : > { %p2658_p3 = scmp.lt.s32.totalorder (!%p141_p2), %s2424_s13, 1  ;;  %s2620_s19 = smov (!%p141_p2), 4  }
   0x6   : > { %144 = sbr.rel (%p141_p2) target bundleno = 987 (0x3db), region = 28  ;;  %s2621_s20 = smov (!%p141_p2), 8  }
   0x7   : > { %s2622_s25 = smov (!%p141_p2), 12   ;;  %s2623_s30 = smov (!%p141_p2), 16  }
   0x8   : > { %s2624_s8 = smov (!%p141_p2), 20   ;;  %s2625_s17 = smov (!%p141_p2), 24  }
   0x9   : > { %s2626_s22 = smov (!%p141_p2), 28   ;;  %s2627_s6 = smov (!%p141_p2), 32  }
   0xb   : > { %vm176_vm0 = vcmask 31744   ;;  %vm179_vm1 = vcmask 25600   ;;  %v2619_v0 = vmov 0.0   ;;  %s3880_s13 = smov (!%p2658_p3, %s2424_s13), 1  ;;  %vm553_vm2 = vcmask 64544  }
   0xc   : > { %177 = vst.msk [vmem:[#allocation2] sm:$0xff] %vm176_vm0, %v2619_v0  ;;  %178 = vst.msk [vmem:[#allocation2 + $0x8] sm:$0xff] %vm176_vm0, %v2619_v0  ;;  %s2433_s15 = sshll.u32 %s3880_s13, 8  ;;  %vm746_vm3 = vcmask 97344   ;;  %vm939_vm4 = vcmask 130144   ;;  %vm1132_vm5 = vcmask 162944   ;;  %s175_s14 = scalar_lea.vmem %s3877_s3, %s3880_s13 }
   0xd   : > { %181 = vst.msk [vmem:[#allocation2 + $0x18] sm:$0xff] %vm176_vm0, %v2619_v0  ;;  %182 = vst.msk [vmem:[#allocation2 + $0x20] sm:$0xff] %vm176_vm0, %v2619_v0  ;;  %s2812_s18 = scalar_lea.vmem %s3874_s0, %s2433_s15  ;;  %vm1325_vm6 = vcmask 195744   ;;  %vm1519_vm7 = vcmask 228544   ;;  %vm1712_vm8 = vcmask 261344   ;;  %vm1905_vm9 = vcmask 294144  }
   0xe   : > { %184 = vst.msk [vmem:[#allocation2 + $0x30] sm:$0xff] %vm176_vm0, %v2619_v0  ;;  %185 = vst.msk [vmem:[#allocation2 + $0x38] sm:$0xff] %vm176_vm0, %v2619_v0  ;;  %v264_v1 = vld [vmem:[%s2812_s18] sm:$0xff]  ;;  %v266_v2 = vld [vmem:[%s2812_s18 + $0x10] sm:$0xff] }
   0xf   : > { %187 = vst.msk [vmem:[#allocation2 + $0x48] sm:$0xff] %vm176_vm0, %v2619_v0  ;;  %188 = vst.msk [vmem:[#allocation2 + $0x50] sm:$0xff] %vm176_vm0, %v2619_v0  ;;  %v265_v3 = vld [vmem:[%s2812_s18 + $0x8] sm:$0xff]  ;;  %v268_v4 = vld [vmem:[%s2812_s18 + $0x20] sm:$0xff] }
  0x10   : > { %190 = vst.msk [vmem:[#allocation2 + $0x60] sm:$0xff] %vm176_vm0, %v2619_v0  ;;  %191 = vst.msk [vmem:[#allocation2 + $0x68] sm:$0xff] %vm176_vm0, %v2619_v0  ;;  %v267_v5 = vld [vmem:[%s2812_s18 + $0x18] sm:$0xff]  ;;  %v270_v6 = vld [vmem:[%s2812_s18 + $0x30] sm:$0xff] }
  0x11   : > { %193 = vst.msk [vmem:[#allocation2 + $0x78] sm:$0xff] %vm176_vm0, %v2619_v0  ;;  %194 = vst.msk [vmem:[#allocation2 + $0x80] sm:$0xff] %vm176_vm0, %v2619_v0  ;;  %v269_v9 = vld [vmem:[%s2812_s18 + $0x28] sm:$0xff]  ;;  %v272_v10 = vld [vmem:[%s2812_s18 + $0x40] sm:$0xff] }
  0x12   : > { %196 = vst.msk [vmem:[#allocation2 + $0x90] sm:$0xff] %vm176_vm0, %v2619_v0  ;;  %197 = vst.msk [vmem:[#allocation2 + $0x98] sm:$0xff] %vm176_vm0, %v2619_v0  ;;  %v271_v11 = vld [vmem:[%s2812_s18 + $0x38] sm:$0xff]  ;;  %v274_v12 = vld [vmem:[%s2812_s18 + $0x50] sm:$0xff] }
  0x13   : > { %199 = vst.msk [vmem:[#allocation2 + $0xa8] sm:$0xff] %vm176_vm0, %v2619_v0  ;;  %200 = vst.msk [vmem:[#allocation2 + $0xb0] sm:$0xff] %vm176_vm0, %v2619_v0  ;;  %v393_v7 = vld [vmem:[#allocation2 + $0x1] sm:$0xff]  ;;  %v275_v15 = vld [vmem:[%s2812_s18 + $0x58] sm:$0xff] }
  0x14   : > { %202 = vst.msk [vmem:[#allocation2 + $0xc0] sm:$0xff] %vm176_vm0, %v2619_v0  ;;  %203 = vst.msk [vmem:[#allocation2 + $0xc8] sm:$0xff] %vm176_vm0, %v2619_v0  ;;  %457 = vrot.lane.b32.xlu0 %v393_v7, %s2620_s19  ;;  %v273_v13 = vld [vmem:[%s2812_s18 + $0x48] sm:$0xff]  ;;  %v276_v14 = vld [vmem:[%s2812_s18 + $0x60] sm:$0xff] }
  0x15   : > { %205 = vst.msk [vmem:[#allocation2 + $0xd8] sm:$0xff] %vm176_vm0, %v2619_v0  ;;  %206 = vst.msk [vmem:[#allocation2 + $0xe0] sm:$0xff] %vm176_vm0, %v2619_v0  ;;  %v278_v16 = vld [vmem:[%s2812_s18 + $0x70] sm:$0xff]  ;;  %v277_v17 = vld [vmem:[%s2812_s18 + $0x68] sm:$0xff] }
  0x16   : > { %208 = vst.msk [vmem:[#allocation2 + $0xf0] sm:$0xff] %vm176_vm0, %v2619_v0  ;;  %209 = vst.msk [vmem:[#allocation2 + $0xf8] sm:$0xff] %vm176_vm0, %v2619_v0  ;;  %v280_v18 = vld [vmem:[%s2812_s18 + $0x80] sm:$0xff]  ;;  %v279_v19 = vld [vmem:[%s2812_s18 + $0x78] sm:$0xff] }
  0x17   : > { %211 = vst.msk [vmem:[#allocation2 + $0x108] sm:$0xff] %vm176_vm0, %v2619_v0  ;;  %212 = vst.msk [vmem:[#allocation2 + $0x110] sm:$0xff] %vm176_vm0, %v2619_v0  ;;  %v282_v20 = vld [vmem:[%s2812_s18 + $0x90] sm:$0xff]  ;;  %v281_v21 = vld [vmem:[%s2812_s18 + $0x88] sm:$0xff] }
  0x18   : > { %214 = vst.msk [vmem:[#allocation2 + $0x120] sm:$0xff] %vm176_vm0, %v2619_v0  ;;  %215 = vst.msk [vmem:[#allocation2 + $0x128] sm:$0xff] %vm176_vm0, %v2619_v0  ;;  %v284_v22 = vld [vmem:[%s2812_s18 + $0xa0] sm:$0xff]  ;;  %v283_v23 = vld [vmem:[%s2812_s18 + $0x98] sm:$0xff] }
  0x19   : > { %217 = vst.msk [vmem:[#allocation2 + $0x138] sm:$0xff] %vm176_vm0, %v2619_v0  ;;  %218 = vst.msk [vmem:[#allocation2 + $0x140] sm:$0xff] %vm176_vm0, %v2619_v0  ;;  %v286_v24 = vld [vmem:[%s2812_s18 + $0xb0] sm:$0xff]  ;;  %v285_v28 = vld [vmem:[%s2812_s18 + $0xa8] sm:$0xff] }
  0x1a   : > { %220 = vst.msk [vmem:[#allocation2 + $0x150] sm:$0xff] %vm176_vm0, %v2619_v0  ;;  %221 = vst.msk [vmem:[#allocation2 + $0x158] sm:$0xff] %vm176_vm0, %v2619_v0  ;;  %v288_v29 = vld [vmem:[%s2812_s18 + $0xc0] sm:$0xff]  ;;  %v287_v33 = vld [vmem:[%s2812_s18 + $0xb8] sm:$0xff] }
  0x1b   : > { %223 = vst.msk [vmem:[#allocation2 + $0x168] sm:$0xff] %vm176_vm0, %v2619_v0  ;;  %224 = vst.msk [vmem:[#allocation2 + $0x170] sm:$0xff] %vm176_vm0, %v2619_v0  ;;  %v290_v34 = vld [vmem:[%s2812_s18 + $0xd0] sm:$0xff]  ;;  %v289_v35 = vld [vmem:[%s2812_s18 + $0xc8] sm:$0xff] }
  0x1c   : > { %226 = vst.msk [vmem:[#allocation2 + $0x180] sm:$0xff] %vm176_vm0, %v2619_v0  ;;  %227 = vst.msk [vmem:[#allocation2 + $0x188] sm:$0xff] %vm176_vm0, %v2619_v0  ;;  %v292_v36 = vld [vmem:[%s2812_s18 + $0xe0] sm:$0xff]  ;;  %v291_v37 = vld [vmem:[%s2812_s18 + $0xd8] sm:$0xff] }
  0x1d   : > { %229 = vst.msk [vmem:[#allocation2 + $0x198] sm:$0xff] %vm176_vm0, %v2619_v0  ;;  %230 = vst.msk [vmem:[#allocation2 + $0x1a0] sm:$0xff] %vm176_vm0, %v2619_v0  ;;  %v293_v39 = vld [vmem:[%s2812_s18 + $0xe8] sm:$0xff]  ;;  %v329_v49 = vld [vmem:[#allocation2] sm:$0xff] }
  0x1e   : > { %232 = vst [vmem:[#allocation3] sm:$0xff] %v2619_v0  ;;  %233 = vst [vmem:[#allocation3 + $0x8] sm:$0xff] %v2619_v0  ;;  %v330_v50 = vld [vmem:[#allocation2 + $0x8] sm:$0xff] }
  0x1f   : > { %234 = vst [vmem:[#allocation3 + $0x10] sm:$0xff] %v2619_v0  ;;  %235 = vst [vmem:[#allocation3 + $0x18] sm:$0xff] %v2619_v0 }
  0x20   : > { %236 = vst [vmem:[#allocation3 + $0x20] sm:$0xff] %v2619_v0  ;;  %237 = vst [vmem:[#allocation3 + $0x28] sm:$0xff] %v2619_v0 }
  0x21   : > { %238 = vst [vmem:[#allocation3 + $0x30] sm:$0xff] %v2619_v0  ;;  %239 = vst [vmem:[#allocation3 + $0x38] sm:$0xff] %v2619_v0 }
  0x22   : > { %240 = vst [vmem:[#allocation3 + $0x40] sm:$0xff] %v2619_v0  ;;  %241 = vst [vmem:[#allocation3 + $0x48] sm:$0xff] %v2619_v0 }
  0x23   : > { %242 = vst [vmem:[#allocation3 + $0x50] sm:$0xff] %v2619_v0  ;;  %243 = vst [vmem:[#allocation3 + $0x58] sm:$0xff] %v2619_v0 }
  0x24   : > { %244 = vst [vmem:[#allocation3 + $0x60] sm:$0xff] %v2619_v0  ;;  %245 = vst [vmem:[#allocation3 + $0x68] sm:$0xff] %v2619_v0 }
  0x25   : > { %246 = vst [vmem:[#allocation3 + $0x70] sm:$0xff] %v2619_v0  ;;  %247 = vst [vmem:[#allocation3 + $0x78] sm:$0xff] %v2619_v0 }
  0x26   : > { %248 = vst [vmem:[#allocation3 + $0x80] sm:$0xff] %v2619_v0  ;;  %249 = vst [vmem:[#allocation3 + $0x88] sm:$0xff] %v2619_v0 }
  0x27   : > { %250 = vst [vmem:[#allocation3 + $0x90] sm:$0xff] %v2619_v0  ;;  %251 = vst [vmem:[#allocation3 + $0x98] sm:$0xff] %v2619_v0 }
  0x28   : > { %252 = vst [vmem:[#allocation3 + $0xa0] sm:$0xff] %v2619_v0  ;;  %253 = vst [vmem:[#allocation3 + $0xa8] sm:$0xff] %v2619_v0 }
  0x29   : > { %254 = vst [vmem:[#allocation3 + $0xb0] sm:$0xff] %v2619_v0  ;;  %255 = vst [vmem:[#allocation3 + $0xb8] sm:$0xff] %v2619_v0 }
  0x2a   : > { %256 = vst [vmem:[#allocation3 + $0xc0] sm:$0xff] %v2619_v0  ;;  %257 = vst [vmem:[#allocation3 + $0xc8] sm:$0xff] %v2619_v0 }
  0x2b   : > { %258 = vst [vmem:[#allocation3 + $0xd0] sm:$0xff] %v2619_v0  ;;  %259 = vst [vmem:[#allocation3 + $0xd8] sm:$0xff] %v2619_v0 }
  0x2c   : > { %260 = vst [vmem:[#allocation3 + $0xe0] sm:$0xff] %v2619_v0  ;;  %261 = vst [vmem:[#allocation3 + $0xe8] sm:$0xff] %v2619_v0 }
  0x2d   : > { %262 = vst [vmem:[#allocation3 + $0xf0] sm:$0xff] %v2619_v0  ;;  %263 = vst [vmem:[#allocation3 + $0xf8] sm:$0xff] %v2619_v0 }
  0x2e   : > { %180 = vst.msk [vmem:[#allocation2 + $0x10] sm:$0x3] %vm179_vm1, %v2619_v0  ;;  %183 = vst.msk [vmem:[#allocation2 + $0x28] sm:$0x3] %vm179_vm1, %v2619_v0 }
  0x2f   : > { %186 = vst.msk [vmem:[#allocation2 + $0x40] sm:$0x3] %vm179_vm1, %v2619_v0  ;;  %189 = vst.msk [vmem:[#allocation2 + $0x58] sm:$0x3] %vm179_vm1, %v2619_v0 }
  0x30   : > { %192 = vst.msk [vmem:[#allocation2 + $0x70] sm:$0x3] %vm179_vm1, %v2619_v0  ;;  %195 = vst.msk [vmem:[#allocation2 + $0x88] sm:$0x3] %vm179_vm1, %v2619_v0 }
  0x31   : > { %198 = vst.msk [vmem:[#allocation2 + $0xa0] sm:$0x3] %vm179_vm1, %v2619_v0  ;;  %201 = vst.msk [vmem:[#allocation2 + $0xb8] sm:$0x3] %vm179_vm1, %v2619_v0 }
  0x32   : > { %204 = vst.msk [vmem:[#allocation2 + $0xd0] sm:$0x3] %vm179_vm1, %v2619_v0  ;;  %207 = vst.msk [vmem:[#allocation2 + $0xe8] sm:$0x3] %vm179_vm1, %v2619_v0 }
  0x33   : > { %210 = vst.msk [vmem:[#allocation2 + $0x100] sm:$0x3] %vm179_vm1, %v2619_v0  ;;  %213 = vst.msk [vmem:[#allocation2 + $0x118] sm:$0x3] %vm179_vm1, %v2619_v0 }
  0x34   : > { %216 = vst.msk [vmem:[#allocation2 + $0x130] sm:$0x3] %vm179_vm1, %v2619_v0  ;;  %219 = vst.msk [vmem:[#allocation2 + $0x148] sm:$0x3] %vm179_vm1, %v2619_v0 }
  0x35   : > { %222 = vst.msk [vmem:[#allocation2 + $0x160] sm:$0x3] %vm179_vm1, %v2619_v0  ;;  %225 = vst.msk [vmem:[#allocation2 + $0x178] sm:$0x3] %vm179_vm1, %v2619_v0  ;;  %v394_v8 = vld [vmem:[#allocation2 + $0x9] sm:$0xff] }
  0x36   : > { %228 = vst.msk [vmem:[#allocation2 + $0x190] sm:$0x3] %vm179_vm1, %v2619_v0  ;;  %231 = vst.msk [vmem:[#allocation2 + $0x1a8] sm:$0x3] %vm179_vm1, %v2619_v0  ;;  %459 = vrot.lane.b32.xlu0 %v394_v8, %s2620_s19 }
  0x37   : > { %297 = vst.msk [vmem:[#allocation2 + $0x19] sm:$0xff] %vm176_vm0, %v264_v1  ;;  %299 = vst.msk [vmem:[#allocation2 + $0x31] sm:$0xff] %vm176_vm0, %v266_v2 }
  0x38   : > { %298 = vst.msk [vmem:[#allocation2 + $0x21] sm:$0xff] %vm176_vm0, %v265_v3  ;;  %301 = vst.msk [vmem:[#allocation2 + $0x49] sm:$0xff] %vm176_vm0, %v268_v4 }
  0x39   : > { %300 = vst.msk [vmem:[#allocation2 + $0x39] sm:$0xff] %vm176_vm0, %v267_v5  ;;  %303 = vst.msk [vmem:[#allocation2 + $0x61] sm:$0xff] %vm176_vm0, %v270_v6 }
  0x3a   : > { %302 = vst.msk [vmem:[#allocation2 + $0x51] sm:$0xff] %vm176_vm0, %v269_v9  ;;  %305 = vst.msk [vmem:[#allocation2 + $0x79] sm:$0xff] %vm176_vm0, %v272_v10 }
  0x3b   : > { %304 = vst.msk [vmem:[#allocation2 + $0x69] sm:$0xff] %vm176_vm0, %v271_v11  ;;  %307 = vst.msk [vmem:[#allocation2 + $0x91] sm:$0xff] %vm176_vm0, %v274_v12 }
  0x3c   : > { %306 = vst.msk [vmem:[#allocation2 + $0x81] sm:$0xff] %vm176_vm0, %v273_v13  ;;  %309 = vst.msk [vmem:[#allocation2 + $0xa9] sm:$0xff] %vm176_vm0, %v276_v14 }
  0x3d   : > { %308 = vst.msk [vmem:[#allocation2 + $0x99] sm:$0xff] %vm176_vm0, %v275_v15  ;;  %311 = vst.msk [vmem:[#allocation2 + $0xc1] sm:$0xff] %vm176_vm0, %v278_v16 }
  0x3e   : > { %310 = vst.msk [vmem:[#allocation2 + $0xb1] sm:$0xff] %vm176_vm0, %v277_v17  ;;  %313 = vst.msk [vmem:[#allocation2 + $0xd9] sm:$0xff] %vm176_vm0, %v280_v18  ;;  %v2857_v25 = vld [vmem:[#allocation2 + $0x19] sm:$0xff]  ;;  %v2859_v26 = vld [vmem:[#allocation2 + $0x31] sm:$0xff] }
  0x3f   : > { %312 = vst.msk [vmem:[#allocation2 + $0xc9] sm:$0xff] %vm176_vm0, %v279_v19  ;;  %315 = vst.msk [vmem:[#allocation2 + $0xf1] sm:$0xff] %vm176_vm0, %v282_v20  ;;  %461 = vrot.lane.b32.xlu1 %v2857_v25, %s2620_s19  ;;  %v2866_v27 = vld [vmem:[#allocation2 + $0x21] sm:$0xff]  ;;  %465 = vrot.lane.b32.xlu0 %v2859_v26, %s2620_s19  ;;  %v2874_v30 = vld [vmem:[#allocation2 + $0x49] sm:$0xff] }
  0x40   : > { %314 = vst.msk [vmem:[#allocation2 + $0xe1] sm:$0xff] %vm176_vm0, %v281_v21  ;;  %317 = vst.msk [vmem:[#allocation2 + $0x109] sm:$0xff] %vm176_vm0, %v284_v22  ;;  %v2878_v31 = vld [vmem:[#allocation2 + $0x39] sm:$0xff]  ;;  %v2882_v32 = vld [vmem:[#allocation2 + $0x61] sm:$0xff] }
  0x41   : > { %316 = vst.msk [vmem:[#allocation2 + $0xf9] sm:$0xff] %vm176_vm0, %v283_v23  ;;  %319 = vst.msk [vmem:[#allocation2 + $0x121] sm:$0xff] %vm176_vm0, %v286_v24  ;;  %v2894_v38 = vld [vmem:[#allocation2 + $0x51] sm:$0xff]  ;;  %v2902_v40 = vld [vmem:[#allocation2 + $0x79] sm:$0xff] }
  0x42   : > { %318 = vst.msk [vmem:[#allocation2 + $0x111] sm:$0xff] %vm176_vm0, %v285_v28  ;;  %321 = vst.msk [vmem:[#allocation2 + $0x139] sm:$0xff] %vm176_vm0, %v288_v29  ;;  %v2906_v41 = vld [vmem:[#allocation2 + $0x69] sm:$0xff]  ;;  %v2910_v42 = vld [vmem:[#allocation2 + $0x20] sm:$0xff] }
  0x43   : > { %463 = vrot.lane.b32.xlu1 %v2866_v27, %s2620_s19  ;;  %469 = vrot.lane.b32.xlu0 %v2874_v30, %s2620_s19  ;;  %320 = vst.msk [vmem:[#allocation2 + $0x129] sm:$0xff] %vm176_vm0, %v287_v33  ;;  %323 = vst.msk [vmem:[#allocation2 + $0x151] sm:$0xff] %vm176_vm0, %v290_v34  ;;  %v2912_v43 = vld [vmem:[#allocation2 + $0x18] sm:$0xff]  ;;  %v2914_v44 = vld [vmem:[#allocation2 + $0x30] sm:$0xff] }
  0x44   : > { %322 = vst.msk [vmem:[#allocation2 + $0x141] sm:$0xff] %vm176_vm0, %v289_v35  ;;  %325 = vst.msk [vmem:[#allocation2 + $0x169] sm:$0xff] %vm176_vm0, %v292_v36  ;;  %v2916_v45 = vld [vmem:[#allocation2 + $0x91] sm:$0xff]  ;;  %v2926_v46 = vld [vmem:[#allocation2 + $0x81] sm:$0xff] }
  0x45   : > { %324 = vst.msk [vmem:[#allocation2 + $0x159] sm:$0xff] %vm176_vm0, %v291_v37  ;;  %326 = vst.msk [vmem:[#allocation2 + $0x171] sm:$0xff] %vm176_vm0, %v293_v39  ;;  %v2928_v47 = vld [vmem:[#allocation2 + $0x38] sm:$0xff]  ;;  %v2930_v48 = vld [vmem:[#allocation2 + $0xa9] sm:$0xff] }
  0x46   : > { %363 = vst.msk [vmem:[#allocation3 + $0x10] sm:$0xff] %vm176_vm0, %v2912_v43  ;;  %365 = vst.msk [vmem:[#allocation3 + $0x20] sm:$0xff] %vm176_vm0, %v2914_v44  ;;  %v2938_v51 = vld [vmem:[#allocation2 + $0x48] sm:$0xff]  ;;  %v2940_v52 = vld [vmem:[#allocation2 + $0x60] sm:$0xff] }
  0x47   : > { %467 = vrot.lane.b32.xlu1 %v2878_v31, %s2620_s19  ;;  %473 = vrot.lane.b32.xlu0 %v2882_v32, %s2620_s19  ;;  %364 = vst.msk [vmem:[#allocation3 + $0x18] sm:$0xff] %vm176_vm0, %v2910_v42  ;;  %366 = vst.msk [vmem:[#allocation3 + $0x28] sm:$0xff] %vm176_vm0, %v2928_v47  ;;  %v2942_v53 = vld [vmem:[#allocation2 + $0x50] sm:$0xff]  ;;  %v2944_v54 = vld [vmem:[#allocation2 + $0x99] sm:$0xff] }
  0x48   : > { %361 = vst.msk [vmem:[#allocation3] sm:$0xff] %vm176_vm0, %v329_v49  ;;  %362 = vst.msk [vmem:[#allocation3 + $0x8] sm:$0xff] %vm176_vm0, %v330_v50  ;;  %v2952_v55 = vld [vmem:[#allocation2 + $0x78] sm:$0xff]  ;;  %v2954_v56 = vld [vmem:[#allocation2 + $0x68] sm:$0xff] }
  0x49   : > { %367 = vst.msk [vmem:[#allocation3 + $0x30] sm:$0xff] %vm176_vm0, %v2938_v51  ;;  %369 = vst.msk [vmem:[#allocation3 + $0x40] sm:$0xff] %vm176_vm0, %v2940_v52  ;;  %v2956_v57 = vld [vmem:[#allocation2 + $0x90] sm:$0xff]  ;;  %v2966_v58 = vld [vmem:[#allocation2 + $0x80] sm:$0xff] }
  0x4a   : > { %368 = vst.msk [vmem:[#allocation3 + $0x38] sm:$0xff] %vm176_vm0, %v2942_v53  ;;  %371 = vst.msk [vmem:[#allocation3 + $0x50] sm:$0xff] %vm176_vm0, %v2952_v55  ;;  %v2968_v59 = vld [vmem:[#allocation2 + $0xa8] sm:$0xff]  ;;  %v2970_v60 = vld [vmem:[#allocation2 + $0x98] sm:$0xff] }
  0x4b   : > { %471 = vrot.lane.b32.xlu1 %v2894_v38, %s2620_s19  ;;  %477 = vrot.lane.b32.xlu0 %v2902_v40, %s2620_s19  ;;  %370 = vst.msk [vmem:[#allocation3 + $0x48] sm:$0xff] %vm176_vm0, %v2954_v56  ;;  %373 = vst.msk [vmem:[#allocation3 + $0x60] sm:$0xff] %vm176_vm0, %v2956_v57  ;;  %v2978_v61 = vld [vmem:[#allocation2 + $0xc0] sm:$0xff]  ;;  %v2980_v62 = vld [vmem:[#allocation2 + $0xb0] sm:$0xff] }
  0x4c   : > { %372 = vst.msk [vmem:[#allocation3 + $0x58] sm:$0xff] %vm176_vm0, %v2966_v58  ;;  %375 = vst.msk [vmem:[#allocation3 + $0x70] sm:$0xff] %vm176_vm0, %v2968_v59  ;;  %v2982_v63 = vld [vmem:[#allocation2 + $0xd8] sm:$0xff]  ;;  %v2992_v0 = vld [vmem:[#allocation2 + $0xc8] sm:$0xff] }
  0x4d   : > { %374 = vst.msk [vmem:[#allocation3 + $0x68] sm:$0xff] %vm176_vm0, %v2970_v60  ;;  %377 = vst.msk [vmem:[#allocation3 + $0x80] sm:$0xff] %vm176_vm0, %v2978_v61  ;;  %v2994_v1 = vld [vmem:[#allocation2 + $0xf0] sm:$0xff]  ;;  %v2996_v2 = vld [vmem:[#allocation2 + $0xe0] sm:$0xff] }
  0x4e   : > { %376 = vst.msk [vmem:[#allocation3 + $0x78] sm:$0xff] %vm176_vm0, %v2980_v62  ;;  %379 = vst.msk [vmem:[#allocation3 + $0x90] sm:$0xff] %vm176_vm0, %v2982_v63  ;;  %v409_v3 = vld [vmem:[#allocation2 + $0xc1] sm:$0xff]  ;;  %v3010_v5 = vld [vmem:[#allocation2 + $0xb1] sm:$0xff] }
  0x4f   : > { %475 = vrot.lane.b32.xlu1 %v2906_v41, %s2620_s19  ;;  %481 = vrot.lane.b32.xlu0 %v2916_v45, %s2620_s19  ;;  %378 = vst.msk [vmem:[#allocation3 + $0x88] sm:$0xff] %vm176_vm0, %v2992_v0  ;;  %381 = vst.msk [vmem:[#allocation3 + $0xa0] sm:$0xff] %vm176_vm0, %v2994_v1  ;;  %v3004_v4 = vld [vmem:[#allocation2 + $0x108] sm:$0xff]  ;;  %v3012_v6 = vld [vmem:[#allocation2 + $0xf8] sm:$0xff] }
  0x50   : > { %380 = vst.msk [vmem:[#allocation3 + $0x98] sm:$0xff] %vm176_vm0, %v2996_v2  ;;  %383 = vst.msk [vmem:[#allocation3 + $0xb0] sm:$0xff] %vm176_vm0, %v3004_v4  ;;  %v411_v7 = vld [vmem:[#allocation2 + $0xd9] sm:$0xff]  ;;  %v410_v9 = vld [vmem:[#allocation2 + $0xc9] sm:$0xff] }
  0x51   : > { %382 = vst.msk [vmem:[#allocation3 + $0xa8] sm:$0xff] %vm176_vm0, %v3012_v6  ;;  %v3017_v8 = vld [vmem:[#allocation2 + $0x120] sm:$0xff]  ;;  %v3023_v10 = vld [vmem:[#allocation2 + $0x110] sm:$0xff]  ;;  %v355_v12 = vld [vmem:[#allocation2 + $0x138] sm:$0xff] }
  0x52   : > { %385 = vst.msk [vmem:[#allocation3 + $0xc0] sm:$0xff] %vm176_vm0, %v3017_v8  ;;  %384 = vst.msk [vmem:[#allocation3 + $0xb8] sm:$0xff] %vm176_vm0, %v3023_v10  ;;  %v413_v11 = vld [vmem:[#allocation2 + $0xf1] sm:$0xff]  ;;  %v412_v13 = vld [vmem:[#allocation2 + $0xe1] sm:$0xff] }
  0x53   : > { %479 = vrot.lane.b32.xlu1 %v2926_v46, %s2620_s19  ;;  %485 = vrot.lane.b32.xlu0 %v2930_v48, %s2620_s19  ;;  %387 = vst.msk [vmem:[#allocation3 + $0xd0] sm:$0xff] %vm176_vm0, %v355_v12  ;;  %v3030_v14 = vld [vmem:[#allocation2 + $0x128] sm:$0xff]  ;;  %v357_v16 = vld [vmem:[#allocation2 + $0x150] sm:$0xff]  ;;  %v414_v17 = vld [vmem:[#allocation2 + $0xf9] sm:$0xff] }
  0x54   : > { %386 = vst.msk [vmem:[#allocation3 + $0xc8] sm:$0xff] %vm176_vm0, %v3030_v14  ;;  %v415_v15 = vld [vmem:[#allocation2 + $0x109] sm:$0xff]  ;;  %389 = vst.msk [vmem:[#allocation3 + $0xe0] sm:$0xff] %vm176_vm0, %v357_v16  ;;  %v356_v18 = vld [vmem:[#allocation2 + $0x140] sm:$0xff] }
  0x55   : > { %388 = vst.msk [vmem:[#allocation3 + $0xd8] sm:$0xff] %vm176_vm0, %v356_v18  ;;  %v417_v19 = vld [vmem:[#allocation2 + $0x121] sm:$0xff]  ;;  %v416_v21 = vld [vmem:[#allocation2 + $0x111] sm:$0xff]  ;;  %v419_v23 = vld [vmem:[#allocation2 + $0x139] sm:$0xff] }
  0x56   : > { %v359_v20 = vld [vmem:[#allocation2 + $0x168] sm:$0xff]  ;;  %v358_v22 = vld [vmem:[#allocation2 + $0x158] sm:$0xff]  ;;  %v360_v28 = vld [vmem:[#allocation2 + $0x170] sm:$0xff] }
  0x57   : > { %483 = vrot.lane.b32.xlu1 %v2944_v54, %s2620_s19  ;;  %489 = vrot.lane.b32.xlu0 %v409_v3, %s2620_s19  ;;  %391 = vst.msk [vmem:[#allocation3 + $0xf0] sm:$0xff] %vm176_vm0, %v359_v20  ;;  %390 = vst.msk [vmem:[#allocation3 + $0xe8] sm:$0xff] %vm176_vm0, %v358_v22  ;;  %v418_v24 = vld [vmem:[#allocation2 + $0x129] sm:$0xff]  ;;  %v421_v29 = vld [vmem:[#allocation2 + $0x151] sm:$0xff] }
  0x58   : > { %392 = vst.msk [vmem:[#allocation3 + $0xf8] sm:$0xff] %vm176_vm0, %v360_v28  ;;  %v420_v33 = vld [vmem:[#allocation2 + $0x141] sm:$0xff]  ;;  %v423_v34 = vld [vmem:[#allocation2 + $0x169] sm:$0xff]  ;;  %v422_v35 = vld [vmem:[#allocation2 + $0x159] sm:$0xff] }
  0x59   : > { %v586_v36 = vld [vmem:[#allocation2 + $0x2] sm:$0xff]  ;;  %v424_v37 = vld [vmem:[#allocation2 + $0x171] sm:$0xff]  ;;  %v588_v39 = vld [vmem:[#allocation2 + $0x1a] sm:$0xff] }
  0x5a   : > { %v587_v49 = vld [vmem:[#allocation2 + $0xa] sm:$0xff]  ;;  %v3054_v50 = vld [vmem:[#allocation2 + $0x32] sm:$0xff]  ;;  %v589_v3 = vld [vmem:[#allocation2 + $0x22] sm:$0xff] }
  0x5b   : > { %487 = vrot.lane.b32.xlu1 %v3010_v5, %s2620_s19  ;;  %493 = vrot.lane.b32.xlu0 %v411_v7, %s2620_s19  ;;  %v3059_v7 = vld [vmem:[#allocation2 + $0x4a] sm:$0xff]  ;;  %v3070_v12 = vld [vmem:[#allocation2 + $0x52] sm:$0xff] }
  0x5c   : > { %v3082_v16 = vld [vmem:[#allocation2 + $0x92] sm:$0xff]  ;;  %v1983_v20 = vld [vmem:[%s3875_s1 + $0x68] sm:$0xff] }
  0x5d   : > { %v1985_v18 = vld [vmem:[%s3875_s1 + $0x78] sm:$0xff] }
  0x5e   : > { %2482 = vmatprep.subr.mxu0 %v1985_v18  ;;  %2562 = vmatprep.subr.mxu1 %v1985_v18  ;;  %v1977_v22 = vld [vmem:[%s3875_s1 + $0x38] sm:$0xff] }
  0x5f   : > { %491 = vrot.lane.b32.xlu1 %v410_v9, %s2620_s19  ;;  %497 = vrot.lane.b32.xlu0 %v413_v11, %s2620_s19  ;;  %v3062_v9 = vld [vmem:[#allocation2 + $0x3a] sm:$0xff]  ;;  %v3066_v11 = vld [vmem:[#allocation2 + $0x62] sm:$0xff] }
  0x60   : > { %2483 = vmatpush3.msra.mxu0 %v1985_v18  ;;  %2578 = vmatpush3.msra.mxu1 %v1985_v18  ;;  %v1973_v28 = vld [vmem:[%s3875_s1 + $0x18] sm:$0xff] }
  0x63   : > { %495 = vrot.lane.b32.xlu1 %v412_v13, %s2620_s19  ;;  %501 = vrot.lane.b32.xlu0 %v415_v15, %s2620_s19  ;;  %v3074_v13 = vld [vmem:[#allocation2 + $0x7a] sm:$0xff]  ;;  %v3078_v15 = vld [vmem:[#allocation2 + $0x6a] sm:$0xff] }
  0x67   : > { %499 = vrot.lane.b32.xlu1 %v414_v17, %s2620_s19  ;;  %505 = vrot.lane.b32.xlu0 %v417_v19, %s2620_s19  ;;  %v3086_v17 = vld [vmem:[#allocation2 + $0x82] sm:$0xff]  ;;  %v1984_v19 = vld [vmem:[%s3875_s1 + $0x70] sm:$0xff] }
  0x68   : > { %2484 = vmatprep.subr.mxu0 %v1984_v19  ;;  %2563 = vmatprep.subr.mxu1 %v1984_v19 }
  0x69   : > { %2485 = vmatpush3.msra.mxu0 %v1984_v19  ;;  %2579 = vmatpush3.msra.mxu1 %v1984_v19 }
  0x6a   : > { %2486 = vmatprep.subr.mxu0 %v1983_v20  ;;  %2564 = vmatprep.subr.mxu1 %v1983_v20 }
  0x6b   : > { %503 = vrot.lane.b32.xlu1 %v416_v21, %s2620_s19  ;;  %509 = vrot.lane.b32.xlu0 %v419_v23, %s2620_s19  ;;  %v1982_v21 = vld [vmem:[%s3875_s1 + $0x60] sm:$0xff]  ;;  %v1976_v23 = vld [vmem:[%s3875_s1 + $0x30] sm:$0xff] }
  0x6c   : > { %2487 = vmatpush3.msra.mxu0 %v1983_v20  ;;  %2580 = vmatpush3.msra.mxu1 %v1983_v20 }
  0x6d   : > { %2488 = vmatprep.subr.mxu0 %v1982_v21  ;;  %2565 = vmatprep.subr.mxu1 %v1982_v21 }
  0x6e   : > { %2489 = vmatpush3.msra.mxu0 %v1982_v21  ;;  %2581 = vmatpush3.msra.mxu1 %v1982_v21 }
  0x6f   : > { %507 = vrot.lane.b32.xlu1 %v418_v24, %s2620_s19  ;;  %513 = vrot.lane.b32.xlu0 %v421_v29, %s2620_s19  ;;  %v1975_v24 = vld [vmem:[%s3875_s1 + $0x28] sm:$0xff] }
  0x73   : > { %511 = vrot.lane.b32.xlu1 %v420_v33, %s2620_s19  ;;  %517 = vrot.lane.b32.xlu0 %v423_v34, %s2620_s19  ;;  %v1972_v33 = vld [vmem:[%s3875_s1 + $0x10] sm:$0xff]  ;;  %v1970_v34 = vld [vmem:[%s3875_s1] sm:$0xff] }
  0x77   : > { %515 = vrot.lane.b32.xlu1 %v422_v35, %s2620_s19  ;;  %650 = vrot.lane.b32.xlu0 %v586_v36, %s2621_s20 }
  0x7b   : > { %519 = vrot.lane.b32.xlu1 %v424_v37, %s2620_s19  ;;  %654 = vrot.lane.b32.xlu0 %v588_v39, %s2621_s20 }
  0x7f   : > { %652 = vrot.lane.b32.xlu1 %v587_v49, %s2621_s20  ;;  %658 = vrot.lane.b32.xlu0 %v3054_v50, %s2621_s20 }
  0x83   : > { %656 = vrot.lane.b32.xlu1 %v589_v3, %s2621_s20  ;;  %662 = vrot.lane.b32.xlu0 %v3059_v7, %s2621_s20 }
  0x86   : > { %v458_v29 = vpop.permute.xlu0 %457 }
  0x87   : > { %660 = vrot.lane.b32.xlu1 %v3062_v9, %s2621_s20  ;;  %666 = vrot.lane.b32.xlu0 %v3066_v11, %s2621_s20  ;;  %554 = vst.msk [vmem:[#allocation3] sm:$0xff] %vm553_vm2, %v458_v29 }
  0x8b   : > { %664 = vrot.lane.b32.xlu1 %v3070_v12, %s2621_s20  ;;  %670 = vrot.lane.b32.xlu0 %v3074_v13, %s2621_s20 }
  0x8f   : > { %668 = vrot.lane.b32.xlu1 %v3078_v15, %s2621_s20  ;;  %674 = vrot.lane.b32.xlu0 %v3082_v16, %s2621_s20 }
  0x93   : > { %672 = vrot.lane.b32.xlu1 %v3086_v17, %s2621_s20  ;;  %845 = vrot.lane.b32.xlu0 %v2910_v42, %s2622_s25  ;;  %v1981_v42 = vld [vmem:[%s3875_s1 + $0x58] sm:$0xff] }
  0x94   : > { %2490 = vmatprep.subr.mxu0 %v1981_v42  ;;  %2566 = vmatprep.subr.mxu1 %v1981_v42 }
  0x95   : > { %2491 = vmatpush3.msra.mxu0 %v1981_v42  ;;  %2582 = vmatpush3.msra.mxu1 %v1981_v42 }
  0x97   : > { %843 = vrot.lane.b32.xlu1 %v2912_v43, %s2622_s25  ;;  %1038 = vrot.lane.b32.xlu0 %v2866_v27, %s2623_s30  ;;  %v1980_v43 = vld [vmem:[%s3875_s1 + $0x50] sm:$0xff]  ;;  %v1979_v27 = vld [vmem:[%s3875_s1 + $0x48] sm:$0xff] }
  0x98   : > { %2492 = vmatprep.subr.mxu0 %v1980_v43  ;;  %2567 = vmatprep.subr.mxu1 %v1980_v43 }
  0x99   : > { %2493 = vmatpush3.msra.mxu0 %v1980_v43  ;;  %2583 = vmatpush3.msra.mxu1 %v1980_v43 }
  0x9a   : > { %2494 = vmatprep.subr.mxu0 %v1979_v27  ;;  %2568 = vmatprep.subr.mxu1 %v1979_v27 }
  0x9b   : > { %1036 = vrot.lane.b32.xlu1 %v2857_v25, %s2623_s30  ;;  %1231 = vrot.lane.b32.xlu0 %v589_v3, %s2624_s8  ;;  %v1978_v25 = vld [vmem:[%s3875_s1 + $0x40] sm:$0xff] }
  0x9c   : > { %2495 = vmatpush3.msra.mxu0 %v1979_v27  ;;  %2584 = vmatpush3.msra.mxu1 %v1979_v27 }
  0x9d   : > { %2496 = vmatprep.subr.mxu0 %v1978_v25  ;;  %2569 = vmatprep.subr.mxu1 %v1978_v25 }
  0x9e   : > { %2497 = vmatpush3.msra.mxu0 %v1978_v25  ;;  %2585 = vmatpush3.msra.mxu1 %v1978_v25 }
  0x9f   : > { %1229 = vrot.lane.b32.xlu1 %v588_v39, %s2624_s8  ;;  %847 = vrot.lane.b32.xlu0 %v2914_v44, %s2622_s25 }
  0xa0   : > { %2498 = vmatprep.subr.mxu0 %v1977_v22  ;;  %2570 = vmatprep.subr.mxu1 %v1977_v22 }
  0xa1   : > { %2499 = vmatpush3.msra.mxu0 %v1977_v22  ;;  %2586 = vmatpush3.msra.mxu1 %v1977_v22 }
  0xa2   : > { %2500 = vmatprep.subr.mxu0 %v1976_v23  ;;  %2571 = vmatprep.subr.mxu1 %v1976_v23 }
  0xa3   : > { %1423 = vrot.lane.b32.xlu1 %v2914_v44, %s2625_s17  ;;  %1616 = vrot.lane.b32.xlu0 %v2859_v26, %s2626_s22  ;;  %v1974_v44 = vld [vmem:[%s3875_s1 + $0x20] sm:$0xff] }
  0xa4   : > { %2501 = vmatpush3.msra.mxu0 %v1976_v23  ;;  %2587 = vmatpush3.msra.mxu1 %v1976_v23 }
  0xa5   : > { %2502 = vmatprep.subr.mxu0 %v1975_v24  ;;  %2572 = vmatprep.subr.mxu1 %v1975_v24 }
  0xa6   : > { %2503 = vmatpush3.msra.mxu0 %v1975_v24  ;;  %2588 = vmatpush3.msra.mxu1 %v1975_v24 }
  0xa7   : > { %1425 = vrot.lane.b32.xlu1 %v2928_v47, %s2625_s17  ;;  %2504 = vmatprep.subr.mxu0 %v1974_v44 }
  0xa8   : > { %1040 = vrot.lane.b32.xlu0 %v2859_v26, %s2623_s30  ;;  %2505 = vmatpush3.msra.mxu0 %v1974_v44  ;;  %v1971_v26 = vld [vmem:[%s3875_s1 + $0x8] sm:$0xff] }
  0xa9   : > { %2506 = vmatprep.subr.mxu0 %v1973_v28  ;;  %2573 = vmatprep.subr.mxu1 %v1974_v44 }
  0xaa   : > { %2507 = vmatpush3.msra.mxu0 %v1973_v28  ;;  %2589 = vmatpush3.msra.mxu1 %v1974_v44 }
  0xab   : > { %849 = vrot.lane.b32.xlu1 %v2928_v47, %s2622_s25  ;;  %2508 = vmatprep.subr.mxu0 %v1972_v33  ;;  %v460_v47 = vpop.permute.xlu0 %459 }
  0xac   : > { %1809 = vrot.lane.b32.xlu0 %v3054_v50, %s2627_s6  ;;  %2509 = vmatpush3.msra.mxu0 %v1972_v33  ;;  %555 = vst.msk [vmem:[#allocation3 + $0x8] sm:$0xff] %vm553_vm2, %v460_v47 }
  0xad   : > { %2510 = vmatprep.subr.mxu0 %v1971_v26  ;;  %2574 = vmatprep.subr.mxu1 %v1973_v28 }
  0xae   : > { %2511 = vmatpush3.msra.mxu0 %v1971_v26  ;;  %2590 = vmatpush3.msra.mxu1 %v1973_v28 }
  0xaf   : > { %1618 = vrot.lane.b32.xlu1 %v2878_v31, %s2626_s22  ;;  %2512 = vmatprep.subr.mxu0 %v1970_v34 }
  0xb0   : > { %1233 = vrot.lane.b32.xlu0 %v3054_v50, %s2624_s8  ;;  %2513 = vmatpush3.msra.mxu0 %v1970_v34 }
  0xb1   : > { %v462_v35 = vpop.permute.xlu1 %461  ;;  %v466_v36 = vpop.permute.xlu0 %465  ;;  %2575 = vmatprep.subr.mxu1 %v1972_v33 }
  0xb2   : > { %556 = vst.msk [vmem:[#allocation3 + $0x10] sm:$0xff] %vm553_vm2, %v462_v35  ;;  %558 = vst.msk [vmem:[#allocation3 + $0x20] sm:$0xff] %vm553_vm2, %v466_v36  ;;  %2591 = vmatpush3.msra.mxu1 %v1972_v33 }
  0xb3   : > { %1042 = vrot.lane.b32.xlu1 %v2878_v31, %s2623_s30  ;;  %2576 = vmatprep.subr.mxu1 %v1971_v26 }
  0xb4   : > { %1235 = vrot.lane.b32.xlu0 %v3062_v9, %s2624_s8  ;;  %2592 = vmatpush3.msra.mxu1 %v1971_v26 }
  0xb5   : > { %v464_v37 = vpop.permute.xlu1 %463  ;;  %v470_v39 = vpop.permute.xlu0 %469  ;;  %2577 = vmatprep.subr.mxu1 %v1970_v34 }
  0xb6   : > { %557 = vst.msk [vmem:[#allocation3 + $0x18] sm:$0xff] %vm553_vm2, %v464_v37  ;;  %560 = vst.msk [vmem:[#allocation3 + $0x30] sm:$0xff] %vm553_vm2, %v470_v39  ;;  %2593 = vmatpush3.msra.mxu1 %v1970_v34 }
  0xb7   : > { %1811 = vrot.lane.b32.xlu1 %v3062_v9, %s2627_s6 }
  0xb8   : > { %851 = vrot.lane.b32.xlu0 %v2938_v51, %s2622_s25 }
  0xb9   : > { %v468_v31 = vpop.permute.xlu1 %467  ;;  %v474_v49 = vpop.permute.xlu0 %473 }
  0xba   : > { %559 = vst.msk [vmem:[#allocation3 + $0x28] sm:$0xff] %vm553_vm2, %v468_v31  ;;  %562 = vst.msk [vmem:[#allocation3 + $0x40] sm:$0xff] %vm553_vm2, %v474_v49 }
  0xbb   : > { %1427 = vrot.lane.b32.xlu1 %v2938_v51, %s2625_s17 }
  0xbc   : > { %1620 = vrot.lane.b32.xlu0 %v2874_v30, %s2626_s22 }
  0xbd   : > { %v472_v50 = vpop.permute.xlu1 %471  ;;  %v478_v3 = vpop.permute.xlu0 %477 }
  0xbe   : > { %561 = vst.msk [vmem:[#allocation3 + $0x38] sm:$0xff] %vm553_vm2, %v472_v50  ;;  %564 = vst.msk [vmem:[#allocation3 + $0x50] sm:$0xff] %vm553_vm2, %v478_v3 }
  0xbf   : > { %1429 = vrot.lane.b32.xlu1 %v2942_v53, %s2625_s17 }
  0xc0   : > { %1044 = vrot.lane.b32.xlu0 %v2874_v30, %s2623_s30 }
  0xc1   : > { %v476_v51 = vpop.permute.xlu1 %475  ;;  %v482_v9 = vpop.permute.xlu0 %481 }
  0xc2   : > { %563 = vst.msk [vmem:[#allocation3 + $0x48] sm:$0xff] %vm553_vm2, %v476_v51  ;;  %566 = vst.msk [vmem:[#allocation3 + $0x60] sm:$0xff] %vm553_vm2, %v482_v9 }
  0xc3   : > { %853 = vrot.lane.b32.xlu1 %v2942_v53, %s2622_s25 }
  0xc4   : > { %1813 = vrot.lane.b32.xlu0 %v3059_v7, %s2627_s6 }
  0xc5   : > { %v480_v18 = vpop.permute.xlu1 %479  ;;  %v486_v19 = vpop.permute.xlu0 %485 }
  0xc6   : > { %565 = vst.msk [vmem:[#allocation3 + $0x58] sm:$0xff] %vm553_vm2, %v480_v18  ;;  %568 = vst.msk [vmem:[#allocation3 + $0x70] sm:$0xff] %vm553_vm2, %v486_v19  ;;  %v1755_v18 = vld [vmem:[#allocation2 + $0xaa] sm:$0xff] }
  0xc7   : > { %1622 = vrot.lane.b32.xlu1 %v2894_v38, %s2626_s22 }
  0xc8   : > { %1237 = vrot.lane.b32.xlu0 %v3059_v7, %s2624_s8 }
  0xc9   : > { %v484_v30 = vpop.permute.xlu1 %483  ;;  %v490_v53 = vpop.permute.xlu0 %489 }
  0xca   : > { %567 = vst.msk [vmem:[#allocation3 + $0x68] sm:$0xff] %vm553_vm2, %v484_v30  ;;  %570 = vst.msk [vmem:[#allocation3 + $0x80] sm:$0xff] %vm553_vm2, %v490_v53  ;;  %v1756_v30 = vld [vmem:[#allocation2 + $0xb2] sm:$0xff] }
  0xcb   : > { %1046 = vrot.lane.b32.xlu1 %v2894_v38, %s2623_s30 }
  0xcc   : > { %1239 = vrot.lane.b32.xlu0 %v3070_v12, %s2624_s8 }
  0xcd   : > { %v488_v20 = vpop.permute.xlu1 %487  ;;  %v494_v21 = vpop.permute.xlu0 %493 }
  0xce   : > { %569 = vst.msk [vmem:[#allocation3 + $0x78] sm:$0xff] %vm553_vm2, %v488_v20  ;;  %572 = vst.msk [vmem:[#allocation3 + $0x90] sm:$0xff] %vm553_vm2, %v494_v21 }
  0xcf   : > { %1815 = vrot.lane.b32.xlu1 %v3070_v12, %s2627_s6 }
  0xd0   : > { %855 = vrot.lane.b32.xlu0 %v2940_v52, %s2622_s25 }
  0xd1   : > { %v492_v7 = vpop.permute.xlu1 %491  ;;  %v498_v38 = vpop.permute.xlu0 %497 }
  0xd2   : > { %571 = vst.msk [vmem:[#allocation3 + $0x88] sm:$0xff] %vm553_vm2, %v492_v7  ;;  %574 = vst.msk [vmem:[#allocation3 + $0xa0] sm:$0xff] %vm553_vm2, %v498_v38 }
  0xd3   : > { %1431 = vrot.lane.b32.xlu1 %v2940_v52, %s2625_s17 }
  0xd4   : > { %1624 = vrot.lane.b32.xlu0 %v2882_v32, %s2626_s22 }
  0xd5   : > { %v496_v42 = vpop.permute.xlu1 %495  ;;  %v502_v12 = vpop.permute.xlu0 %501 }
  0xd6   : > { %573 = vst.msk [vmem:[#allocation3 + $0x98] sm:$0xff] %vm553_vm2, %v496_v42  ;;  %576 = vst.msk [vmem:[#allocation3 + $0xb0] sm:$0xff] %vm553_vm2, %v502_v12 }
  0xd7   : > { %1433 = vrot.lane.b32.xlu1 %v2954_v56, %s2625_s17 }
  0xd8   : > { %1048 = vrot.lane.b32.xlu0 %v2882_v32, %s2623_s30 }
  0xd9   : > { %v500_v43 = vpop.permute.xlu1 %499  ;;  %v506_v52 = vpop.permute.xlu0 %505 }
  0xda   : > { %575 = vst.msk [vmem:[#allocation3 + $0xa8] sm:$0xff] %vm553_vm2, %v500_v43  ;;  %578 = vst.msk [vmem:[#allocation3 + $0xc0] sm:$0xff] %vm553_vm2, %v506_v52  ;;  %v1564_v52 = vld [vmem:[#allocation2 + $0xc1] sm:$0xff] }
  0xdb   : > { %857 = vrot.lane.b32.xlu1 %v2954_v56, %s2622_s25 }
  0xdc   : > { %1817 = vrot.lane.b32.xlu0 %v3066_v11, %s2627_s6 }
  0xdd   : > { %v504_v27 = vpop.permute.xlu1 %503  ;;  %v510_v25 = vpop.permute.xlu0 %509 }
  0xde   : > { %577 = vst.msk [vmem:[#allocation3 + $0xb8] sm:$0xff] %vm553_vm2, %v504_v27  ;;  %580 = vst.msk [vmem:[#allocation3 + $0xd0] sm:$0xff] %vm553_vm2, %v510_v25  ;;  %v1565_v25 = vld [vmem:[#allocation2 + $0xc9] sm:$0xff] }
  0xdf   : > { %1626 = vrot.lane.b32.xlu1 %v2906_v41, %s2626_s22 }
  0xe0   : > { %1241 = vrot.lane.b32.xlu0 %v3066_v11, %s2624_s8 }
  0xe1   : > { %v508_v32 = vpop.permute.xlu1 %507  ;;  %v514_v56 = vpop.permute.xlu0 %513 }
  0xe2   : > { %579 = vst.msk [vmem:[#allocation3 + $0xc8] sm:$0xff] %vm553_vm2, %v508_v32  ;;  %582 = vst.msk [vmem:[#allocation3 + $0xe0] sm:$0xff] %vm553_vm2, %v514_v56 }
  0xe3   : > { %1050 = vrot.lane.b32.xlu1 %v2906_v41, %s2623_s30 }
  0xe4   : > { %1243 = vrot.lane.b32.xlu0 %v3078_v15, %s2624_s8 }
  0xe5   : > { %v512_v22 = vpop.permute.xlu1 %511  ;;  %v518_v23 = vpop.permute.xlu0 %517 }
  0xe6   : > { %581 = vst.msk [vmem:[#allocation3 + $0xd8] sm:$0xff] %vm553_vm2, %v512_v22  ;;  %584 = vst.msk [vmem:[#allocation3 + $0xf0] sm:$0xff] %vm553_vm2, %v518_v23 }
  0xe7   : > { %1819 = vrot.lane.b32.xlu1 %v3078_v15, %s2627_s6 }
  0xe8   : > { %859 = vrot.lane.b32.xlu0 %v2952_v55, %s2622_s25 }
  0xe9   : > { %v516_v11 = vpop.permute.xlu1 %515  ;;  %v651_v41 = vpop.permute.xlu0 %650 }
  0xea   : > { %583 = vst.msk [vmem:[#allocation3 + $0xe8] sm:$0xff] %vm553_vm2, %v516_v11  ;;  %v1758_v11 = vld [vmem:[#allocation2 + $0xca] sm:$0xff] }
  0xeb   : > { %1435 = vrot.lane.b32.xlu1 %v2952_v55, %s2625_s17  ;;  %747 = vst.msk [vmem:[#allocation3] sm:$0xff] %vm746_vm3, %v651_v41 }
  0xec   : > { %1628 = vrot.lane.b32.xlu0 %v2902_v40, %s2626_s22 }
  0xed   : > { %v520_v24 = vpop.permute.xlu1 %519  ;;  %v655_v15 = vpop.permute.xlu0 %654 }
  0xee   : > { %585 = vst.msk [vmem:[#allocation3 + $0xf8] sm:$0xff] %vm553_vm2, %v520_v24 }
  0xef   : > { %1437 = vrot.lane.b32.xlu1 %v2966_v58, %s2625_s17  ;;  %749 = vst.msk [vmem:[#allocation3 + $0x10] sm:$0xff] %vm746_vm3, %v655_v15 }
  0xf0   : > { %1052 = vrot.lane.b32.xlu0 %v2902_v40, %s2623_s30 }
  0xf1   : > { %v653_v44 = vpop.permute.xlu1 %652  ;;  %v659_v55 = vpop.permute.xlu0 %658 }
  0xf2   : > { %748 = vst.msk [vmem:[#allocation3 + $0x8] sm:$0xff] %vm746_vm3, %v653_v44  ;;  %751 = vst.msk [vmem:[#allocation3 + $0x20] sm:$0xff] %vm746_vm3, %v659_v55 }
  0xf3   : > { %861 = vrot.lane.b32.xlu1 %v2966_v58, %s2622_s25 }
  0xf4   : > { %1821 = vrot.lane.b32.xlu0 %v3074_v13, %s2627_s6 }
  0xf5   : > { %v657_v28 = vpop.permute.xlu1 %656  ;;  %v663_v29 = vpop.permute.xlu0 %662 }
  0xf6   : > { %750 = vst.msk [vmem:[#allocation3 + $0x18] sm:$0xff] %vm746_vm3, %v657_v28  ;;  %753 = vst.msk [vmem:[#allocation3 + $0x30] sm:$0xff] %vm746_vm3, %v663_v29 }
  0xf7   : > { %1630 = vrot.lane.b32.xlu1 %v2926_v46, %s2626_s22 }
  0xf8   : > { %1245 = vrot.lane.b32.xlu0 %v3074_v13, %s2624_s8 }
  0xf9   : > { %v661_v40 = vpop.permute.xlu1 %660  ;;  %v667_v58 = vpop.permute.xlu0 %666 }
  0xfa   : > { %752 = vst.msk [vmem:[#allocation3 + $0x28] sm:$0xff] %vm746_vm3, %v661_v40  ;;  %755 = vst.msk [vmem:[#allocation3 + $0x40] sm:$0xff] %vm746_vm3, %v667_v58 }
  0xfb   : > { %1054 = vrot.lane.b32.xlu1 %v2926_v46, %s2623_s30 }
  0xfc   : > { %1247 = vrot.lane.b32.xlu0 %v3086_v17, %s2624_s8 }
  0xfd   : > { %v665_v33 = vpop.permute.xlu1 %664  ;;  %v671_v26 = vpop.permute.xlu0 %670 }
  0xfe   : > { %754 = vst.msk [vmem:[#allocation3 + $0x38] sm:$0xff] %vm746_vm3, %v665_v33  ;;  %757 = vst.msk [vmem:[#allocation3 + $0x50] sm:$0xff] %vm746_vm3, %v671_v26 }
  0xff   : > { %1823 = vrot.lane.b32.xlu1 %v3086_v17, %s2627_s6 }
 0x100   : > { %863 = vrot.lane.b32.xlu0 %v2956_v57, %s2622_s25 }
 0x101   : > { %v669_v13 = vpop.permute.xlu1 %668  ;;  %v675_v46 = vpop.permute.xlu0 %674 }
 0x102   : > { %756 = vst.msk [vmem:[#allocation3 + $0x48] sm:$0xff] %vm746_vm3, %v669_v13  ;;  %759 = vst.msk [vmem:[#allocation3 + $0x60] sm:$0xff] %vm746_vm3, %v675_v46  ;;  %v1566_v13 = vld [vmem:[#allocation2 + $0xd9] sm:$0xff] }
 0x103   : > { %1439 = vrot.lane.b32.xlu1 %v2956_v57, %s2625_s17 }
 0x104   : > { %1632 = vrot.lane.b32.xlu0 %v2916_v45, %s2626_s22 }
 0x105   : > { %v673_v47 = vpop.permute.xlu1 %672  ;;  %v846_v17 = vpop.permute.xlu0 %845 }
 0x106   : > { %758 = vst.msk [vmem:[#allocation3 + $0x58] sm:$0xff] %vm746_vm3, %v673_v47  ;;  %v1567_v47 = vld [vmem:[#allocation2 + $0xe1] sm:$0xff] }
 0x107   : > { %1441 = vrot.lane.b32.xlu1 %v2970_v60, %s2625_s17  ;;  %941 = vst.msk [vmem:[#allocation3 + $0x8] sm:$0xff] %vm939_vm4, %v846_v17 }
 0x108   : > { %1056 = vrot.lane.b32.xlu0 %v2916_v45, %s2623_s30 }
 0x109   : > { %v844_v34 = vpop.permute.xlu1 %843  ;;  %v1039_v57 = vpop.permute.xlu0 %1038 }
 0x10a   : > { %940 = vst.msk [vmem:[#allocation3] sm:$0xff] %vm939_vm4, %v844_v34 }
 0x10b   : > { %865 = vrot.lane.b32.xlu1 %v2970_v60, %s2622_s25  ;;  %1134 = vst.msk [vmem:[#allocation3 + $0x8] sm:$0xff] %vm1132_vm5, %v1039_v57  ;;  %v1176_v60 = vld [vmem:[#allocation2 + $0x9a] sm:$0xff] }
 0x10c   : > { %1825 = vrot.lane.b32.xlu0 %v3082_v16, %s2627_s6 }
 0x10d   : > { %v1037_v35 = vpop.permute.xlu1 %1036  ;;  %v1232_v36 = vpop.permute.xlu0 %1231 }
 0x10e   : > { %1133 = vst.msk [vmem:[#allocation3] sm:$0xff] %vm1132_vm5, %v1037_v35 }
 0x10f   : > { %1634 = vrot.lane.b32.xlu1 %v2944_v54, %s2626_s22  ;;  %1327 = vst.msk [vmem:[#allocation3 + $0x8] sm:$0xff] %vm1325_vm6, %v1232_v36  ;;  %v1760_v36 = vld [vmem:[#allocation2 + $0xe2] sm:$0xff] }
 0x110   : > { %1249 = vrot.lane.b32.xlu0 %v3082_v16, %s2624_s8 }
 0x111   : > { %v1230_v45 = vpop.permute.xlu1 %1229  ;;  %v848_v37 = vpop.permute.xlu0 %847 }
 0x112   : > { %1326 = vst.msk [vmem:[#allocation3] sm:$0xff] %vm1325_vm6, %v1230_v45 }
 0x113   : > { %1058 = vrot.lane.b32.xlu1 %v2944_v54, %s2623_s30  ;;  %942 = vst.msk [vmem:[#allocation3 + $0x10] sm:$0xff] %vm939_vm4, %v848_v37 }
 0x114   : > { %1251 = vrot.lane.b32.xlu0 %v1176_v60, %s2624_s8 }
 0x115   : > { %v1424_v39 = vpop.permute.xlu1 %1423  ;;  %v1617_v31 = vpop.permute.xlu0 %1616 }
 0x116   : > { %1520 = vst.msk [vmem:[#allocation3] sm:$0xff] %vm1519_vm7, %v1424_v39 }
 0x117   : > { %1827 = vrot.lane.b32.xlu1 %v1176_v60, %s2627_s6  ;;  %1713 = vst.msk [vmem:[#allocation3] sm:$0xff] %vm1712_vm8, %v1617_v31 }
 0x118   : > { %676 = vrot.lane.b32.xlu0 %v1176_v60, %s2621_s20 }
 0x119   : > { %v1426_v16 = vpop.permute.xlu1 %1425 }
 0x11a   : > { %1521 = vst.msk [vmem:[#allocation3 + $0x8] sm:$0xff] %vm1519_vm7, %v1426_v16  ;;  %v1041_v54 = vpop.permute.xlu0 %1040 }
 0x11b   : > { %1443 = vrot.lane.b32.xlu1 %v2968_v59, %s2625_s17  ;;  %1135 = vst.msk [vmem:[#allocation3 + $0x10] sm:$0xff] %vm1132_vm5, %v1041_v54 }
 0x11c   : > { %1445 = vrot.lane.b32.xlu0 %v2980_v62, %s2625_s17 }
 0x11d   : > { %v850_v49 = vpop.permute.xlu1 %849 }
 0x11e   : > { %943 = vst.msk [vmem:[#allocation3 + $0x18] sm:$0xff] %vm939_vm4, %v850_v49  ;;  %v1810_v50 = vpop.permute.xlu0 %1809 }
 0x11f   : > { %867 = vrot.lane.b32.xlu1 %v2968_v59, %s2622_s25  ;;  %1906 = vst.msk [vmem:[#allocation3] sm:$0xff] %vm1905_vm9, %v1810_v50 }
 0x120   : > { %869 = vrot.lane.b32.xlu0 %v2980_v62, %s2622_s25 }
 0x121   : > { %v1619_v3 = vpop.permute.xlu1 %1618 }
 0x122   : > { %1714 = vst.msk [vmem:[#allocation3 + $0x8] sm:$0xff] %vm1712_vm8, %v1619_v3  ;;  %v1234_v51 = vpop.permute.xlu0 %1233 }
 0x123   : > { %1636 = vrot.lane.b32.xlu1 %v2930_v48, %s2626_s22  ;;  %1328 = vst.msk [vmem:[#allocation3 + $0x10] sm:$0xff] %vm1325_vm6, %v1234_v51  ;;  %v1568_v51 = vld [vmem:[#allocation2 + $0xf1] sm:$0xff] }
 0x124   : > { %1638 = vrot.lane.b32.xlu0 %v3010_v5, %s2626_s22 }
 0x125   : > { %v1043_v9 = vpop.permute.xlu1 %1042 }
 0x126   : > { %1136 = vst.msk [vmem:[#allocation3 + $0x18] sm:$0xff] %vm1132_vm5, %v1043_v9  ;;  %v1236_v59 = vpop.permute.xlu0 %1235  ;;  %v1938_v62 = vld [vmem:[#allocation3] sm:$0xff] }
 0x127   : > { %1060 = vrot.lane.b32.xlu1 %v2930_v48, %s2623_s30  ;;  %1329 = vst.msk [vmem:[#allocation3 + $0x18] sm:$0xff] %vm1325_vm6, %v1236_v59  ;;  %2514 = vmatprep.mubr.f32.mxu0 %v1938_v62  ;;  %v1569_v59 = vld [vmem:[#allocation2 + $0xf9] sm:$0xff] }
 0x128   : > { %1062 = vrot.lane.b32.xlu0 %v3010_v5, %s2623_s30 }
 0x129   : > { %v1812_v19 = vpop.permute.xlu1 %1811 }
 0x12a   : > { %1907 = vst.msk [vmem:[#allocation3 + $0x8] sm:$0xff] %vm1905_vm9, %v1812_v19  ;;  %v852_v53 = vpop.permute.xlu0 %851 }
 0x12b   : > { %1829 = vrot.lane.b32.xlu1 %v1755_v18, %s2627_s6  ;;  %944 = vst.msk [vmem:[#allocation3 + $0x20] sm:$0xff] %vm939_vm4, %v852_v53  ;;  %v1762_v53 = vld [vmem:[#allocation2 + $0xfa] sm:$0xff] }
 0x12c   : > { %1831 = vrot.lane.b32.xlu0 %v1756_v30, %s2627_s6 }
 0x12d   : > { %v1428_v48 = vpop.permute.xlu1 %1427 }
 0x12e   : > { %1522 = vst.msk [vmem:[#allocation3 + $0x10] sm:$0xff] %vm1519_vm7, %v1428_v48  ;;  %v1621_v20 = vpop.permute.xlu0 %1620 }
 0x12f   : > { %1253 = vrot.lane.b32.xlu1 %v1755_v18, %s2624_s8  ;;  %1715 = vst.msk [vmem:[#allocation3 + $0x10] sm:$0xff] %vm1712_vm8, %v1621_v20 }
 0x130   : > { %1255 = vrot.lane.b32.xlu0 %v1756_v30, %s2624_s8 }
 0x131   : > { %v1430_v5 = vpop.permute.xlu1 %1429  ;;  %v1939_v21 = vld [vmem:[#allocation3 + $0x8] sm:$0xff] }
 0x132   : > { %1523 = vst.msk [vmem:[#allocation3 + $0x18] sm:$0xff] %vm1519_vm7, %v1430_v5  ;;  %2515 = vmatmul.mubr.f32.vlgmr.msra.gmra.mxu0 %v1939_v21  ;;  %v1045_v7 = vpop.permute.xlu0 %1044 }
 0x133   : > { %678 = vrot.lane.b32.xlu1 %v1755_v18, %s2621_s20  ;;  %1137 = vst.msk [vmem:[#allocation3 + $0x20] sm:$0xff] %vm1132_vm5, %v1045_v7 }
 0x134   : > { %680 = vrot.lane.b32.xlu0 %v1756_v30, %s2621_s20 }
 0x135   : > { %v854_v38 = vpop.permute.xlu1 %853 }
 0x136   : > { %945 = vst.msk [vmem:[#allocation3 + $0x28] sm:$0xff] %vm939_vm4, %v854_v38  ;;  %v1814_v42 = vpop.permute.xlu0 %1813 }
 0x137   : > { %1447 = vrot.lane.b32.xlu1 %v2978_v61, %s2625_s17  ;;  %1908 = vst.msk [vmem:[#allocation3 + $0x10] sm:$0xff] %vm1905_vm9, %v1814_v42 }
 0x138   : > { %1449 = vrot.lane.b32.xlu0 %v2992_v0, %s2625_s17 }
 0x139   : > { %v1623_v12 = vpop.permute.xlu1 %1622 }
 0x13a   : > { %1716 = vst.msk [vmem:[#allocation3 + $0x18] sm:$0xff] %vm1712_vm8, %v1623_v12  ;;  %v1238_v43 = vpop.permute.xlu0 %1237 }
 0x13b   : > { %871 = vrot.lane.b32.xlu1 %v2978_v61, %s2622_s25  ;;  %1330 = vst.msk [vmem:[#allocation3 + $0x20] sm:$0xff] %vm1325_vm6, %v1238_v43 }
 0x13c   : > { %873 = vrot.lane.b32.xlu0 %v2992_v0, %s2622_s25  ;;  %v1757_v0 = vld [vmem:[#allocation2 + $0xc2] sm:$0xff] }
 0x13d   : > { %v1047_v27 = vpop.permute.xlu1 %1046 }
 0x13e   : > { %1138 = vst.msk [vmem:[#allocation3 + $0x28] sm:$0xff] %vm1132_vm5, %v1047_v27  ;;  %v1240_v32 = vpop.permute.xlu0 %1239  ;;  %v1940_v56 = vld [vmem:[#allocation3 + $0x10] sm:$0xff] }
 0x13f   : > { %1640 = vrot.lane.b32.xlu1 %v1564_v52, %s2626_s22  ;;  %1331 = vst.msk [vmem:[#allocation3 + $0x28] sm:$0xff] %vm1325_vm6, %v1240_v32  ;;  %2517 = vmatprep.mubr.f32.mxu0 %v1940_v56  ;;  %v295_v32 = vld [vmem:[%s2812_s18 + $0xf8] sm:$0xff] }
 0x140   : > { %1642 = vrot.lane.b32.xlu0 %v1565_v25, %s2626_s22  ;;  %328 = vst.msk [vmem:[#allocation2 + $0x189] sm:$0xff] %vm176_vm0, %v295_v32 }
 0x141   : > { %v1816_v61 = vpop.permute.xlu1 %1815 }
 0x142   : > { %1909 = vst.msk [vmem:[#allocation3 + $0x18] sm:$0xff] %vm1905_vm9, %v1816_v61  ;;  %v856_v22 = vpop.permute.xlu0 %855 }
 0x143   : > { %1064 = vrot.lane.b32.xlu1 %v1564_v52, %s2623_s30  ;;  %946 = vst.msk [vmem:[#allocation3 + $0x30] sm:$0xff] %vm939_vm4, %v856_v22  ;;  %v294_v52 = vld [vmem:[%s2812_s18 + $0xf0] sm:$0xff] }
 0x144   : > { %1066 = vrot.lane.b32.xlu0 %v1565_v25, %s2623_s30  ;;  %327 = vst.msk [vmem:[#allocation2 + $0x181] sm:$0xff] %vm176_vm0, %v294_v52  ;;  %v1570_v25 = vld [vmem:[#allocation2 + $0x109] sm:$0xff]  ;;  %v1571_v22 = vld [vmem:[#allocation2 + $0x111] sm:$0xff] }
 0x145   : > { %v1432_v23 = vpop.permute.xlu1 %1431  ;;  %v1384_v52 = vld [vmem:[#allocation2 + $0x158] sm:$0xff] }
 0x146   : > { %1524 = vst.msk [vmem:[#allocation3 + $0x20] sm:$0xff] %vm1519_vm7, %v1432_v23  ;;  %v1625_v41 = vpop.permute.xlu0 %1624 }
 0x147   : > { %1833 = vrot.lane.b32.xlu1 %v1757_v0, %s2627_s6  ;;  %1717 = vst.msk [vmem:[#allocation3 + $0x20] sm:$0xff] %vm1712_vm8, %v1625_v41  ;;  %v1764_v41 = vld [vmem:[#allocation2 + $0x112] sm:$0xff] }
 0x148   : > { %1835 = vrot.lane.b32.xlu0 %v1758_v11, %s2627_s6 }
 0x149   : > { %v1434_v24 = vpop.permute.xlu1 %1433  ;;  %v1941_v15 = vld [vmem:[#allocation3 + $0x18] sm:$0xff] }
 0x14a   : > { %1525 = vst.msk [vmem:[#allocation3 + $0x28] sm:$0xff] %vm1519_vm7, %v1434_v24  ;;  %2518 = vmatmul.mubr.f32.gmra.mxu0 %v1941_v15  ;;  %v1049_v44 = vpop.permute.xlu0 %1048 }
 0x14b   : > { %1257 = vrot.lane.b32.xlu1 %v1757_v0, %s2624_s8  ;;  %1139 = vst.msk [vmem:[#allocation3 + $0x30] sm:$0xff] %vm1132_vm5, %v1049_v44 }
 0x14c   : > { %1259 = vrot.lane.b32.xlu0 %v1758_v11, %s2624_s8 }
 0x14d   : > { %v858_v55 = vpop.permute.xlu1 %857 }
 0x14e   : > { %947 = vst.msk [vmem:[#allocation3 + $0x38] sm:$0xff] %vm939_vm4, %v858_v55  ;;  %v1818_v28 = vpop.permute.xlu0 %1817 }
 0x14f   : > { %682 = vrot.lane.b32.xlu1 %v1757_v0, %s2621_s20  ;;  %1910 = vst.msk [vmem:[#allocation3 + $0x20] sm:$0xff] %vm1905_vm9, %v1818_v28 }
 0x150   : > { %684 = vrot.lane.b32.xlu0 %v1758_v11, %s2621_s20 }
 0x151   : > { %v1627_v29 = vpop.permute.xlu1 %1626 }
 0x152   : > { %1718 = vst.msk [vmem:[#allocation3 + $0x28] sm:$0xff] %vm1712_vm8, %v1627_v29  ;;  %v1242_v40 = vpop.permute.xlu0 %1241 }
 0x153   : > { %1451 = vrot.lane.b32.xlu1 %v2982_v63, %s2625_s17  ;;  %1332 = vst.msk [vmem:[#allocation3 + $0x30] sm:$0xff] %vm1325_vm6, %v1242_v40 }
 0x154   : > { %1453 = vrot.lane.b32.xlu0 %v2996_v2, %s2625_s17 }
 0x155   : > { %v1051_v58 = vpop.permute.xlu1 %1050 }
 0x156   : > { %1140 = vst.msk [vmem:[#allocation3 + $0x38] sm:$0xff] %vm1132_vm5, %v1051_v58  ;;  %v1244_v33 = vpop.permute.xlu0 %1243  ;;  %v1942_v26 = vld [vmem:[#allocation3 + $0x20] sm:$0xff] }
 0x157   : > { %875 = vrot.lane.b32.xlu1 %v2982_v63, %s2622_s25  ;;  %1333 = vst.msk [vmem:[#allocation3 + $0x38] sm:$0xff] %vm1325_vm6, %v1244_v33  ;;  %2520 = vmatprep.mubr.f32.mxu0 %v1942_v26  ;;  %v801_v26 = vld [vmem:[#allocation2 + $0x120] sm:$0xff] }
 0x158   : > { %877 = vrot.lane.b32.xlu0 %v2996_v2, %s2622_s25  ;;  %v1759_v2 = vld [vmem:[#allocation2 + $0xda] sm:$0xff] }
 0x159   : > { %v1820_v46 = vpop.permute.xlu1 %1819 }
 0x15a   : > { %1911 = vst.msk [vmem:[#allocation3 + $0x28] sm:$0xff] %vm1905_vm9, %v1820_v46  ;;  %v860_v17 = vpop.permute.xlu0 %859 }
 0x15b   : > { %1644 = vrot.lane.b32.xlu1 %v1566_v13, %s2626_s22  ;;  %948 = vst.msk [vmem:[#allocation3 + $0x40] sm:$0xff] %vm939_vm4, %v860_v17  ;;  %v1573_v17 = vld [vmem:[#allocation2 + $0x129] sm:$0xff] }
 0x15c   : > { %1646 = vrot.lane.b32.xlu0 %v1567_v47, %s2626_s22 }
 0x15d   : > { %v1436_v63 = vpop.permute.xlu1 %1435 }
 0x15e   : > { %1526 = vst.msk [vmem:[#allocation3 + $0x30] sm:$0xff] %vm1519_vm7, %v1436_v63  ;;  %v1629_v34 = vpop.permute.xlu0 %1628 }
 0x15f   : > { %1068 = vrot.lane.b32.xlu1 %v1566_v13, %s2623_s30  ;;  %1719 = vst.msk [vmem:[#allocation3 + $0x30] sm:$0xff] %vm1712_vm8, %v1629_v34 }
 0x160   : > { %1070 = vrot.lane.b32.xlu0 %v1567_v47, %s2623_s30  ;;  %v1572_v47 = vld [vmem:[#allocation2 + $0x121] sm:$0xff] }
 0x161   : > { %v1438_v57 = vpop.permute.xlu1 %1437  ;;  %v1943_v35 = vld [vmem:[#allocation3 + $0x28] sm:$0xff] }
 0x162   : > { %1527 = vst.msk [vmem:[#allocation3 + $0x38] sm:$0xff] %vm1519_vm7, %v1438_v57  ;;  %2521 = vmatmul.mubr.f32.gmra.mxu0 %v1943_v35  ;;  %v1053_v45 = vpop.permute.xlu0 %1052  ;;  %v1766_v35 = vld [vmem:[#allocation2 + $0x12a] sm:$0xff] }
 0x163   : > { %1837 = vrot.lane.b32.xlu1 %v1759_v2, %s2627_s6  ;;  %1141 = vst.msk [vmem:[#allocation3 + $0x40] sm:$0xff] %vm1132_vm5, %v1053_v45 }
 0x164   : > { %1839 = vrot.lane.b32.xlu0 %v1760_v36, %s2627_s6 }
 0x165   : > { %v862_v60 = vpop.permute.xlu1 %861 }
 0x166   : > { %949 = vst.msk [vmem:[#allocation3 + $0x48] sm:$0xff] %vm939_vm4, %v862_v60  ;;  %v1822_v37 = vpop.permute.xlu0 %1821 }
 0x167   : > { %1261 = vrot.lane.b32.xlu1 %v1759_v2, %s2624_s8  ;;  %1912 = vst.msk [vmem:[#allocation3 + $0x30] sm:$0xff] %vm1905_vm9, %v1822_v37 }
 0x168   : > { %1263 = vrot.lane.b32.xlu0 %v1760_v36, %s2624_s8 }
 0x169   : > { %v1631_v39 = vpop.permute.xlu1 %1630 }
 0x16a   : > { %1720 = vst.msk [vmem:[#allocation3 + $0x38] sm:$0xff] %vm1712_vm8, %v1631_v39  ;;  %v1246_v31 = vpop.permute.xlu0 %1245 }
 0x16b   : > { %686 = vrot.lane.b32.xlu1 %v1759_v2, %s2621_s20  ;;  %1334 = vst.msk [vmem:[#allocation3 + $0x40] sm:$0xff] %vm1325_vm6, %v1246_v31  ;;  %v1381_v31 = vld [vmem:[#allocation2 + $0x138] sm:$0xff] }
 0x16c   : > { %688 = vrot.lane.b32.xlu0 %v1760_v36, %s2621_s20 }
 0x16d   : > { %v1055_v16 = vpop.permute.xlu1 %1054 }
 0x16e   : > { %1142 = vst.msk [vmem:[#allocation3 + $0x48] sm:$0xff] %vm1132_vm5, %v1055_v16  ;;  %v1248_v54 = vpop.permute.xlu0 %1247  ;;  %v1944_v49 = vld [vmem:[#allocation3 + $0x30] sm:$0xff] }
 0x16f   : > { %1455 = vrot.lane.b32.xlu1 %v2994_v1, %s2625_s17  ;;  %1335 = vst.msk [vmem:[#allocation3 + $0x48] sm:$0xff] %vm1325_vm6, %v1248_v54  ;;  %2523 = vmatprep.mubr.f32.mxu0 %v1944_v49  ;;  %v1382_v49 = vld [vmem:[#allocation2 + $0x140] sm:$0xff] }
 0x170   : > { %1457 = vrot.lane.b32.xlu0 %v3012_v6, %s2625_s17 }
 0x171   : > { %v1824_v50 = vpop.permute.xlu1 %1823 }
 0x172   : > { %1913 = vst.msk [vmem:[#allocation3 + $0x38] sm:$0xff] %vm1905_vm9, %v1824_v50  ;;  %v864_v3 = vpop.permute.xlu0 %863 }
 0x173   : > { %879 = vrot.lane.b32.xlu1 %v2994_v1, %s2622_s25  ;;  %950 = vst.msk [vmem:[#allocation3 + $0x50] sm:$0xff] %vm939_vm4, %v864_v3 }
 0x174   : > { %881 = vrot.lane.b32.xlu0 %v3012_v6, %s2622_s25  ;;  %v1761_v6 = vld [vmem:[#allocation2 + $0xf2] sm:$0xff] }
 0x175   : > { %v1440_v9 = vpop.permute.xlu1 %1439 }
 0x176   : > { %1528 = vst.msk [vmem:[#allocation3 + $0x40] sm:$0xff] %vm1519_vm7, %v1440_v9  ;;  %v1633_v62 = vpop.permute.xlu0 %1632 }
 0x177   : > { %1648 = vrot.lane.b32.xlu1 %v1568_v51, %s2626_s22  ;;  %1721 = vst.msk [vmem:[#allocation3 + $0x40] sm:$0xff] %vm1712_vm8, %v1633_v62 }
 0x178   : > { %1650 = vrot.lane.b32.xlu0 %v1569_v59, %s2626_s22 }
 0x179   : > { %v1442_v18 = vpop.permute.xlu1 %1441  ;;  %v1945_v19 = vld [vmem:[#allocation3 + $0x38] sm:$0xff] }
 0x17a   : > { %1529 = vst.msk [vmem:[#allocation3 + $0x48] sm:$0xff] %vm1519_vm7, %v1442_v18  ;;  %2524 = vmatmul.mubr.f32.gmra.mxu0 %v1945_v19  ;;  %v1057_v1 = vpop.permute.xlu0 %1056  ;;  %v1575_v18 = vld [vmem:[#allocation2 + $0x141] sm:$0xff] }
 0x17b   : > { %1072 = vrot.lane.b32.xlu1 %v1568_v51, %s2623_s30  ;;  %1143 = vst.msk [vmem:[#allocation3 + $0x50] sm:$0xff] %vm1132_vm5, %v1057_v1 }
 0x17c   : > { %1074 = vrot.lane.b32.xlu0 %v1569_v59, %s2623_s30  ;;  %v1574_v59 = vld [vmem:[#allocation2 + $0x139] sm:$0xff] }
 0x17d   : > { %v866_v30 = vpop.permute.xlu1 %865 }
 0x17e   : > { %951 = vst.msk [vmem:[#allocation3 + $0x58] sm:$0xff] %vm939_vm4, %v866_v30  ;;  %v1826_v48 = vpop.permute.xlu0 %1825  ;;  %v1767_v30 = vld [vmem:[#allocation2 + $0x13a] sm:$0xff] }
 0x17f   : > { %1841 = vrot.lane.b32.xlu1 %v1761_v6, %s2627_s6  ;;  %1914 = vst.msk [vmem:[#allocation3 + $0x40] sm:$0xff] %vm1905_vm9, %v1826_v48  ;;  %v1768_v48 = vld [vmem:[#allocation2 + $0x142] sm:$0xff] }
 0x180   : > { %1843 = vrot.lane.b32.xlu0 %v1762_v53, %s2627_s6 }
 0x181   : > { %v1635_v20 = vpop.permute.xlu1 %1634 }
 0x182   : > { %1722 = vst.msk [vmem:[#allocation3 + $0x48] sm:$0xff] %vm1712_vm8, %v1635_v20  ;;  %v1250_v5 = vpop.permute.xlu0 %1249 }
 0x183   : > { %1265 = vrot.lane.b32.xlu1 %v1761_v6, %s2624_s8  ;;  %1336 = vst.msk [vmem:[#allocation3 + $0x50] sm:$0xff] %vm1325_vm6, %v1250_v5 }
 0x184   : > { %1267 = vrot.lane.b32.xlu0 %v1762_v53, %s2624_s8 }
 0x185   : > { %v1059_v21 = vpop.permute.xlu1 %1058 }
 0x186   : > { %1144 = vst.msk [vmem:[#allocation3 + $0x58] sm:$0xff] %vm1132_vm5, %v1059_v21  ;;  %v1252_v7 = vpop.permute.xlu0 %1251  ;;  %v1946_v38 = vld [vmem:[#allocation3 + $0x40] sm:$0xff] }
 0x187   : > { %690 = vrot.lane.b32.xlu1 %v1761_v6, %s2621_s20  ;;  %1337 = vst.msk [vmem:[#allocation3 + $0x58] sm:$0xff] %vm1325_vm6, %v1252_v7  ;;  %2526 = vmatprep.mubr.f32.mxu0 %v1946_v38 }
 0x188   : > { %692 = vrot.lane.b32.xlu0 %v1762_v53, %s2621_s20 }
 0x189   : > { %v1828_v42 = vpop.permute.xlu1 %1827 }
 0x18a   : > { %1915 = vst.msk [vmem:[#allocation3 + $0x48] sm:$0xff] %vm1905_vm9, %v1828_v42  ;;  %v677_v12 = vpop.permute.xlu0 %676  ;;  %v1383_v42 = vld [vmem:[#allocation2 + $0x150] sm:$0xff] }
 0x18b   : > { %1459 = vrot.lane.b32.xlu1 %v3004_v4, %s2625_s17  ;;  %760 = vst.msk [vmem:[#allocation3 + $0x68] sm:$0xff] %vm746_vm3, %v677_v12 }
 0x18c   : > { %1461 = vrot.lane.b32.xlu0 %v3023_v10, %s2625_s17 }
 0x18d   : > { %v1444_v43 = vpop.permute.xlu1 %1443 }
 0x18e   : > { %1530 = vst.msk [vmem:[#allocation3 + $0x50] sm:$0xff] %vm1519_vm7, %v1444_v43  ;;  %v1446_v27 = vpop.permute.xlu0 %1445 }
 0x18f   : > { %883 = vrot.lane.b32.xlu1 %v3004_v4, %s2622_s25  ;;  %1531 = vst.msk [vmem:[#allocation3 + $0x58] sm:$0xff] %vm1519_vm7, %v1446_v27 }
 0x190   : > { %885 = vrot.lane.b32.xlu0 %v3023_v10, %s2622_s25  ;;  %v1763_v10 = vld [vmem:[#allocation2 + $0x10a] sm:$0xff] }
 0x191   : > { %v868_v56 = vpop.permute.xlu1 %867  ;;  %v1947_v61 = vld [vmem:[#allocation3 + $0x48] sm:$0xff] }
 0x192   : > { %952 = vst.msk [vmem:[#allocation3 + $0x60] sm:$0xff] %vm939_vm4, %v868_v56  ;;  %2527 = vmatmul.mubr.f32.gmra.mxu0 %v1947_v61  ;;  %v870_v0 = vpop.permute.xlu0 %869  ;;  %v1576_v61 = vld [vmem:[#allocation2 + $0x151] sm:$0xff] }
 0x193   : > { %1652 = vrot.lane.b32.xlu1 %v1570_v25, %s2626_s22  ;;  %953 = vst.msk [vmem:[#allocation3 + $0x68] sm:$0xff] %vm939_vm4, %v870_v0  ;;  %v1577_v0 = vld [vmem:[#allocation2 + $0x159] sm:$0xff] }
 0x194   : > { %1654 = vrot.lane.b32.xlu0 %v1571_v22, %s2626_s22 }
 0x195   : > { %v1637_v4 = vpop.permute.xlu1 %1636 }
 0x196   : > { %1723 = vst.msk [vmem:[#allocation3 + $0x50] sm:$0xff] %vm1712_vm8, %v1637_v4  ;;  %v1639_v23 = vpop.permute.xlu0 %1638 }
 0x197   : > { %1076 = vrot.lane.b32.xlu1 %v1570_v25, %s2623_s30  ;;  %1724 = vst.msk [vmem:[#allocation3 + $0x58] sm:$0xff] %vm1712_vm8, %v1639_v23 }
 0x198   : > { %1078 = vrot.lane.b32.xlu0 %v1571_v22, %s2623_s30 }
 0x199   : > { %v1061_v11 = vpop.permute.xlu1 %1060 }
 0x19a   : > { %1145 = vst.msk [vmem:[#allocation3 + $0x60] sm:$0xff] %vm1132_vm5, %v1061_v11  ;;  %v1063_v24 = vpop.permute.xlu0 %1062  ;;  %v1769_v11 = vld [vmem:[#allocation2 + $0x152] sm:$0xff] }
 0x19b   : > { %1845 = vrot.lane.b32.xlu1 %v1763_v10, %s2627_s6  ;;  %1146 = vst.msk [vmem:[#allocation3 + $0x68] sm:$0xff] %vm1132_vm5, %v1063_v24  ;;  %v1770_v24 = vld [vmem:[#allocation2 + $0x15a] sm:$0xff] }
 0x19c   : > { %1847 = vrot.lane.b32.xlu0 %v1764_v41, %s2627_s6 }
 0x19d   : > { %v1830_v15 = vpop.permute.xlu1 %1829 }
 0x19e   : > { %1916 = vst.msk [vmem:[#allocation3 + $0x50] sm:$0xff] %vm1905_vm9, %v1830_v15  ;;  %v1832_v44 = vpop.permute.xlu0 %1831 }
 0x19f   : > { %1269 = vrot.lane.b32.xlu1 %v1763_v10, %s2624_s8  ;;  %1917 = vst.msk [vmem:[#allocation3 + $0x58] sm:$0xff] %vm1905_vm9, %v1832_v44 }
 0x1a0   : > { %1271 = vrot.lane.b32.xlu0 %v1764_v41, %s2624_s8 }
 0x1a1   : > { %v1254_v55 = vpop.permute.xlu1 %1253 }
 0x1a2   : > { %1338 = vst.msk [vmem:[#allocation3 + $0x60] sm:$0xff] %vm1325_vm6, %v1254_v55  ;;  %v1256_v28 = vpop.permute.xlu0 %1255 }
 0x1a3   : > { %694 = vrot.lane.b32.xlu1 %v1763_v10, %s2621_s20  ;;  %1339 = vst.msk [vmem:[#allocation3 + $0x68] sm:$0xff] %vm1325_vm6, %v1256_v28 }
 0x1a4   : > { %696 = vrot.lane.b32.xlu0 %v1764_v41, %s2621_s20 }
 0x1a5   : > { %v679_v29 = vpop.permute.xlu1 %678  ;;  %v1948_v40 = vld [vmem:[#allocation3 + $0x50] sm:$0xff] }
 0x1a6   : > { %761 = vst.msk [vmem:[#allocation3 + $0x70] sm:$0xff] %vm746_vm3, %v679_v29  ;;  %2529 = vmatprep.mubr.f32.mxu0 %v1948_v40  ;;  %v681_v58 = vpop.permute.xlu0 %680  ;;  %v1949_v33 = vld [vmem:[#allocation3 + $0x58] sm:$0xff] }
 0x1a7   : > { %1463 = vrot.lane.b32.xlu1 %v3017_v8, %s2625_s17  ;;  %762 = vst.msk [vmem:[#allocation3 + $0x78] sm:$0xff] %vm746_vm3, %v681_v58  ;;  %2530 = vmatmul.mubr.f32.gmra.mxu0 %v1949_v33  ;;  %v1385_v40 = vld [vmem:[#allocation2 + $0x168] sm:$0xff] }
 0x1a8   : > { %1465 = vrot.lane.b32.xlu0 %v3030_v14, %s2625_s17 }
 0x1a9   : > { %v1448_v13 = vpop.permute.xlu1 %1447 }
 0x1aa   : > { %1532 = vst.msk [vmem:[#allocation3 + $0x60] sm:$0xff] %vm1519_vm7, %v1448_v13  ;;  %v1450_v46 = vpop.permute.xlu0 %1449 }
 0x1ab   : > { %887 = vrot.lane.b32.xlu1 %v801_v26, %s2622_s25  ;;  %1533 = vst.msk [vmem:[#allocation3 + $0x68] sm:$0xff] %vm1519_vm7, %v1450_v46  ;;  %v1386_v26 = vld [vmem:[#allocation2 + $0x170] sm:$0xff] }
 0x1ac   : > { %889 = vrot.lane.b32.xlu0 %v3030_v14, %s2622_s25  ;;  %v1765_v14 = vld [vmem:[#allocation2 + $0x122] sm:$0xff] }
 0x1ad   : > { %v872_v8 = vpop.permute.xlu1 %871 }
 0x1ae   : > { %954 = vst.msk [vmem:[#allocation3 + $0x70] sm:$0xff] %vm939_vm4, %v872_v8  ;;  %v874_v63 = vpop.permute.xlu0 %873 }
 0x1af   : > { %1656 = vrot.lane.b32.xlu1 %v1572_v47, %s2626_s22  ;;  %955 = vst.msk [vmem:[#allocation3 + $0x78] sm:$0xff] %vm939_vm4, %v874_v63 }
 0x1b0   : > { %1658 = vrot.lane.b32.xlu0 %v1573_v17, %s2626_s22 }
 0x1b1   : > { %v1641_v34 = vpop.permute.xlu1 %1640 }
 0x1b2   : > { %1725 = vst.msk [vmem:[#allocation3 + $0x60] sm:$0xff] %vm1712_vm8, %v1641_v34  ;;  %v1643_v2 = vpop.permute.xlu0 %1642  ;;  %v1579_v34 = vld [vmem:[#allocation2 + $0x171] sm:$0xff] }
 0x1b3   : > { %1080 = vrot.lane.b32.xlu1 %v1572_v47, %s2623_s30  ;;  %1726 = vst.msk [vmem:[#allocation3 + $0x68] sm:$0xff] %vm1712_vm8, %v1643_v2 }
 0x1b4   : > { %1082 = vrot.lane.b32.xlu0 %v1573_v17, %s2623_s30  ;;  %v1578_v17 = vld [vmem:[#allocation2 + $0x169] sm:$0xff] }
 0x1b5   : > { %v1065_v57 = vpop.permute.xlu1 %1064 }
 0x1b6   : > { %1147 = vst.msk [vmem:[#allocation3 + $0x70] sm:$0xff] %vm1132_vm5, %v1065_v57  ;;  %v1067_v36 = vpop.permute.xlu0 %1066 }
 0x1b7   : > { %1849 = vrot.lane.b32.xlu1 %v1765_v14, %s2627_s6  ;;  %1148 = vst.msk [vmem:[#allocation3 + $0x78] sm:$0xff] %vm1132_vm5, %v1067_v36 }
 0x1b8   : > { %1851 = vrot.lane.b32.xlu0 %v1766_v35, %s2627_s6 }
 0x1b9   : > { %v1834_v45 = vpop.permute.xlu1 %1833 }
 0x1ba   : > { %1918 = vst.msk [vmem:[#allocation3 + $0x60] sm:$0xff] %vm1905_vm9, %v1834_v45  ;;  %v1836_v60 = vpop.permute.xlu0 %1835  ;;  %v1772_v45 = vld [vmem:[#allocation2 + $0x172] sm:$0xff] }
 0x1bb   : > { %1273 = vrot.lane.b32.xlu1 %v1765_v14, %s2624_s8  ;;  %1919 = vst.msk [vmem:[#allocation3 + $0x68] sm:$0xff] %vm1905_vm9, %v1836_v60 }
 0x1bc   : > { %1275 = vrot.lane.b32.xlu0 %v1766_v35, %s2624_s8 }
 0x1bd   : > { %v1258_v37 = vpop.permute.xlu1 %1257 }
 0x1be   : > { %1340 = vst.msk [vmem:[#allocation3 + $0x70] sm:$0xff] %vm1325_vm6, %v1258_v37  ;;  %v1260_v39 = vpop.permute.xlu0 %1259 }
 0x1bf   : > { %698 = vrot.lane.b32.xlu1 %v1765_v14, %s2621_s20  ;;  %1341 = vst.msk [vmem:[#allocation3 + $0x78] sm:$0xff] %vm1325_vm6, %v1260_v39 }
 0x1c0   : > { %700 = vrot.lane.b32.xlu0 %v1766_v35, %s2621_s20  ;;  %v1771_v35 = vld [vmem:[#allocation2 + $0x16a] sm:$0xff] }
 0x1c1   : > { %v683_v16 = vpop.permute.xlu1 %682  ;;  %v1950_v54 = vld [vmem:[#allocation3 + $0x60] sm:$0xff] }
 0x1c2   : > { %763 = vst.msk [vmem:[#allocation3 + $0x80] sm:$0xff] %vm746_vm3, %v683_v16  ;;  %2532 = vmatprep.mubr.f32.mxu0 %v1950_v54  ;;  %v685_v50 = vpop.permute.xlu0 %684  ;;  %v1951_v3 = vld [vmem:[#allocation3 + $0x68] sm:$0xff]  ;;  %v1387_v54 = vld [vmem:[#allocation2 + $0x180] sm:$0xff] }
 0x1c3   : > { %1467 = vrot.lane.b32.xlu1 %v1381_v31, %s2625_s17  ;;  %764 = vst.msk [vmem:[#allocation3 + $0x88] sm:$0xff] %vm746_vm3, %v685_v50  ;;  %2533 = vmatmul.mubr.f32.gmra.mxu0 %v1951_v3  ;;  %v1388_v3 = vld [vmem:[#allocation2 + $0x188] sm:$0xff] }
 0x1c4   : > { %1469 = vrot.lane.b32.xlu0 %v1382_v49, %s2625_s17 }
 0x1c5   : > { %v1452_v51 = vpop.permute.xlu1 %1451 }
 0x1c6   : > { %1534 = vst.msk [vmem:[#allocation3 + $0x70] sm:$0xff] %vm1519_vm7, %v1452_v51  ;;  %v1454_v9 = vpop.permute.xlu0 %1453 }
 0x1c7   : > { %891 = vrot.lane.b32.xlu1 %v1381_v31, %s2622_s25  ;;  %1535 = vst.msk [vmem:[#allocation3 + $0x78] sm:$0xff] %vm1519_vm7, %v1454_v9 }
 0x1c8   : > { %893 = vrot.lane.b32.xlu0 %v1382_v49, %s2622_s25 }
 0x1c9   : > { %v876_v62 = vpop.permute.xlu1 %875 }
 0x1ca   : > { %956 = vst.msk [vmem:[#allocation3 + $0x80] sm:$0xff] %vm939_vm4, %v876_v62  ;;  %v878_v19 = vpop.permute.xlu0 %877 }
 0x1cb   : > { %1660 = vrot.lane.b32.xlu1 %v1574_v59, %s2626_s22  ;;  %957 = vst.msk [vmem:[#allocation3 + $0x88] sm:$0xff] %vm939_vm4, %v878_v19 }
 0x1cc   : > { %1662 = vrot.lane.b32.xlu0 %v1575_v18, %s2626_s22 }
 0x1cd   : > { %v1645_v1 = vpop.permute.xlu1 %1644 }
 0x1ce   : > { %1727 = vst.msk [vmem:[#allocation3 + $0x70] sm:$0xff] %vm1712_vm8, %v1645_v1  ;;  %v1647_v6 = vpop.permute.xlu0 %1646  ;;  %v1581_v1 = vld [vmem:[#allocation2 + $0x189] sm:$0xff] }
 0x1cf   : > { %1084 = vrot.lane.b32.xlu1 %v1574_v59, %s2623_s30  ;;  %1728 = vst.msk [vmem:[#allocation3 + $0x78] sm:$0xff] %vm1712_vm8, %v1647_v6 }
 0x1d0   : > { %1086 = vrot.lane.b32.xlu0 %v1575_v18, %s2623_s30  ;;  %v1580_v18 = vld [vmem:[#allocation2 + $0x181] sm:$0xff] }
 0x1d1   : > { %v1069_v53 = vpop.permute.xlu1 %1068 }
 0x1d2   : > { %1149 = vst.msk [vmem:[#allocation3 + $0x80] sm:$0xff] %vm1132_vm5, %v1069_v53  ;;  %v1071_v20 = vpop.permute.xlu0 %1070 }
 0x1d3   : > { %1853 = vrot.lane.b32.xlu1 %v1767_v30, %s2627_s6  ;;  %1150 = vst.msk [vmem:[#allocation3 + $0x88] sm:$0xff] %vm1132_vm5, %v1071_v20 }
 0x1d4   : > { %1855 = vrot.lane.b32.xlu0 %v1768_v48, %s2627_s6 }
 0x1d5   : > { %v1838_v5 = vpop.permute.xlu1 %1837 }
 0x1d6   : > { %1920 = vst.msk [vmem:[#allocation3 + $0x70] sm:$0xff] %vm1905_vm9, %v1838_v5  ;;  %v1840_v21 = vpop.permute.xlu0 %1839  ;;  %v1774_v5 = vld [vmem:[#allocation2 + $0x18a] sm:$0xff] }
 0x1d7   : > { %1277 = vrot.lane.b32.xlu1 %v1767_v30, %s2624_s8  ;;  %1921 = vst.msk [vmem:[#allocation3 + $0x78] sm:$0xff] %vm1905_vm9, %v1840_v21 }
 0x1d8   : > { %1279 = vrot.lane.b32.xlu0 %v1768_v48, %s2624_s8 }
 0x1d9   : > { %v1262_v7 = vpop.permute.xlu1 %1261 }
 0x1da   : > { %1342 = vst.msk [vmem:[#allocation3 + $0x80] sm:$0xff] %vm1325_vm6, %v1262_v7  ;;  %v1264_v38 = vpop.permute.xlu0 %1263 }
 0x1db   : > { %702 = vrot.lane.b32.xlu1 %v1767_v30, %s2621_s20  ;;  %1343 = vst.msk [vmem:[#allocation3 + $0x88] sm:$0xff] %vm1325_vm6, %v1264_v38  ;;  %v1389_v38 = vld [vmem:[#allocation2 + $0x198] sm:$0xff] }
 0x1dc   : > { %704 = vrot.lane.b32.xlu0 %v1768_v48, %s2621_s20  ;;  %v1773_v48 = vld [vmem:[#allocation2 + $0x182] sm:$0xff] }
 0x1dd   : > { %v687_v12 = vpop.permute.xlu1 %686  ;;  %v1952_v43 = vld [vmem:[#allocation3 + $0x70] sm:$0xff] }
 0x1de   : > { %765 = vst.msk [vmem:[#allocation3 + $0x90] sm:$0xff] %vm746_vm3, %v687_v12  ;;  %2535 = vmatprep.mubr.f32.mxu0 %v1952_v43  ;;  %v689_v27 = vpop.permute.xlu0 %688  ;;  %v1953_v25 = vld [vmem:[#allocation3 + $0x78] sm:$0xff]  ;;  %v1582_v43 = vld [vmem:[#allocation2 + $0x199] sm:$0xff] }
 0x1df   : > { %1471 = vrot.lane.b32.xlu1 %v1383_v42, %s2625_s17  ;;  %766 = vst.msk [vmem:[#allocation3 + $0x98] sm:$0xff] %vm746_vm3, %v689_v27  ;;  %2536 = vmatmul.mubr.f32.gmra.mxu0 %v1953_v25  ;;  %v1390_v27 = vld [vmem:[#allocation2 + $0x1a0] sm:$0xff] }
 0x1e0   : > { %1473 = vrot.lane.b32.xlu0 %v1384_v52, %s2625_s17 }
 0x1e1   : > { %v1456_v32 = vpop.permute.xlu1 %1455 }
 0x1e2   : > { %1536 = vst.msk [vmem:[#allocation3 + $0x80] sm:$0xff] %vm1519_vm7, %v1456_v32  ;;  %v1458_v56 = vpop.permute.xlu0 %1457 }
 0x1e3   : > { %895 = vrot.lane.b32.xlu1 %v1383_v42, %s2622_s25  ;;  %1537 = vst.msk [vmem:[#allocation3 + $0x88] sm:$0xff] %vm1519_vm7, %v1458_v56  ;;  %v1775_v56 = vld [vmem:[#allocation2 + $0x19a] sm:$0xff] }
 0x1e4   : > { %897 = vrot.lane.b32.xlu0 %v1384_v52, %s2622_s25 }
 0x1e5   : > { %v880_v22 = vpop.permute.xlu1 %879 }
 0x1e6   : > { %958 = vst.msk [vmem:[#allocation3 + $0x90] sm:$0xff] %vm939_vm4, %v880_v22  ;;  %v882_v4 = vpop.permute.xlu0 %881 }
 0x1e7   : > { %1664 = vrot.lane.b32.xlu1 %v1576_v61, %s2626_s22  ;;  %959 = vst.msk [vmem:[#allocation3 + $0x98] sm:$0xff] %vm939_vm4, %v882_v4 }
 0x1e8   : > { %1666 = vrot.lane.b32.xlu0 %v1577_v0, %s2626_s22 }
 0x1e9   : > { %v1649_v23 = vpop.permute.xlu1 %1648 }
 0x1ea   : > { %1729 = vst.msk [vmem:[#allocation3 + $0x80] sm:$0xff] %vm1712_vm8, %v1649_v23  ;;  %v1651_v10 = vpop.permute.xlu0 %1650 }
 0x1eb   : > { %1088 = vrot.lane.b32.xlu1 %v1576_v61, %s2623_s30  ;;  %1730 = vst.msk [vmem:[#allocation3 + $0x88] sm:$0xff] %vm1712_vm8, %v1651_v10  ;;  %v1776_v10 = vld [vmem:[#allocation2 + $0x1a2] sm:$0xff] }
 0x1ec   : > { %1090 = vrot.lane.b32.xlu0 %v1577_v0, %s2623_s30  ;;  %v1583_v0 = vld [vmem:[#allocation2 + $0x1a1] sm:$0xff] }
 0x1ed   : > { %v1073_v41 = vpop.permute.xlu1 %1072 }
 0x1ee   : > { %1151 = vst.msk [vmem:[#allocation3 + $0x90] sm:$0xff] %vm1132_vm5, %v1073_v41  ;;  %v1075_v15 = vpop.permute.xlu0 %1074 }
 0x1ef   : > { %1857 = vrot.lane.b32.xlu1 %v1769_v11, %s2627_s6  ;;  %1152 = vst.msk [vmem:[#allocation3 + $0x98] sm:$0xff] %vm1132_vm5, %v1075_v15 }
 0x1f0   : > { %1859 = vrot.lane.b32.xlu0 %v1770_v24, %s2627_s6 }
 0x1f1   : > { %v1842_v44 = vpop.permute.xlu1 %1841 }
 0x1f2   : > { %1922 = vst.msk [vmem:[#allocation3 + $0x80] sm:$0xff] %vm1905_vm9, %v1842_v44  ;;  %v1844_v55 = vpop.permute.xlu0 %1843 }
 0x1f3   : > { %1281 = vrot.lane.b32.xlu1 %v1769_v11, %s2624_s8  ;;  %1923 = vst.msk [vmem:[#allocation3 + $0x88] sm:$0xff] %vm1905_vm9, %v1844_v55 }
 0x1f4   : > { %1283 = vrot.lane.b32.xlu0 %v1770_v24, %s2624_s8 }
 0x1f5   : > { %v1266_v28 = vpop.permute.xlu1 %1265 }
 0x1f6   : > { %1344 = vst.msk [vmem:[#allocation3 + $0x90] sm:$0xff] %vm1325_vm6, %v1266_v28  ;;  %v1268_v29 = vpop.permute.xlu0 %1267 }
 0x1f7   : > { %706 = vrot.lane.b32.xlu1 %v1769_v11, %s2621_s20  ;;  %1345 = vst.msk [vmem:[#allocation3 + $0x98] sm:$0xff] %vm1325_vm6, %v1268_v29 }
 0x1f8   : > { %708 = vrot.lane.b32.xlu0 %v1770_v24, %s2621_s20 }
 0x1f9   : > { %v691_v58 = vpop.permute.xlu1 %690  ;;  %v1954_v33 = vld [vmem:[#allocation3 + $0x80] sm:$0xff] }
 0x1fa   : > { %767 = vst.msk [vmem:[#allocation3 + $0xa0] sm:$0xff] %vm746_vm3, %v691_v58  ;;  %2538 = vmatprep.mubr.f32.mxu1 %v1954_v33  ;;  %v693_v13 = vpop.permute.xlu0 %692  ;;  %v1955_v46 = vld [vmem:[#allocation3 + $0x88] sm:$0xff] }
 0x1fb   : > { %1475 = vrot.lane.b32.xlu1 %v1385_v40, %s2625_s17  ;;  %768 = vst.msk [vmem:[#allocation3 + $0xa8] sm:$0xff] %vm746_vm3, %v693_v13  ;;  %2539 = vmatmul.mubr.f32.vlgmr.msra.gmra.mxu1 %v1955_v46 }
 0x1fc   : > { %1477 = vrot.lane.b32.xlu0 %v1386_v26, %s2625_s17 }
 0x1fd   : > { %v1460_v47 = vpop.permute.xlu1 %1459 }
 0x1fe   : > { %1538 = vst.msk [vmem:[#allocation3 + $0x90] sm:$0xff] %vm1519_vm7, %v1460_v47  ;;  %v1462_v8 = vpop.permute.xlu0 %1461 }
 0x1ff   : > { %899 = vrot.lane.b32.xlu1 %v1385_v40, %s2622_s25  ;;  %1539 = vst.msk [vmem:[#allocation3 + $0x98] sm:$0xff] %vm1519_vm7, %v1462_v8 }
 0x200   : > { %901 = vrot.lane.b32.xlu0 %v1386_v26, %s2622_s25 }
 0x201   : > { %v884_v63 = vpop.permute.xlu1 %883 }
 0x202   : > { %960 = vst.msk [vmem:[#allocation3 + $0xa0] sm:$0xff] %vm939_vm4, %v884_v63  ;;  %v886_v2 = vpop.permute.xlu0 %885 }
 0x203   : > { %1668 = vrot.lane.b32.xlu1 %v1578_v17, %s2626_s22  ;;  %961 = vst.msk [vmem:[#allocation3 + $0xa8] sm:$0xff] %vm939_vm4, %v886_v2 }
 0x204   : > { %1670 = vrot.lane.b32.xlu0 %v1579_v34, %s2626_s22 }
 0x205   : > { %v1653_v14 = vpop.permute.xlu1 %1652 }
 0x206   : > { %1731 = vst.msk [vmem:[#allocation3 + $0x90] sm:$0xff] %vm1712_vm8, %v1653_v14  ;;  %v1655_v57 = vpop.permute.xlu0 %1654 }
 0x207   : > { %1092 = vrot.lane.b32.xlu1 %v1578_v17, %s2623_s30  ;;  %1732 = vst.msk [vmem:[#allocation3 + $0x98] sm:$0xff] %vm1712_vm8, %v1655_v57 }
 0x208   : > { %1094 = vrot.lane.b32.xlu0 %v1579_v34, %s2623_s30 }
 0x209   : > { %v1077_v36 = vpop.permute.xlu1 %1076 }
 0x20a   : > { %1153 = vst.msk [vmem:[#allocation3 + $0xa0] sm:$0xff] %vm1132_vm5, %v1077_v36  ;;  %v1079_v60 = vpop.permute.xlu0 %1078 }
 0x20b   : > { %1861 = vrot.lane.b32.xlu1 %v1771_v35, %s2627_s6  ;;  %1154 = vst.msk [vmem:[#allocation3 + $0xa8] sm:$0xff] %vm1132_vm5, %v1079_v60 }
 0x20c   : > { %1863 = vrot.lane.b32.xlu0 %v1772_v45, %s2627_s6 }
 0x20d   : > { %v1846_v37 = vpop.permute.xlu1 %1845 }
 0x20e   : > { %1924 = vst.msk [vmem:[#allocation3 + $0x90] sm:$0xff] %vm1905_vm9, %v1846_v37  ;;  %v1848_v39 = vpop.permute.xlu0 %1847 }
 0x20f   : > { %1285 = vrot.lane.b32.xlu1 %v1771_v35, %s2624_s8  ;;  %1925 = vst.msk [vmem:[#allocation3 + $0x98] sm:$0xff] %vm1905_vm9, %v1848_v39 }
 0x210   : > { %1287 = vrot.lane.b32.xlu0 %v1772_v45, %s2624_s8 }
 0x211   : > { %v1270_v31 = vpop.permute.xlu1 %1269 }
 0x212   : > { %1346 = vst.msk [vmem:[#allocation3 + $0xa0] sm:$0xff] %vm1325_vm6, %v1270_v31  ;;  %v1272_v16 = vpop.permute.xlu0 %1271 }
 0x213   : > { %710 = vrot.lane.b32.xlu1 %v1771_v35, %s2621_s20  ;;  %1347 = vst.msk [vmem:[#allocation3 + $0xa8] sm:$0xff] %vm1325_vm6, %v1272_v16 }
 0x214   : > { %712 = vrot.lane.b32.xlu0 %v1772_v45, %s2621_s20 }
 0x215   : > { %v695_v49 = vpop.permute.xlu1 %694  ;;  %v1956_v50 = vld [vmem:[#allocation3 + $0x90] sm:$0xff] }
 0x216   : > { %769 = vst.msk [vmem:[#allocation3 + $0xb0] sm:$0xff] %vm746_vm3, %v695_v49  ;;  %2541 = vmatprep.mubr.f32.mxu1 %v1956_v50  ;;  %v697_v51 = vpop.permute.xlu0 %696  ;;  %v1957_v9 = vld [vmem:[#allocation3 + $0x98] sm:$0xff] }
 0x217   : > { %1479 = vrot.lane.b32.xlu1 %v1387_v54, %s2625_s17  ;;  %770 = vst.msk [vmem:[#allocation3 + $0xb8] sm:$0xff] %vm746_vm3, %v697_v51  ;;  %2542 = vmatmul.mubr.f32.gmra.mxu1 %v1957_v9 }
 0x218   : > { %1481 = vrot.lane.b32.xlu0 %v1388_v3, %s2625_s17 }
 0x219   : > { %v1464_v59 = vpop.permute.xlu1 %1463 }
 0x21a   : > { %1540 = vst.msk [vmem:[#allocation3 + $0xa0] sm:$0xff] %vm1519_vm7, %v1464_v59  ;;  %v1466_v62 = vpop.permute.xlu0 %1465 }
 0x21b   : > { %903 = vrot.lane.b32.xlu1 %v1387_v54, %s2622_s25  ;;  %1541 = vst.msk [vmem:[#allocation3 + $0xa8] sm:$0xff] %vm1519_vm7, %v1466_v62 }
 0x21c   : > { %905 = vrot.lane.b32.xlu0 %v1388_v3, %s2622_s25  ;;  %s172_s25 = scalar_lea.vmem %s3876_s2, %s3880_s13 }
 0x21d   : > { %v888_v19 = vpop.permute.xlu1 %887 }
 0x21e   : > { %962 = vst.msk [vmem:[#allocation3 + $0xb0] sm:$0xff] %vm939_vm4, %v888_v19  ;;  %v890_v6 = vpop.permute.xlu0 %889 }
 0x21f   : > { %1672 = vrot.lane.b32.xlu1 %v1580_v18, %s2626_s22  ;;  %963 = vst.msk [vmem:[#allocation3 + $0xb8] sm:$0xff] %vm939_vm4, %v890_v6 }
 0x220   : > { %1674 = vrot.lane.b32.xlu0 %v1581_v1, %s2626_s22 }
 0x221   : > { %v1657_v30 = vpop.permute.xlu1 %1656 }
 0x222   : > { %1733 = vst.msk [vmem:[#allocation3 + $0xa0] sm:$0xff] %vm1712_vm8, %v1657_v30  ;;  %v1659_v53 = vpop.permute.xlu0 %1658 }
 0x223   : > { %1096 = vrot.lane.b32.xlu1 %v1580_v18, %s2623_s30  ;;  %1734 = vst.msk [vmem:[#allocation3 + $0xa8] sm:$0xff] %vm1712_vm8, %v1659_v53 }
 0x224   : > { %1098 = vrot.lane.b32.xlu0 %v1581_v1, %s2623_s30 }
 0x225   : > { %v1081_v20 = vpop.permute.xlu1 %1080 }
 0x226   : > { %1155 = vst.msk [vmem:[#allocation3 + $0xb0] sm:$0xff] %vm1132_vm5, %v1081_v20  ;;  %v1083_v21 = vpop.permute.xlu0 %1082 }
 0x227   : > { %1865 = vrot.lane.b32.xlu1 %v1773_v48, %s2627_s6  ;;  %1156 = vst.msk [vmem:[#allocation3 + $0xb8] sm:$0xff] %vm1132_vm5, %v1083_v21 }
 0x228   : > { %1867 = vrot.lane.b32.xlu0 %v1774_v5, %s2627_s6 }
 0x229   : > { %v1850_v7 = vpop.permute.xlu1 %1849 }
 0x22a   : > { %1926 = vst.msk [vmem:[#allocation3 + $0xa0] sm:$0xff] %vm1905_vm9, %v1850_v7  ;;  %v1852_v42 = vpop.permute.xlu0 %1851 }
 0x22b   : > { %1289 = vrot.lane.b32.xlu1 %v1773_v48, %s2624_s8  ;;  %1927 = vst.msk [vmem:[#allocation3 + $0xa8] sm:$0xff] %vm1905_vm9, %v1852_v42 }
 0x22c   : > { %1483 = vrot.lane.b32.xlu0 %v1389_v38, %s2625_s17 }
 0x22d   : > { %v1274_v12 = vpop.permute.xlu1 %1273 }
 0x22e   : > { %1348 = vst.msk [vmem:[#allocation3 + $0xb0] sm:$0xff] %vm1325_vm6, %v1274_v12  ;;  %v1276_v52 = vpop.permute.xlu0 %1275 }
 0x22f   : > { %1291 = vrot.lane.b32.xlu1 %v1774_v5, %s2624_s8  ;;  %1349 = vst.msk [vmem:[#allocation3 + $0xb8] sm:$0xff] %vm1325_vm6, %v1276_v52 }
 0x230   : > { %1676 = vrot.lane.b32.xlu0 %v1582_v43, %s2626_s22 }
 0x231   : > { %v699_v25 = vpop.permute.xlu1 %698  ;;  %v1958_v32 = vld [vmem:[#allocation3 + $0xa0] sm:$0xff] }
 0x232   : > { %771 = vst.msk [vmem:[#allocation3 + $0xc0] sm:$0xff] %vm746_vm3, %v699_v25  ;;  %2544 = vmatprep.mubr.f32.mxu1 %v1958_v32  ;;  %v701_v61 = vpop.permute.xlu0 %700  ;;  %v1959_v22 = vld [vmem:[#allocation3 + $0xa8] sm:$0xff] }
 0x233   : > { %1485 = vrot.lane.b32.xlu1 %v1390_v27, %s2625_s17  ;;  %772 = vst.msk [vmem:[#allocation3 + $0xc8] sm:$0xff] %vm746_vm3, %v701_v61  ;;  %2545 = vmatmul.mubr.f32.gmra.mxu1 %v1959_v22 }
 0x234   : > { %1869 = vrot.lane.b32.xlu0 %v1775_v56, %s2627_s6 }
 0x235   : > { %v1468_v4 = vpop.permute.xlu1 %1467 }
 0x236   : > { %1542 = vst.msk [vmem:[#allocation3 + $0xb0] sm:$0xff] %vm1519_vm7, %v1468_v4  ;;  %v1470_v23 = vpop.permute.xlu0 %1469 }
 0x237   : > { %1678 = vrot.lane.b32.xlu1 %v1583_v0, %s2626_s22  ;;  %1543 = vst.msk [vmem:[#allocation3 + $0xb8] sm:$0xff] %vm1519_vm7, %v1470_v23 }
 0x239   : > { %v892_v11 = vpop.permute.xlu1 %891 }
 0x23a   : > { %964 = vst.msk [vmem:[#allocation3 + $0xc0] sm:$0xff] %vm939_vm4, %v892_v11  ;;  %v894_v41 = vpop.permute.xlu0 %893 }
 0x23b   : > { %1871 = vrot.lane.b32.xlu1 %v1776_v10, %s2627_s6  ;;  %965 = vst.msk [vmem:[#allocation3 + $0xc8] sm:$0xff] %vm939_vm4, %v894_v41 }
 0x23d   : > { %v1661_v24 = vpop.permute.xlu1 %1660 }
 0x23e   : > { %1735 = vst.msk [vmem:[#allocation3 + $0xb0] sm:$0xff] %vm1712_vm8, %v1661_v24  ;;  %v1663_v15 = vpop.permute.xlu0 %1662 }
 0x23f   : > { %1736 = vst.msk [vmem:[#allocation3 + $0xb8] sm:$0xff] %vm1712_vm8, %v1663_v15 }
 0x241   : > { %v1085_v44 = vpop.permute.xlu1 %1084 }
 0x242   : > { %1157 = vst.msk [vmem:[#allocation3 + $0xc0] sm:$0xff] %vm1132_vm5, %v1085_v44  ;;  %v1087_v55 = vpop.permute.xlu0 %1086  ;;  %v3700_v44 = vpop.f32.mrf.mxu0 }
 0x243   : > { %1158 = vst.msk [vmem:[#allocation3 + $0xc8] sm:$0xff] %vm1132_vm5, %v1087_v55 }
 0x244   : > { %v3702_v55 = vpop.f32.mrf.mxu0 }
 0x245   : > { %v1854_v28 = vpop.permute.xlu1 %1853 }
 0x246   : > { %1928 = vst.msk [vmem:[#allocation3 + $0xb0] sm:$0xff] %vm1905_vm9, %v1854_v28  ;;  %v1856_v29 = vpop.permute.xlu0 %1855  ;;  %v3704_v28 = vpop.f32.mrf.mxu0 }
 0x247   : > { %1929 = vst.msk [vmem:[#allocation3 + $0xb8] sm:$0xff] %vm1905_vm9, %v1856_v29 }
 0x248   : > { %v3706_v29 = vpop.f32.mrf.mxu0 }
 0x249   : > { %v1278_v40 = vpop.permute.xlu1 %1277 }
 0x24a   : > { %1350 = vst.msk [vmem:[#allocation3 + $0xc0] sm:$0xff] %vm1325_vm6, %v1278_v40  ;;  %v1280_v58 = vpop.permute.xlu0 %1279  ;;  %v2211_v40 = vadd.f32 %v3700_v44, %v3702_v55 }
 0x24b   : > { %1351 = vst.msk [vmem:[#allocation3 + $0xc8] sm:$0xff] %vm1325_vm6, %v1280_v58  ;;  %v3710_v58 = vpop.f32.mrf.mxu0 }
 0x24d   : > { %v703_v33 = vpop.permute.xlu1 %702  ;;  %v1960_v26 = vld [vmem:[#allocation3 + $0xb0] sm:$0xff] }
 0x24e   : > { %773 = vst.msk [vmem:[#allocation3 + $0xd0] sm:$0xff] %vm746_vm3, %v703_v33  ;;  %2547 = vmatprep.mubr.f32.mxu1 %v1960_v26  ;;  %v705_v13 = vpop.permute.xlu0 %704  ;;  %v1961_v46 = vld [vmem:[#allocation3 + $0xb8] sm:$0xff]  ;;  %v2212_v33 = vadd.f32 %v2211_v40, %v3706_v29  ;;  %v3713_v26 = vpop.f32.mrf.mxu0 }
 0x24f   : > { %774 = vst.msk [vmem:[#allocation3 + $0xd8] sm:$0xff] %vm746_vm3, %v705_v13  ;;  %2548 = vmatmul.mubr.f32.gmra.mxu1 %v1961_v46 }
 0x250   : > { %v2213_v13 = vadd.f32 %v3704_v28, %v2212_v33  ;;  %v3716_v46 = vpop.f32.mrf.mxu0 }
 0x251   : > { %v1472_v47 = vpop.permute.xlu1 %1471 }
 0x252   : > { %1544 = vst.msk [vmem:[#allocation3 + $0xc0] sm:$0xff] %vm1519_vm7, %v1472_v47  ;;  %v1474_v8 = vpop.permute.xlu0 %1473  ;;  %v2214_v47 = vadd.f32 %v2213_v13, %v3713_v26 }
 0x253   : > { %1545 = vst.msk [vmem:[#allocation3 + $0xc8] sm:$0xff] %vm1519_vm7, %v1474_v8  ;;  %v3719_v8 = vpop.f32.mrf.mxu0 }
 0x255   : > { %v896_v17 = vpop.permute.xlu1 %895 }
 0x256   : > { %966 = vst.msk [vmem:[#allocation3 + $0xd0] sm:$0xff] %vm939_vm4, %v896_v17  ;;  %v898_v63 = vpop.permute.xlu0 %897  ;;  %v2215_v17 = vadd.f32 %v3710_v58, %v2214_v47 }
 0x257   : > { %967 = vst.msk [vmem:[#allocation3 + $0xd8] sm:$0xff] %vm939_vm4, %v898_v63  ;;  %v3722_v63 = vpop.f32.mrf.mxu0 }
 0x259   : > { %v1665_v34 = vpop.permute.xlu1 %1664 }
 0x25a   : > { %1737 = vst.msk [vmem:[#allocation3 + $0xc0] sm:$0xff] %vm1712_vm8, %v1665_v34  ;;  %v1667_v2 = vpop.permute.xlu0 %1666  ;;  %v2216_v34 = vadd.f32 %v2215_v17, %v3719_v8 }
 0x25b   : > { %1738 = vst.msk [vmem:[#allocation3 + $0xc8] sm:$0xff] %vm1712_vm8, %v1667_v2  ;;  %v3725_v2 = vpop.f32.mrf.mxu0 }
 0x25d   : > { %v1089_v14 = vpop.permute.xlu1 %1088 }
 0x25e   : > { %1159 = vst.msk [vmem:[#allocation3 + $0xd0] sm:$0xff] %vm1132_vm5, %v1089_v14  ;;  %v1091_v57 = vpop.permute.xlu0 %1090  ;;  %v2217_v14 = vadd.f32 %v3716_v46, %v2216_v34 }
 0x25f   : > { %1160 = vst.msk [vmem:[#allocation3 + $0xd8] sm:$0xff] %vm1132_vm5, %v1091_v57 }
 0x261   : > { %v1858_v35 = vpop.permute.xlu1 %1857 }
 0x262   : > { %1930 = vst.msk [vmem:[#allocation3 + $0xc0] sm:$0xff] %vm1905_vm9, %v1858_v35  ;;  %v1860_v36 = vpop.permute.xlu0 %1859  ;;  %v2218_v35 = vadd.f32 %v2217_v14, %v3725_v2 }
 0x263   : > { %1931 = vst.msk [vmem:[#allocation3 + $0xc8] sm:$0xff] %vm1905_vm9, %v1860_v36 }
 0x265   : > { %v1282_v45 = vpop.permute.xlu1 %1281 }
 0x266   : > { %1352 = vst.msk [vmem:[#allocation3 + $0xd0] sm:$0xff] %vm1325_vm6, %v1282_v45  ;;  %v1284_v60 = vpop.permute.xlu0 %1283  ;;  %v2219_v45 = vadd.f32 %v3722_v63, %v2218_v35 }
 0x267   : > { %1353 = vst.msk [vmem:[#allocation3 + $0xd8] sm:$0xff] %vm1325_vm6, %v1284_v60  ;;  %v3728_v57 = vpop.f32.mrf.mxu0 }
 0x269   : > { %v707_v37 = vpop.permute.xlu1 %706  ;;  %v1962_v39 = vld [vmem:[#allocation3 + $0xc0] sm:$0xff]  ;;  %v3731_v36 = vpop.f32.mrf.mxu0 }
 0x26a   : > { %775 = vst.msk [vmem:[#allocation3 + $0xe0] sm:$0xff] %vm746_vm3, %v707_v37  ;;  %2550 = vmatprep.mubr.f32.mxu1 %v1962_v39  ;;  %v709_v31 = vpop.permute.xlu0 %708  ;;  %v1963_v16 = vld [vmem:[#allocation3 + $0xc8] sm:$0xff]  ;;  %v2220_v37 = vadd.f32 %v2219_v45, %v3731_v36 }
 0x26b   : > { %776 = vst.msk [vmem:[#allocation3 + $0xe8] sm:$0xff] %vm746_vm3, %v709_v31  ;;  %2551 = vmatmul.mubr.f32.gmra.mxu1 %v1963_v16 }
 0x26c   : > { %v2221_v31 = vadd.f32 %v3728_v57, %v2220_v37 }
 0x26d   : > { %v1476_v54 = vpop.permute.xlu1 %1475 }
 0x26e   : > { %1546 = vst.msk [vmem:[#allocation3 + $0xd0] sm:$0xff] %vm1519_vm7, %v1476_v54  ;;  %v1478_v49 = vpop.permute.xlu0 %1477 }
 0x26f   : > { %1547 = vst.msk [vmem:[#allocation3 + $0xd8] sm:$0xff] %vm1519_vm7, %v1478_v49 }
 0x271   : > { %v900_v50 = vpop.permute.xlu1 %899 }
 0x272   : > { %968 = vst.msk [vmem:[#allocation3 + $0xe0] sm:$0xff] %vm939_vm4, %v900_v50  ;;  %v902_v3 = vpop.permute.xlu0 %901 }
 0x273   : > { %969 = vst.msk [vmem:[#allocation3 + $0xe8] sm:$0xff] %vm939_vm4, %v902_v3 }
 0x275   : > { %v1669_v51 = vpop.permute.xlu1 %1668 }
 0x276   : > { %1739 = vst.msk [vmem:[#allocation3 + $0xd0] sm:$0xff] %vm1712_vm8, %v1669_v51  ;;  %v1671_v9 = vpop.permute.xlu0 %1670 }
 0x277   : > { %1740 = vst.msk [vmem:[#allocation3 + $0xd8] sm:$0xff] %vm1712_vm8, %v1671_v9 }
 0x279   : > { %v1093_v59 = vpop.permute.xlu1 %1092 }
 0x27a   : > { %1161 = vst.msk [vmem:[#allocation3 + $0xe0] sm:$0xff] %vm1132_vm5, %v1093_v59  ;;  %v1095_v62 = vpop.permute.xlu0 %1094 }
 0x27b   : > { %1162 = vst.msk [vmem:[#allocation3 + $0xe8] sm:$0xff] %vm1132_vm5, %v1095_v62 }
 0x27d   : > { %v1862_v18 = vpop.permute.xlu1 %1861 }
 0x27e   : > { %1932 = vst.msk [vmem:[#allocation3 + $0xd0] sm:$0xff] %vm1905_vm9, %v1862_v18  ;;  %v1864_v19 = vpop.permute.xlu0 %1863 }
 0x27f   : > { %1933 = vst.msk [vmem:[#allocation3 + $0xd8] sm:$0xff] %vm1905_vm9, %v1864_v19 }
 0x281   : > { %v1286_v1 = vpop.permute.xlu1 %1285 }
 0x282   : > { %1354 = vst.msk [vmem:[#allocation3 + $0xe0] sm:$0xff] %vm1325_vm6, %v1286_v1  ;;  %v1288_v6 = vpop.permute.xlu0 %1287 }
 0x283   : > { %1355 = vst.msk [vmem:[#allocation3 + $0xe8] sm:$0xff] %vm1325_vm6, %v1288_v6  ;;  %v3734_v60 = vpop.f32.mrf.mxu0 }
 0x285   : > { %v711_v30 = vpop.permute.xlu1 %710  ;;  %v1964_v53 = vld [vmem:[#allocation3 + $0xd0] sm:$0xff]  ;;  %v3737_v39 = vpop.f32.mrf.mxu0 }
 0x286   : > { %777 = vst.msk [vmem:[#allocation3 + $0xf0] sm:$0xff] %vm746_vm3, %v711_v30  ;;  %2553 = vmatprep.mubr.f32.mxu1 %v1964_v53  ;;  %v713_v48 = vpop.permute.xlu0 %712  ;;  %v1965_v20 = vld [vmem:[#allocation3 + $0xd8] sm:$0xff]  ;;  %v2222_v54 = vadd.f32 %v2221_v31, %v3737_v39 }
 0x287   : > { %778 = vst.msk [vmem:[#allocation3 + $0xf8] sm:$0xff] %vm746_vm3, %v713_v48  ;;  %2554 = vmatmul.mubr.f32.gmra.mxu1 %v1965_v20 }
 0x288   : > { %v2223_v50 = vadd.f32 %v3734_v60, %v2222_v54 }
 0x289   : > { %v1480_v5 = vpop.permute.xlu1 %1479 }
 0x28a   : > { %1548 = vst.msk [vmem:[#allocation3 + $0xe0] sm:$0xff] %vm1519_vm7, %v1480_v5  ;;  %v1482_v21 = vpop.permute.xlu0 %1481 }
 0x28b   : > { %1549 = vst.msk [vmem:[#allocation3 + $0xe8] sm:$0xff] %vm1519_vm7, %v1482_v21 }
 0x28d   : > { %v904_v7 = vpop.permute.xlu1 %903 }
 0x28e   : > { %970 = vst.msk [vmem:[#allocation3 + $0xf0] sm:$0xff] %vm939_vm4, %v904_v7  ;;  %v906_v38 = vpop.permute.xlu0 %905 }
 0x28f   : > { %971 = vst.msk [vmem:[#allocation3 + $0xf8] sm:$0xff] %vm939_vm4, %v906_v38 }
 0x291   : > { %v1673_v42 = vpop.permute.xlu1 %1672 }
 0x292   : > { %1741 = vst.msk [vmem:[#allocation3 + $0xe0] sm:$0xff] %vm1712_vm8, %v1673_v42  ;;  %v1675_v12 = vpop.permute.xlu0 %1674 }
 0x293   : > { %1742 = vst.msk [vmem:[#allocation3 + $0xe8] sm:$0xff] %vm1712_vm8, %v1675_v12 }
 0x295   : > { %v1097_v43 = vpop.permute.xlu1 %1096 }
 0x296   : > { %1163 = vst.msk [vmem:[#allocation3 + $0xf0] sm:$0xff] %vm1132_vm5, %v1097_v43  ;;  %v1099_v52 = vpop.permute.xlu0 %1098 }
 0x297   : > { %1164 = vst.msk [vmem:[#allocation3 + $0xf8] sm:$0xff] %vm1132_vm5, %v1099_v52 }
 0x299   : > { %v1866_v27 = vpop.permute.xlu1 %1865 }
 0x29a   : > { %1934 = vst.msk [vmem:[#allocation3 + $0xe0] sm:$0xff] %vm1905_vm9, %v1866_v27  ;;  %v1868_v25 = vpop.permute.xlu0 %1867 }
 0x29b   : > { %1935 = vst.msk [vmem:[#allocation3 + $0xe8] sm:$0xff] %vm1905_vm9, %v1868_v25 }
 0x29d   : > { %v1290_v32 = vpop.permute.xlu1 %1289 }
 0x29e   : > { %1356 = vst.msk [vmem:[#allocation3 + $0xf0] sm:$0xff] %vm1325_vm6, %v1290_v32  ;;  %v1484_v56 = vpop.permute.xlu0 %1483 }
 0x29f   : > { %1550 = vst.msk [vmem:[#allocation3 + $0xf0] sm:$0xff] %vm1519_vm7, %v1484_v56  ;;  %v3740_v16 = vpop.f32.mrf.mxu0 }
 0x2a1   : > { %v1292_v61 = vpop.permute.xlu1 %1291  ;;  %v1966_v22 = vld [vmem:[#allocation3 + $0xe0] sm:$0xff]  ;;  %v3743_v49 = vpop.f32.mrf.mxu0 }
 0x2a2   : > { %1357 = vst.msk [vmem:[#allocation3 + $0xf8] sm:$0xff] %vm1325_vm6, %v1292_v61  ;;  %2556 = vmatprep.mubr.f32.mxu1 %v1966_v22  ;;  %v1967_v0 = vld [vmem:[#allocation3 + $0xe8] sm:$0xff]  ;;  %v1677_v4 = vpop.permute.xlu0 %1676  ;;  %v2224_v51 = vadd.f32 %v2223_v50, %v3743_v49 }
 0x2a3   : > { %2557 = vmatmul.mubr.f32.gmra.mxu1 %v1967_v0  ;;  %1743 = vst.msk [vmem:[#allocation3 + $0xf0] sm:$0xff] %vm1712_vm8, %v1677_v4 }
 0x2a4   : > { %v2225_v59 = vadd.f32 %v3740_v16, %v2224_v51 }
 0x2a5   : > { %v1486_v23 = vpop.permute.xlu1 %1485 }
 0x2a6   : > { %1551 = vst.msk [vmem:[#allocation3 + $0xf8] sm:$0xff] %vm1519_vm7, %v1486_v23  ;;  %v1870_v10 = vpop.permute.xlu0 %1869 }
 0x2a7   : > { %1936 = vst.msk [vmem:[#allocation3 + $0xf0] sm:$0xff] %vm1905_vm9, %v1870_v10 }
 0x2a9   : > { %v1679_v11 = vpop.permute.xlu1 %1678 }
 0x2aa   : > { %1744 = vst.msk [vmem:[#allocation3 + $0xf8] sm:$0xff] %vm1712_vm8, %v1679_v11 }
 0x2ad   : > { %v1872_v41 = vpop.permute.xlu1 %1871 }
 0x2ae   : > { %1937 = vst.msk [vmem:[#allocation3 + $0xf8] sm:$0xff] %vm1905_vm9, %v1872_v41  ;;  %v1968_v24 = vld [vmem:[#allocation3 + $0xf0] sm:$0xff] }
 0x2af   : > { %2559 = vmatprep.mubr.f32.mxu1 %v1968_v24 }
 0x2b5   : > { %v1969_v15 = vld [vmem:[#allocation3 + $0xf8] sm:$0xff] }
 0x2b6   : > { %2560 = vmatmul.mubr.f32.gmra.mxu1 %v1969_v15 }
 0x2bb   : > { %v3746_v3 = vpop.f32.mrf.mxu1 }
 0x2bd   : > { %v3749_v9 = vpop.f32.mrf.mxu1 }
 0x2be   : > { %v2226_v18 = vadd.f32 %v2225_v59, %v3749_v9 }
 0x2c0   : > { %v2227_v1 = vadd.f32 %v3746_v3, %v2226_v18 }
 0x2d7   : > { %v3752_v62 = vpop.f32.mrf.mxu1 }
 0x2d9   : > { %v3755_v19 = vpop.f32.mrf.mxu1 }
 0x2da   : > { %v2228_v30 = vadd.f32 %v2227_v1, %v3755_v19 }
 0x2dc   : > { %v2229_v48 = vadd.f32 %v3752_v62, %v2228_v30 }
 0x2f3   : > { %v3758_v6 = vpop.f32.mrf.mxu1 }
 0x2f5   : > { %v3761_v53 = vpop.f32.mrf.mxu1 }
 0x2f6   : > { %v2230_v5 = vadd.f32 %v2229_v48, %v3761_v53 }
 0x2f8   : > { %v2231_v7 = vadd.f32 %v3758_v6, %v2230_v5 }
 0x30f   : > { %v3764_v20 = vpop.f32.mrf.mxu1 }
 0x311   : > { %v3767_v21 = vpop.f32.mrf.mxu1 }
 0x312   : > { %v2232_v42 = vadd.f32 %v2231_v7, %v3767_v21 }
 0x314   : > { %v2233_v43 = vadd.f32 %v3764_v20, %v2232_v42 }
 0x32b   : > { %v3770_v38 = vpop.f32.mrf.mxu1 }
 0x32d   : > { %v3773_v12 = vpop.f32.mrf.mxu1 }
 0x32e   : > { %v2234_v27 = vadd.f32 %v2233_v43, %v3773_v12 }
 0x330   : > { %v2235_v32 = vadd.f32 %v3770_v38, %v2234_v27 }
 0x347   : > { %v3776_v52 = vpop.f32.mrf.mxu1 }
 0x349   : > { %v3779_v25 = vpop.f32.mrf.mxu1 }
 0x34a   : > { %v2236_v61 = vadd.f32 %v2235_v32, %v3779_v25 }
 0x34c   : > { %v2237_v0 = vadd.f32 %v3776_v52, %v2236_v61 }
 0x363   : > { %v2558_v56 = vpop.f32.mrf.mxu1 }
 0x365   : > { %v2192_v22 = vpop.f32.mrf.mxu1 }
 0x366   : > { %v2238_v4 = vadd.f32 %v2237_v0, %v2192_v22 }
 0x368   : > { %v2239_v10 = vadd.f32 %v2558_v56, %v2238_v4 }
 0x376   : > { %v2561_v23 = vpop.f32.mrf.mxu1 }
 0x378   : > { %v2202_v11 = vpop.f32.mrf.mxu1 }
 0x379   : > { %v2240_v41 = vadd.f32 %v2239_v10, %v2202_v11 }
 0x37b   : > { %v2241_v24 = vadd.f32 %v2561_v23, %v2240_v41 }
 0x37d   : > { %v2242_v15 = vrot.slane %v2241_v24, 4 }
 0x37f   : > { %v2243_v40 = vadd.f32 %v2242_v15, %v2241_v24 }
 0x381   : > { %v2244_v33 = vrot.slane %v2243_v40, 2 }
 0x383   : > { %v2245_v13 = vadd.f32 %v2244_v33, %v2243_v40 }
 0x385   : > { %v2246_v47 = vrot.slane %v2245_v13, 1 }
 0x387   : > { %v2247_v17 = vadd.f32 %v2246_v47, %v2245_v13 }
 0x389   : > { %v3788_v34 = vmul.f32 0.00390625, %v2247_v17 }
 0x38b   : > { %2281 = vst [vmem:[%s172_s25] sm:$0x1] %v3788_v34  ;;  %v3792_v14 = vsub.f32 %v2192_v22, %v3788_v34  ;;  %v3795_v35 = vsub.f32 %v2558_v56, %v3788_v34  ;;  %v3798_v45 = vsub.f32 %v2202_v11, %v3788_v34  ;;  %v3801_v37 = vsub.f32 %v2561_v23, %v3788_v34 }
 0x38c   : > { %v2249_v31 = vsub.f32 %v3702_v55, %v3788_v34  ;;  %v2250_v54 = vsub.f32 %v3700_v44, %v3788_v34  ;;  %v2251_v50 = vsub.f32 %v3706_v29, %v3788_v34  ;;  %v2252_v18 = vsub.f32 %v3704_v28, %v3788_v34 }
 0x38d   : > { %v2253_v1 = vsub.f32 %v3713_v26, %v3788_v34  ;;  %v2254_v5 = vsub.f32 %v3710_v58, %v3788_v34  ;;  %v2255_v44 = vsub.f32 %v3719_v8, %v3788_v34  ;;  %v2256_v43 = vsub.f32 %v3716_v46, %v3788_v34 }
 0x38e   : > { %v2282_v51 = vmul.f32 %v2249_v31, %v2249_v31  ;;  %v2283_v59 = vmul.f32 %v2250_v54, %v2250_v54  ;;  %v2284_v30 = vmul.f32 %v2251_v50, %v2251_v50  ;;  %v2285_v55 = vmul.f32 %v2252_v18, %v2252_v18 }
 0x38f   : > { %v2286_v42 = vmul.f32 %v2253_v1, %v2253_v1  ;;  %v2287_v27 = vmul.f32 %v2254_v5, %v2254_v5  ;;  %v2257_v26 = vsub.f32 %v3725_v2, %v3788_v34  ;;  %v2288_v32 = vmul.f32 %v2255_v44, %v2255_v44 }
 0x390   : > { %v2314_v48 = vadd.f32 %v2283_v59, %v2282_v51  ;;  %v2258_v58 = vsub.f32 %v3722_v63, %v3788_v34  ;;  %v2289_v61 = vmul.f32 %v2256_v43, %v2256_v43  ;;  %v2259_v8 = vsub.f32 %v3731_v36, %v3788_v34 }
 0x391   : > { %v2290_v0 = vmul.f32 %v2257_v26, %v2257_v26  ;;  %v2260_v46 = vsub.f32 %v3728_v57, %v3788_v34  ;;  %v2261_v2 = vsub.f32 %v3737_v39, %v3788_v34  ;;  %v2262_v63 = vsub.f32 %v3734_v60, %v3788_v34 }
 0x392   : > { %v2315_v7 = vadd.f32 %v2314_v48, %v2284_v30  ;;  %v2291_v23 = vmul.f32 %v2258_v58, %v2258_v58  ;;  %v2292_v11 = vmul.f32 %v2259_v8, %v2259_v8  ;;  %v2263_v36 = vsub.f32 %v3743_v49, %v3788_v34 }
 0x393   : > { %v2293_v24 = vmul.f32 %v2260_v46, %v2260_v46  ;;  %v2294_v40 = vmul.f32 %v2261_v2, %v2261_v2  ;;  %v2264_v57 = vsub.f32 %v3740_v16, %v3788_v34  ;;  %v2295_v13 = vmul.f32 %v2262_v63, %v2262_v63 }
 0x394   : > { %v2316_v29 = vadd.f32 %v2315_v7, %v2285_v55  ;;  %v2265_v39 = vsub.f32 %v3749_v9, %v3788_v34  ;;  %v2296_v17 = vmul.f32 %v2263_v36, %v2263_v36  ;;  %v2266_v60 = vsub.f32 %v3746_v3, %v3788_v34 }
 0x395   : > { %v2297_v54 = vmul.f32 %v2264_v57, %v2264_v57  ;;  %v2267_v49 = vsub.f32 %v3755_v19, %v3788_v34  ;;  %v2268_v16 = vsub.f32 %v3752_v62, %v3788_v34  ;;  %v2269_v9 = vsub.f32 %v3761_v53, %v3788_v34 }
 0x396   : > { %v2317_v28 = vadd.f32 %v2316_v29, %v2286_v42  ;;  %v2298_v51 = vmul.f32 %v2265_v39, %v2265_v39  ;;  %v2299_v18 = vmul.f32 %v2266_v60, %v2266_v60  ;;  %v2270_v3 = vsub.f32 %v3758_v6, %v3788_v34 }
 0x397   : > { %v2300_v30 = vmul.f32 %v2267_v49, %v2267_v49  ;;  %v2301_v5 = vmul.f32 %v2268_v16, %v2268_v16  ;;  %v2271_v19 = vsub.f32 %v3767_v21, %v3788_v34  ;;  %v2302_v7 = vmul.f32 %v2269_v9, %v2269_v9 }
 0x398   : > { %v2318_v56 = vadd.f32 %v2317_v28, %v2287_v27  ;;  %v2272_v62 = vsub.f32 %v3764_v20, %v3788_v34  ;;  %v2303_v42 = vmul.f32 %v2270_v3, %v2270_v3  ;;  %v2273_v53 = vsub.f32 %v3773_v12, %v3788_v34 }
 0x399   : > { %v2304_v43 = vmul.f32 %v2271_v19, %v2271_v19  ;;  %v2274_v6 = vsub.f32 %v3770_v38, %v3788_v34  ;;  %v2275_v21 = vsub.f32 %v3779_v25, %v3788_v34  ;;  %v2276_v20 = vsub.f32 %v3776_v52, %v3788_v34 }
 0x39a   : > { %v2319_v22 = vadd.f32 %v2318_v56, %v2288_v32  ;;  %v2305_v28 = vmul.f32 %v2272_v62, %v2272_v62  ;;  %v2306_v32 = vmul.f32 %v2273_v53, %v2273_v53  ;;  %v2310_v38 = vmul.f32 %v3792_v14, %v3792_v14 }
 0x39b   : > { %v2307_v58 = vmul.f32 %v2274_v6, %v2274_v6  ;;  %v2309_v12 = vmul.f32 %v2276_v20, %v2276_v20  ;;  %v2311_v46 = vmul.f32 %v3795_v35, %v3795_v35  ;;  %v2313_v52 = vmul.f32 %v3801_v37, %v3801_v37 }
 0x39c   : > { %v2320_v4 = vadd.f32 %v2319_v22, %v2289_v61  ;;  %v2308_v22 = vmul.f32 %v2275_v21, %v2275_v21 }
 0x39e   : > { %v2321_v10 = vadd.f32 %v2320_v4, %v2290_v0 }
 0x3a0   : > { %v2322_v41 = vadd.f32 %v2321_v10, %v2291_v23  ;;  %v2312_v23 = vmul.f32 %v3798_v45, %v3798_v45 }
 0x3a2   : > { %v2323_v15 = vadd.f32 %v2322_v41, %v2292_v11 }
 0x3a4   : > { %v2324_v33 = vadd.f32 %v2323_v15, %v2293_v24 }
 0x3a6   : > { %v2325_v47 = vadd.f32 %v2324_v33, %v2294_v40 }
 0x3a8   : > { %v2326_v31 = vadd.f32 %v2325_v47, %v2295_v13 }
 0x3aa   : > { %v2327_v50 = vadd.f32 %v2326_v31, %v2296_v17 }
 0x3ac   : > { %v2328_v59 = vadd.f32 %v2327_v50, %v2297_v54 }
 0x3ae   : > { %v2329_v1 = vadd.f32 %v2328_v59, %v2298_v51 }
 0x3b0   : > { %v2330_v48 = vadd.f32 %v2329_v1, %v2299_v18 }
 0x3b2   : > { %v2331_v55 = vadd.f32 %v2330_v48, %v2300_v30 }
 0x3b4   : > { %v2332_v44 = vadd.f32 %v2331_v55, %v2301_v5 }
 0x3b6   : > { %v2333_v29 = vadd.f32 %v2332_v44, %v2302_v7 }
 0x3b8   : > { %v2334_v27 = vadd.f32 %v2333_v29, %v2303_v42 }
 0x3ba   : > { %v2335_v26 = vadd.f32 %v2334_v27, %v2304_v43 }
 0x3bc   : > { %v2336_v56 = vadd.f32 %v2335_v26, %v2305_v28 }
 0x3be   : > { %v2337_v61 = vadd.f32 %v2336_v56, %v2306_v32 }
 0x3c0   : > { %v2338_v8 = vadd.f32 %v2337_v61, %v2307_v58 }
 0x3c2   : > { %v2339_v0 = vadd.f32 %v2338_v8, %v2308_v22 }
 0x3c4   : > { %v2340_v4 = vadd.f32 %v2339_v0, %v2309_v12 }
 0x3c6   : > { %v2341_v25 = vadd.f32 %v2340_v4, %v2310_v38 }
 0x3c8   : > { %v2342_v10 = vadd.f32 %v2341_v25, %v2311_v46 }
 0x3ca   : > { %v2343_v34 = vadd.f32 %v2342_v10, %v2312_v23 }
 0x3cc   : > { %v2344_v2 = vadd.f32 %v2343_v34, %v2313_v52 }
 0x3ce   : > { %v2345_v11 = vrot.slane %v2344_v2, 4 }
 0x3d0   : > { %v2346_v41 = vadd.f32 %v2345_v11, %v2344_v2 }
 0x3d2   : > { %v2347_v63 = vrot.slane %v2346_v41, 2 }
 0x3d4   : > { %v2348_v24 = vadd.f32 %v2347_v63, %v2346_v41 }
 0x3d6   : > { %v2349_v15 = vrot.slane %v2348_v24, 1 }
 0x3d8   : > { %v2350_v14 = vadd.f32 %v2349_v15, %v2348_v24 }
 0x3da   : > { %2351 = vst [vmem:[%s175_s14] sm:$0x1] %v2350_v14 }
 0x3db PF: > { %s14_s12 = sadd.s32 1, %s2617_s12  }
 0x3dc   : > { %p11_p4 = scmp.ge.s32.totalorder %s14_s12, 4  }
 0x3de   :  { %13 = sbr.rel (!%p11_p4) target bundleno = 1 (0x1), region = 72 }

// kernel: conv_norm_act.3
= control target key start
LH: loop header
LB: loop body
LE: loop exit
PB: predicated region body
PF: predicated region fallthrough
CT: control target
= control target key end

     0   :  { %s2698_s15 = smov 0   ;;  %s3909_s0 = inlined_call_operand.vmem [shape: f32[2,16,16,4], index: 0, kind: input, shape index: {}]   ;;  %s3910_s1 = inlined_call_operand.vmem [shape: f32[128,128], index: 1, kind: input, shape index: {}]   ;;  %s3911_s2 = inlined_call_operand.vmem [shape: f32[1,128], index: 2, kind: input, shape index: {}]   ;;  %s3912_s3 = inlined_call_operand.vmem [shape: f32[1,128], index: 3, kind: input, shape index: {}]   ;;  %s3913_s4 = inlined_call_operand.vmem [shape: f32[2,8,256], index: 4, kind: output, shape index: {}]  }
   0x1 LB: > { %s2464_s16 = sadd.s32 4294967295, %s2662_s15   ;;  %p2468_p0 = scmp.ge.s32.totalorder %s2662_s15, 1  ;;  %s2662_s15 = sphi %s2698_s15, %s14_s15  }
   0x2   : > { %p162_p1 = scmp.lt.s32.totalorder %s2662_s15, 3 }
   0x4   : > { %p163_p2 = pnand %p2468_p0, %p162_p1 }
   0x6   : > { %166 = sbr.rel (%p163_p2) target bundleno = 965 (0x3c5), region = 36 }
   0xb   : > { %vm198_vm0 = vcmask 31744   ;;  %vm201_vm1 = vcmask 25600   ;;  %p2708_p3 = scmp.lt.s32.totalorder %s2464_s16, 1  ;;  %v2664_v0 = vmov 0.0   ;;  %s2665_s22 = smov 4   ;;  %vm575_vm2 = vcmask 64544  }
   0xc   : > { %199 = vst.msk [vmem:[#allocation2] sm:$0xff] %vm198_vm0, %v2664_v0  ;;  %200 = vst.msk [vmem:[#allocation2 + $0x8] sm:$0xff] %vm198_vm0, %v2664_v0  ;;  %s2666_s23 = smov 8   ;;  %s2667_s24 = smov 12   ;;  %vm768_vm3 = vcmask 97344   ;;  %vm961_vm4 = vcmask 130144  }
   0xd   : > { %203 = vst.msk [vmem:[#allocation2 + $0x18] sm:$0xff] %vm198_vm0, %v2664_v0  ;;  %204 = vst.msk [vmem:[#allocation2 + $0x20] sm:$0xff] %vm198_vm0, %v2664_v0  ;;  %s3969_s16 = smov (!%p2708_p3, %s2464_s16), 1  ;;  %s2668_s25 = smov 16   ;;  %vm1154_vm5 = vcmask 162944   ;;  %vm1347_vm6 = vcmask 195744  }
   0xe   : > { %206 = vst.msk [vmem:[#allocation2 + $0x30] sm:$0xff] %vm198_vm0, %v2664_v0  ;;  %207 = vst.msk [vmem:[#allocation2 + $0x38] sm:$0xff] %vm198_vm0, %v2664_v0  ;;  %s2477_s18 = sshll.u32 %s3969_s16, 8  ;;  %s2669_s6 = smov 20   ;;  %vm1541_vm7 = vcmask 228544   ;;  %vm1734_vm8 = vcmask 261344  }
   0xf   : > { %209 = vst.msk [vmem:[#allocation2 + $0x48] sm:$0xff] %vm198_vm0, %v2664_v0  ;;  %210 = vst.msk [vmem:[#allocation2 + $0x50] sm:$0xff] %vm198_vm0, %v2664_v0  ;;  %s2862_s21 = scalar_lea.vmem %s3909_s0, %s2477_s18  ;;  %s2670_s17 = smov 24   ;;  %vm1927_vm9 = vcmask 294144  }
  0x10   : > { %212 = vst.msk [vmem:[#allocation2 + $0x60] sm:$0xff] %vm198_vm0, %v2664_v0  ;;  %213 = vst.msk [vmem:[#allocation2 + $0x68] sm:$0xff] %vm198_vm0, %v2664_v0  ;;  %v286_v1 = vld [vmem:[%s2862_s21] sm:$0xff]  ;;  %v288_v2 = vld [vmem:[%s2862_s21 + $0x10] sm:$0xff]  ;;  %s2671_s26 = smov 28   ;;  %s2672_s8 = smov 32  }
  0x11   : > { %215 = vst.msk [vmem:[#allocation2 + $0x78] sm:$0xff] %vm198_vm0, %v2664_v0  ;;  %216 = vst.msk [vmem:[#allocation2 + $0x80] sm:$0xff] %vm198_vm0, %v2664_v0  ;;  %v287_v3 = vld [vmem:[%s2862_s21 + $0x8] sm:$0xff]  ;;  %v290_v4 = vld [vmem:[%s2862_s21 + $0x20] sm:$0xff]  ;;  %s2478_s18 = sshll.u32 %s3969_s16, 4 }
  0x12   : > { %218 = vst.msk [vmem:[#allocation2 + $0x90] sm:$0xff] %vm198_vm0, %v2664_v0  ;;  %219 = vst.msk [vmem:[#allocation2 + $0x98] sm:$0xff] %vm198_vm0, %v2664_v0  ;;  %v289_v5 = vld [vmem:[%s2862_s21 + $0x18] sm:$0xff]  ;;  %v292_v6 = vld [vmem:[%s2862_s21 + $0x30] sm:$0xff] }
  0x13   : > { %221 = vst.msk [vmem:[#allocation2 + $0xa8] sm:$0xff] %vm198_vm0, %v2664_v0  ;;  %222 = vst.msk [vmem:[#allocation2 + $0xb0] sm:$0xff] %vm198_vm0, %v2664_v0  ;;  %v415_v7 = vld [vmem:[#allocation2 + $0x1] sm:$0xff]  ;;  %v293_v11 = vld [vmem:[%s2862_s21 + $0x38] sm:$0xff] }
  0x14   : > { %224 = vst.msk [vmem:[#allocation2 + $0xc0] sm:$0xff] %vm198_vm0, %v2664_v0  ;;  %225 = vst.msk [vmem:[#allocation2 + $0xc8] sm:$0xff] %vm198_vm0, %v2664_v0  ;;  %v291_v9 = vld [vmem:[%s2862_s21 + $0x28] sm:$0xff]  ;;  %479 = vrot.lane.b32.xlu0 %v415_v7, %s2665_s22  ;;  %v294_v10 = vld [vmem:[%s2862_s21 + $0x40] sm:$0xff] }
  0x15   : > { %227 = vst.msk [vmem:[#allocation2 + $0xd8] sm:$0xff] %vm198_vm0, %v2664_v0  ;;  %228 = vst.msk [vmem:[#allocation2 + $0xe0] sm:$0xff] %vm198_vm0, %v2664_v0  ;;  %v296_v12 = vld [vmem:[%s2862_s21 + $0x50] sm:$0xff]  ;;  %v295_v13 = vld [vmem:[%s2862_s21 + $0x48] sm:$0xff] }
  0x16   : > { %230 = vst.msk [vmem:[#allocation2 + $0xf0] sm:$0xff] %vm198_vm0, %v2664_v0  ;;  %231 = vst.msk [vmem:[#allocation2 + $0xf8] sm:$0xff] %vm198_vm0, %v2664_v0  ;;  %v298_v14 = vld [vmem:[%s2862_s21 + $0x60] sm:$0xff]  ;;  %v297_v15 = vld [vmem:[%s2862_s21 + $0x58] sm:$0xff] }
  0x17   : > { %233 = vst.msk [vmem:[#allocation2 + $0x108] sm:$0xff] %vm198_vm0, %v2664_v0  ;;  %234 = vst.msk [vmem:[#allocation2 + $0x110] sm:$0xff] %vm198_vm0, %v2664_v0  ;;  %v300_v16 = vld [vmem:[%s2862_s21 + $0x70] sm:$0xff]  ;;  %v299_v17 = vld [vmem:[%s2862_s21 + $0x68] sm:$0xff] }
  0x18   : > { %236 = vst.msk [vmem:[#allocation2 + $0x120] sm:$0xff] %vm198_vm0, %v2664_v0  ;;  %237 = vst.msk [vmem:[#allocation2 + $0x128] sm:$0xff] %vm198_vm0, %v2664_v0  ;;  %v302_v18 = vld [vmem:[%s2862_s21 + $0x80] sm:$0xff]  ;;  %v301_v19 = vld [vmem:[%s2862_s21 + $0x78] sm:$0xff] }
  0x19   : > { %239 = vst.msk [vmem:[#allocation2 + $0x138] sm:$0xff] %vm198_vm0, %v2664_v0  ;;  %240 = vst.msk [vmem:[#allocation2 + $0x140] sm:$0xff] %vm198_vm0, %v2664_v0  ;;  %v304_v20 = vld [vmem:[%s2862_s21 + $0x90] sm:$0xff]  ;;  %v303_v21 = vld [vmem:[%s2862_s21 + $0x88] sm:$0xff] }
  0x1a   : > { %242 = vst.msk [vmem:[#allocation2 + $0x150] sm:$0xff] %vm198_vm0, %v2664_v0  ;;  %243 = vst.msk [vmem:[#allocation2 + $0x158] sm:$0xff] %vm198_vm0, %v2664_v0  ;;  %v306_v22 = vld [vmem:[%s2862_s21 + $0xa0] sm:$0xff]  ;;  %v305_v23 = vld [vmem:[%s2862_s21 + $0x98] sm:$0xff] }
  0x1b   : > { %245 = vst.msk [vmem:[#allocation2 + $0x168] sm:$0xff] %vm198_vm0, %v2664_v0  ;;  %246 = vst.msk [vmem:[#allocation2 + $0x170] sm:$0xff] %vm198_vm0, %v2664_v0  ;;  %v308_v24 = vld [vmem:[%s2862_s21 + $0xb0] sm:$0xff]  ;;  %v307_v28 = vld [vmem:[%s2862_s21 + $0xa8] sm:$0xff] }
  0x1c   : > { %248 = vst.msk [vmem:[#allocation2 + $0x180] sm:$0xff] %vm198_vm0, %v2664_v0  ;;  %249 = vst.msk [vmem:[#allocation2 + $0x188] sm:$0xff] %vm198_vm0, %v2664_v0  ;;  %v310_v29 = vld [vmem:[%s2862_s21 + $0xc0] sm:$0xff]  ;;  %v309_v33 = vld [vmem:[%s2862_s21 + $0xb8] sm:$0xff] }
  0x1d   : > { %251 = vst.msk [vmem:[#allocation2 + $0x198] sm:$0xff] %vm198_vm0, %v2664_v0  ;;  %252 = vst.msk [vmem:[#allocation2 + $0x1a0] sm:$0xff] %vm198_vm0, %v2664_v0  ;;  %v312_v34 = vld [vmem:[%s2862_s21 + $0xd0] sm:$0xff]  ;;  %v311_v35 = vld [vmem:[%s2862_s21 + $0xc8] sm:$0xff] }
  0x1e   : > { %254 = vst [vmem:[#allocation3] sm:$0xff] %v2664_v0  ;;  %255 = vst [vmem:[#allocation3 + $0x8] sm:$0xff] %v2664_v0  ;;  %v314_v36 = vld [vmem:[%s2862_s21 + $0xe0] sm:$0xff]  ;;  %v313_v37 = vld [vmem:[%s2862_s21 + $0xd8] sm:$0xff] }
  0x1f   : > { %256 = vst [vmem:[#allocation3 + $0x10] sm:$0xff] %v2664_v0  ;;  %257 = vst [vmem:[#allocation3 + $0x18] sm:$0xff] %v2664_v0  ;;  %v315_v39 = vld [vmem:[%s2862_s21 + $0xe8] sm:$0xff]  ;;  %v351_v45 = vld [vmem:[#allocation2] sm:$0xff] }
  0x20   : > { %258 = vst [vmem:[#allocation3 + $0x20] sm:$0xff] %v2664_v0  ;;  %259 = vst [vmem:[#allocation3 + $0x28] sm:$0xff] %v2664_v0  ;;  %v352_v46 = vld [vmem:[#allocation2 + $0x8] sm:$0xff] }
  0x21   : > { %260 = vst [vmem:[#allocation3 + $0x30] sm:$0xff] %v2664_v0  ;;  %261 = vst [vmem:[#allocation3 + $0x38] sm:$0xff] %v2664_v0 }
  0x22   : > { %262 = vst [vmem:[#allocation3 + $0x40] sm:$0xff] %v2664_v0  ;;  %263 = vst [vmem:[#allocation3 + $0x48] sm:$0xff] %v2664_v0 }
  0x23   : > { %264 = vst [vmem:[#allocation3 + $0x50] sm:$0xff] %v2664_v0  ;;  %265 = vst [vmem:[#allocation3 + $0x58] sm:$0xff] %v2664_v0 }
  0x24   : > { %266 = vst [vmem:[#allocation3 + $0x60] sm:$0xff] %v2664_v0  ;;  %267 = vst [vmem:[#allocation3 + $0x68] sm:$0xff] %v2664_v0 }
  0x25   : > { %268 = vst [vmem:[#allocation3 + $0x70] sm:$0xff] %v2664_v0  ;;  %269 = vst [vmem:[#allocation3 + $0x78] sm:$0xff] %v2664_v0 }
  0x26   : > { %270 = vst [vmem:[#allocation3 + $0x80] sm:$0xff] %v2664_v0  ;;  %271 = vst [vmem:[#allocation3 + $0x88] sm:$0xff] %v2664_v0 }
  0x27   : > { %272 = vst [vmem:[#allocation3 + $0x90] sm:$0xff] %v2664_v0  ;;  %273 = vst [vmem:[#allocation3 + $0x98] sm:$0xff] %v2664_v0 }
  0x28   : > { %274 = vst [vmem:[#allocation3 + $0xa0] sm:$0xff] %v2664_v0  ;;  %275 = vst [vmem:[#allocation3 + $0xa8] sm:$0xff] %v2664_v0 }
  0x29   : > { %276 = vst [vmem:[#allocation3 + $0xb0] sm:$0xff] %v2664_v0  ;;  %277 = vst [vmem:[#allocation3 + $0xb8] sm:$0xff] %v2664_v0 }
  0x2a   : > { %278 = vst [vmem:[#allocation3 + $0xc0] sm:$0xff] %v2664_v0  ;;  %279 = vst [vmem:[#allocation3 + $0xc8] sm:$0xff] %v2664_v0 }
  0x2b   : > { %280 = vst [vmem:[#allocation3 + $0xd0] sm:$0xff] %v2664_v0  ;;  %281 = vst [vmem:[#allocation3 + $0xd8] sm:$0xff] %v2664_v0 }
  0x2c   : > { %282 = vst [vmem:[#allocation3 + $0xe0] sm:$0xff] %v2664_v0  ;;  %283 = vst [vmem:[#allocation3 + $0xe8] sm:$0xff] %v2664_v0 }
  0x2d   : > { %284 = vst [vmem:[#allocation3 + $0xf0] sm:$0xff] %v2664_v0  ;;  %285 = vst [vmem:[#allocation3 + $0xf8] sm:$0xff] %v2664_v0 }
  0x2e   : > { %202 = vst.msk [vmem:[#allocation2 + $0x10] sm:$0x3] %vm201_vm1, %v2664_v0  ;;  %205 = vst.msk [vmem:[#allocation2 + $0x28] sm:$0x3] %vm201_vm1, %v2664_v0 }
  0x2f   : > { %208 = vst.msk [vmem:[#allocation2 + $0x40] sm:$0x3] %vm201_vm1, %v2664_v0  ;;  %211 = vst.msk [vmem:[#allocation2 + $0x58] sm:$0x3] %vm201_vm1, %v2664_v0 }
  0x30   : > { %214 = vst.msk [vmem:[#allocation2 + $0x70] sm:$0x3] %vm201_vm1, %v2664_v0  ;;  %217 = vst.msk [vmem:[#allocation2 + $0x88] sm:$0x3] %vm201_vm1, %v2664_v0 }
  0x31   : > { %220 = vst.msk [vmem:[#allocation2 + $0xa0] sm:$0x3] %vm201_vm1, %v2664_v0  ;;  %223 = vst.msk [vmem:[#allocation2 + $0xb8] sm:$0x3] %vm201_vm1, %v2664_v0 }
  0x32   : > { %226 = vst.msk [vmem:[#allocation2 + $0xd0] sm:$0x3] %vm201_vm1, %v2664_v0  ;;  %229 = vst.msk [vmem:[#allocation2 + $0xe8] sm:$0x3] %vm201_vm1, %v2664_v0 }
  0x33   : > { %232 = vst.msk [vmem:[#allocation2 + $0x100] sm:$0x3] %vm201_vm1, %v2664_v0  ;;  %235 = vst.msk [vmem:[#allocation2 + $0x118] sm:$0x3] %vm201_vm1, %v2664_v0 }
  0x34   : > { %238 = vst.msk [vmem:[#allocation2 + $0x130] sm:$0x3] %vm201_vm1, %v2664_v0  ;;  %241 = vst.msk [vmem:[#allocation2 + $0x148] sm:$0x3] %vm201_vm1, %v2664_v0 }
  0x35   : > { %244 = vst.msk [vmem:[#allocation2 + $0x160] sm:$0x3] %vm201_vm1, %v2664_v0  ;;  %247 = vst.msk [vmem:[#allocation2 + $0x178] sm:$0x3] %vm201_vm1, %v2664_v0  ;;  %v416_v8 = vld [vmem:[#allocation2 + $0x9] sm:$0xff] }
  0x36   : > { %250 = vst.msk [vmem:[#allocation2 + $0x190] sm:$0x3] %vm201_vm1, %v2664_v0  ;;  %253 = vst.msk [vmem:[#allocation2 + $0x1a8] sm:$0x3] %vm201_vm1, %v2664_v0  ;;  %481 = vrot.lane.b32.xlu0 %v416_v8, %s2665_s22 }
  0x37   : > { %319 = vst.msk [vmem:[#allocation2 + $0x19] sm:$0xff] %vm198_vm0, %v286_v1  ;;  %321 = vst.msk [vmem:[#allocation2 + $0x31] sm:$0xff] %vm198_vm0, %v288_v2 }
  0x38   : > { %320 = vst.msk [vmem:[#allocation2 + $0x21] sm:$0xff] %vm198_vm0, %v287_v3  ;;  %323 = vst.msk [vmem:[#allocation2 + $0x49] sm:$0xff] %vm198_vm0, %v290_v4 }
  0x39   : > { %322 = vst.msk [vmem:[#allocation2 + $0x39] sm:$0xff] %vm198_vm0, %v289_v5  ;;  %325 = vst.msk [vmem:[#allocation2 + $0x61] sm:$0xff] %vm198_vm0, %v292_v6 }
  0x3a   : > { %324 = vst.msk [vmem:[#allocation2 + $0x51] sm:$0xff] %vm198_vm0, %v291_v9  ;;  %327 = vst.msk [vmem:[#allocation2 + $0x79] sm:$0xff] %vm198_vm0, %v294_v10 }
  0x3b   : > { %326 = vst.msk [vmem:[#allocation2 + $0x69] sm:$0xff] %vm198_vm0, %v293_v11  ;;  %329 = vst.msk [vmem:[#allocation2 + $0x91] sm:$0xff] %vm198_vm0, %v296_v12 }
  0x3c   : > { %328 = vst.msk [vmem:[#allocation2 + $0x81] sm:$0xff] %vm198_vm0, %v295_v13  ;;  %331 = vst.msk [vmem:[#allocation2 + $0xa9] sm:$0xff] %vm198_vm0, %v298_v14 }
  0x3d   : > { %330 = vst.msk [vmem:[#allocation2 + $0x99] sm:$0xff] %vm198_vm0, %v297_v15  ;;  %333 = vst.msk [vmem:[#allocation2 + $0xc1] sm:$0xff] %vm198_vm0, %v300_v16 }
  0x3e   : > { %332 = vst.msk [vmem:[#allocation2 + $0xb1] sm:$0xff] %vm198_vm0, %v299_v17  ;;  %335 = vst.msk [vmem:[#allocation2 + $0xd9] sm:$0xff] %vm198_vm0, %v302_v18  ;;  %v2907_v25 = vld [vmem:[#allocation2 + $0x19] sm:$0xff]  ;;  %v2909_v26 = vld [vmem:[#allocation2 + $0x31] sm:$0xff] }
  0x3f   : > { %334 = vst.msk [vmem:[#allocation2 + $0xc9] sm:$0xff] %vm198_vm0, %v301_v19  ;;  %337 = vst.msk [vmem:[#allocation2 + $0xf1] sm:$0xff] %vm198_vm0, %v304_v20  ;;  %483 = vrot.lane.b32.xlu1 %v2907_v25, %s2665_s22  ;;  %v2916_v27 = vld [vmem:[#allocation2 + $0x21] sm:$0xff]  ;;  %487 = vrot.lane.b32.xlu0 %v2909_v26, %s2665_s22  ;;  %v2924_v30 = vld [vmem:[#allocation2 + $0x49] sm:$0xff] }
  0x40   : > { %336 = vst.msk [vmem:[#allocation2 + $0xe1] sm:$0xff] %vm198_vm0, %v303_v21  ;;  %339 = vst.msk [vmem:[#allocation2 + $0x109] sm:$0xff] %vm198_vm0, %v306_v22  ;;  %v2928_v31 = vld [vmem:[#allocation2 + $0x39] sm:$0xff]  ;;  %v2932_v32 = vld [vmem:[#allocation2 + $0x61] sm:$0xff] }
  0x41   : > { %338 = vst.msk [vmem:[#allocation2 + $0xf9] sm:$0xff] %vm198_vm0, %v305_v23  ;;  %341 = vst.msk [vmem:[#allocation2 + $0x121] sm:$0xff] %vm198_vm0, %v308_v24  ;;  %v2944_v38 = vld [vmem:[#allocation2 + $0x51] sm:$0xff]  ;;  %v2952_v40 = vld [vmem:[#allocation2 + $0x79] sm:$0xff] }
  0x42   : > { %340 = vst.msk [vmem:[#allocation2 + $0x111] sm:$0xff] %vm198_vm0, %v307_v28  ;;  %343 = vst.msk [vmem:[#allocation2 + $0x139] sm:$0xff] %vm198_vm0, %v310_v29  ;;  %v2956_v41 = vld [vmem:[#allocation2 + $0x69] sm:$0xff]  ;;  %v2960_v42 = vld [vmem:[#allocation2 + $0x91] sm:$0xff] }
  0x43   : > { %485 = vrot.lane.b32.xlu1 %v2916_v27, %s2665_s22  ;;  %491 = vrot.lane.b32.xlu0 %v2924_v30, %s2665_s22  ;;  %342 = vst.msk [vmem:[#allocation2 + $0x129] sm:$0xff] %vm198_vm0, %v309_v33  ;;  %345 = vst.msk [vmem:[#allocation2 + $0x151] sm:$0xff] %vm198_vm0, %v312_v34  ;;  %v2964_v43 = vld [vmem:[#allocation2 + $0x81] sm:$0xff]  ;;  %v2968_v44 = vld [vmem:[#allocation2 + $0xa9] sm:$0xff] }
  0x44   : > { %344 = vst.msk [vmem:[#allocation2 + $0x141] sm:$0xff] %vm198_vm0, %v311_v35  ;;  %347 = vst.msk [vmem:[#allocation2 + $0x169] sm:$0xff] %vm198_vm0, %v314_v36  ;;  %v2973_v47 = vld [vmem:[#allocation2 + $0x99] sm:$0xff]  ;;  %v2982_v49 = vld [vmem:[#allocation2 + $0x30] sm:$0xff] }
  0x45   : > { %346 = vst.msk [vmem:[#allocation2 + $0x159] sm:$0xff] %vm198_vm0, %v313_v37  ;;  %348 = vst.msk [vmem:[#allocation2 + $0x171] sm:$0xff] %vm198_vm0, %v315_v39  ;;  %v2976_v48 = vld [vmem:[#allocation2 + $0x18] sm:$0xff]  ;;  %v2984_v50 = vld [vmem:[#allocation2 + $0xc1] sm:$0xff] }
  0x46   : > { %383 = vst.msk [vmem:[#allocation3] sm:$0xff] %vm198_vm0, %v351_v45  ;;  %384 = vst.msk [vmem:[#allocation3 + $0x8] sm:$0xff] %vm198_vm0, %v352_v46  ;;  %v2988_v51 = vld [vmem:[#allocation2 + $0x20] sm:$0xff]  ;;  %v2990_v52 = vld [vmem:[#allocation2 + $0x48] sm:$0xff] }
  0x47   : > { %489 = vrot.lane.b32.xlu1 %v2928_v31, %s2665_s22  ;;  %495 = vrot.lane.b32.xlu0 %v2932_v32, %s2665_s22  ;;  %385 = vst.msk [vmem:[#allocation3 + $0x10] sm:$0xff] %vm198_vm0, %v2976_v48  ;;  %387 = vst.msk [vmem:[#allocation3 + $0x20] sm:$0xff] %vm198_vm0, %v2982_v49  ;;  %v2994_v53 = vld [vmem:[#allocation2 + $0xb1] sm:$0xff]  ;;  %v3002_v55 = vld [vmem:[#allocation2 + $0x60] sm:$0xff] }
  0x48   : > { %386 = vst.msk [vmem:[#allocation3 + $0x18] sm:$0xff] %vm198_vm0, %v2988_v51  ;;  %389 = vst.msk [vmem:[#allocation3 + $0x30] sm:$0xff] %vm198_vm0, %v2990_v52  ;;  %v3000_v54 = vld [vmem:[#allocation2 + $0x38] sm:$0xff]  ;;  %v3010_v57 = vld [vmem:[#allocation2 + $0x50] sm:$0xff] }
  0x49   : > { %v3004_v56 = vld [vmem:[#allocation2 + $0xd9] sm:$0xff]  ;;  %388 = vst.msk [vmem:[#allocation3 + $0x28] sm:$0xff] %vm198_vm0, %v3000_v54  ;;  %391 = vst.msk [vmem:[#allocation3 + $0x40] sm:$0xff] %vm198_vm0, %v3002_v55  ;;  %v3014_v59 = vld [vmem:[#allocation2 + $0x68] sm:$0xff] }
  0x4a   : > { %v3012_v58 = vld [vmem:[#allocation2 + $0x78] sm:$0xff]  ;;  %390 = vst.msk [vmem:[#allocation3 + $0x38] sm:$0xff] %vm198_vm0, %v3010_v57  ;;  %392 = vst.msk [vmem:[#allocation3 + $0x48] sm:$0xff] %vm198_vm0, %v3014_v59  ;;  %v3024_v60 = vld [vmem:[#allocation2 + $0x90] sm:$0xff] }
  0x4b   : > { %493 = vrot.lane.b32.xlu1 %v2944_v38, %s2665_s22  ;;  %499 = vrot.lane.b32.xlu0 %v2952_v40, %s2665_s22  ;;  %393 = vst.msk [vmem:[#allocation3 + $0x50] sm:$0xff] %vm198_vm0, %v3012_v58  ;;  %v3026_v61 = vld [vmem:[#allocation2 + $0x80] sm:$0xff]  ;;  %v3028_v62 = vld [vmem:[#allocation2 + $0xa8] sm:$0xff]  ;;  %395 = vst.msk [vmem:[#allocation3 + $0x60] sm:$0xff] %vm198_vm0, %v3024_v60 }
  0x4c   : > { %v3030_v63 = vld [vmem:[#allocation2 + $0xc9] sm:$0xff]  ;;  %394 = vst.msk [vmem:[#allocation3 + $0x58] sm:$0xff] %vm198_vm0, %v3026_v61  ;;  %397 = vst.msk [vmem:[#allocation3 + $0x70] sm:$0xff] %vm198_vm0, %v3028_v62  ;;  %v3038_v0 = vld [vmem:[#allocation2 + $0x98] sm:$0xff] }
  0x4d   : > { %v3040_v1 = vld [vmem:[#allocation2 + $0xc0] sm:$0xff]  ;;  %v3042_v2 = vld [vmem:[#allocation2 + $0xb0] sm:$0xff]  ;;  %396 = vst.msk [vmem:[#allocation3 + $0x68] sm:$0xff] %vm198_vm0, %v3038_v0  ;;  %v3052_v3 = vld [vmem:[#allocation2 + $0xd8] sm:$0xff] }
  0x4e   : > { %399 = vst.msk [vmem:[#allocation3 + $0x80] sm:$0xff] %vm198_vm0, %v3040_v1  ;;  %398 = vst.msk [vmem:[#allocation3 + $0x78] sm:$0xff] %vm198_vm0, %v3042_v2  ;;  %v3054_v4 = vld [vmem:[#allocation2 + $0xc8] sm:$0xff]  ;;  %v3056_v5 = vld [vmem:[#allocation2 + $0xf0] sm:$0xff] }
  0x4f   : > { %497 = vrot.lane.b32.xlu1 %v2956_v41, %s2665_s22  ;;  %503 = vrot.lane.b32.xlu0 %v2960_v42, %s2665_s22  ;;  %401 = vst.msk [vmem:[#allocation3 + $0x90] sm:$0xff] %vm198_vm0, %v3052_v3  ;;  %400 = vst.msk [vmem:[#allocation3 + $0x88] sm:$0xff] %vm198_vm0, %v3054_v4  ;;  %v3064_v6 = vld [vmem:[#allocation2 + $0xe0] sm:$0xff]  ;;  %v3066_v7 = vld [vmem:[#allocation2 + $0x108] sm:$0xff] }
  0x50   : > { %403 = vst.msk [vmem:[#allocation3 + $0xa0] sm:$0xff] %vm198_vm0, %v3056_v5  ;;  %v3068_v8 = vld [vmem:[#allocation2 + $0xf8] sm:$0xff]  ;;  %402 = vst.msk [vmem:[#allocation3 + $0x98] sm:$0xff] %vm198_vm0, %v3064_v6  ;;  %v3078_v9 = vld [vmem:[#allocation2 + $0x120] sm:$0xff] }
  0x51   : > { %405 = vst.msk [vmem:[#allocation3 + $0xb0] sm:$0xff] %vm198_vm0, %v3066_v7  ;;  %404 = vst.msk [vmem:[#allocation3 + $0xa8] sm:$0xff] %vm198_vm0, %v3068_v8  ;;  %v3080_v10 = vld [vmem:[#allocation2 + $0x110] sm:$0xff]  ;;  %v3088_v12 = vld [vmem:[#allocation2 + $0x138] sm:$0xff] }
  0x52   : > { %v3082_v11 = vld [vmem:[#allocation2 + $0xf1] sm:$0xff]  ;;  %407 = vst.msk [vmem:[#allocation3 + $0xc0] sm:$0xff] %vm198_vm0, %v3078_v9  ;;  %406 = vst.msk [vmem:[#allocation3 + $0xb8] sm:$0xff] %vm198_vm0, %v3080_v10  ;;  %v3094_v13 = vld [vmem:[#allocation2 + $0xe1] sm:$0xff] }
  0x53   : > { %501 = vrot.lane.b32.xlu1 %v2964_v43, %s2665_s22  ;;  %507 = vrot.lane.b32.xlu0 %v2968_v44, %s2665_s22  ;;  %409 = vst.msk [vmem:[#allocation3 + $0xd0] sm:$0xff] %vm198_vm0, %v3088_v12  ;;  %v3096_v14 = vld [vmem:[#allocation2 + $0x128] sm:$0xff]  ;;  %v3104_v16 = vld [vmem:[#allocation2 + $0x150] sm:$0xff]  ;;  %v3110_v17 = vld [vmem:[#allocation2 + $0xf9] sm:$0xff] }
  0x54   : > { %408 = vst.msk [vmem:[#allocation3 + $0xc8] sm:$0xff] %vm198_vm0, %v3096_v14  ;;  %v3102_v15 = vld [vmem:[#allocation2 + $0x109] sm:$0xff]  ;;  %411 = vst.msk [vmem:[#allocation3 + $0xe0] sm:$0xff] %vm198_vm0, %v3104_v16  ;;  %v3112_v18 = vld [vmem:[#allocation2 + $0x140] sm:$0xff] }
  0x55   : > { %410 = vst.msk [vmem:[#allocation3 + $0xd8] sm:$0xff] %vm198_vm0, %v3112_v18  ;;  %v3118_v19 = vld [vmem:[#allocation2 + $0x121] sm:$0xff]  ;;  %v3126_v21 = vld [vmem:[#allocation2 + $0x111] sm:$0xff]  ;;  %v3134_v23 = vld [vmem:[#allocation2 + $0x139] sm:$0xff] }
  0x56   : > { %v3120_v20 = vld [vmem:[#allocation2 + $0x168] sm:$0xff]  ;;  %v3128_v22 = vld [vmem:[#allocation2 + $0x158] sm:$0xff]  ;;  %v3140_v28 = vld [vmem:[#allocation2 + $0x170] sm:$0xff] }
  0x57   : > { %505 = vrot.lane.b32.xlu1 %v2973_v47, %s2665_s22  ;;  %511 = vrot.lane.b32.xlu0 %v2984_v50, %s2665_s22  ;;  %413 = vst.msk [vmem:[#allocation3 + $0xf0] sm:$0xff] %vm198_vm0, %v3120_v20  ;;  %412 = vst.msk [vmem:[#allocation3 + $0xe8] sm:$0xff] %vm198_vm0, %v3128_v22  ;;  %v3138_v24 = vld [vmem:[#allocation2 + $0x129] sm:$0xff]  ;;  %v3148_v33 = vld [vmem:[#allocation2 + $0x151] sm:$0xff] }
  0x58   : > { %3936 = vst [vmem:[#allocation4_spill] sm:$0xff] %v3138_v24  ;;  %v316_v29 = vld [vmem:[%s2862_s21 + $0xf0] sm:$0xff]  ;;  %414 = vst.msk [vmem:[#allocation3 + $0xf8] sm:$0xff] %vm198_vm0, %v3140_v28  ;;  %v3152_v34 = vld [vmem:[#allocation2 + $0x141] sm:$0xff] }
  0x59   : > { %349 = vst.msk [vmem:[#allocation2 + $0x181] sm:$0xff] %vm198_vm0, %v316_v29  ;;  %3937 = vst [vmem:[#allocation5_spill] sm:$0xff] %v3148_v33  ;;  %v3156_v35 = vld [vmem:[#allocation2 + $0x169] sm:$0xff]  ;;  %v317_v36 = vld [vmem:[%s2862_s21 + $0xf8] sm:$0xff]  ;;  %s197_s21 = scalar_lea.vmem %s3913_s4, %s2478_s18 }
  0x5a   : > { %3938 = vst [vmem:[#allocation6_spill] sm:$0xff] %v3152_v34  ;;  %3939 = vst [vmem:[#allocation7_spill] sm:$0xff] %v3156_v35  ;;  %v3162_v37 = vld [vmem:[#allocation2 + $0x159] sm:$0xff]  ;;  %v608_v39 = vld [vmem:[#allocation2 + $0x2] sm:$0xff] }
  0x5b   : > { %509 = vrot.lane.b32.xlu1 %v2994_v53, %s2665_s22  ;;  %515 = vrot.lane.b32.xlu0 %v3004_v56, %s2665_s22  ;;  %350 = vst.msk [vmem:[#allocation2 + $0x189] sm:$0xff] %vm198_vm0, %v317_v36  ;;  %3940 = vst [vmem:[#allocation8_spill] sm:$0xff] %v3162_v37  ;;  %v3168_v45 = vld [vmem:[#allocation2 + $0x171] sm:$0xff]  ;;  %v3171_v46 = vld [vmem:[#allocation2 + $0x1a] sm:$0xff] }
  0x5c   : > { %3941 = vst [vmem:[#allocation9_spill] sm:$0xff] %v3168_v45  ;;  %3942 = vst [vmem:[#allocation10_spill] sm:$0xff] %v3171_v46  ;;  %v609_v29 = vld [vmem:[#allocation2 + $0xa] sm:$0xff]  ;;  %v3177_v36 = vld [vmem:[#allocation2 + $0x32] sm:$0xff] }
  0x5d   : > { %3943 = vst [vmem:[#allocation11_spill] sm:$0xff] %v3177_v36 }
  0x5f   : > { %513 = vrot.lane.b32.xlu1 %v3030_v63, %s2665_s22  ;;  %519 = vrot.lane.b32.xlu0 %v3082_v11, %s2665_s22 }
  0x63   : > { %517 = vrot.lane.b32.xlu1 %v3094_v13, %s2665_s22  ;;  %523 = vrot.lane.b32.xlu0 %v3102_v15, %s2665_s22 }
  0x67   : > { %521 = vrot.lane.b32.xlu1 %v3110_v17, %s2665_s22  ;;  %527 = vrot.lane.b32.xlu0 %v3118_v19, %s2665_s22 }
  0x6b   : > { %525 = vrot.lane.b32.xlu1 %v3126_v21, %s2665_s22  ;;  %531 = vrot.lane.b32.xlu0 %v3134_v23, %s2665_s22 }
  0x6f   : > { %529 = vrot.lane.b32.xlu1 %v3138_v24, %s2665_s22  ;;  %535 = vrot.lane.b32.xlu0 %v3148_v33, %s2665_s22  ;;  %v621_v33 = vld [vmem:[#allocation2 + $0x9a] sm:$0xff] }
  0x73   : > { %533 = vrot.lane.b32.xlu1 %v3152_v34, %s2665_s22  ;;  %539 = vrot.lane.b32.xlu0 %v3156_v35, %s2665_s22  ;;  %v3180_v35 = vld [vmem:[#allocation2 + $0x22] sm:$0xff]  ;;  %v620_v34 = vld [vmem:[#allocation2 + $0x92] sm:$0xff] }
  0x74   : > { %3944 = vst [vmem:[#allocation12_spill] sm:$0xff] %v3180_v35 }
  0x77   : > { %537 = vrot.lane.b32.xlu1 %v3162_v37, %s2665_s22  ;;  %672 = vrot.lane.b32.xlu0 %v608_v39, %s2666_s23  ;;  %v3184_v37 = vld [vmem:[#allocation2 + $0x4a] sm:$0xff]  ;;  %v3188_v39 = vld [vmem:[#allocation2 + $0x3a] sm:$0xff] }
  0x78   : > { %3945 = vst [vmem:[#allocation13_spill] sm:$0xff] %v3184_v37  ;;  %3946 = vst [vmem:[#allocation14_spill] sm:$0xff] %v3188_v39 }
  0x7b   : > { %541 = vrot.lane.b32.xlu1 %v3168_v45, %s2665_s22  ;;  %676 = vrot.lane.b32.xlu0 %v3171_v46, %s2666_s23  ;;  %v616_v46 = vld [vmem:[#allocation2 + $0x62] sm:$0xff]  ;;  %v618_v45 = vld [vmem:[#allocation2 + $0x7a] sm:$0xff] }
  0x7f   : > { %674 = vrot.lane.b32.xlu1 %v609_v29, %s2666_s23  ;;  %680 = vrot.lane.b32.xlu0 %v3177_v36, %s2666_s23  ;;  %v615_v29 = vld [vmem:[#allocation2 + $0x52] sm:$0xff]  ;;  %v617_v36 = vld [vmem:[#allocation2 + $0x6a] sm:$0xff] }
  0x83   : > { %678 = vrot.lane.b32.xlu1 %v3180_v35, %s2666_s23  ;;  %684 = vrot.lane.b32.xlu0 %v3184_v37, %s2666_s23  ;;  %v619_v35 = vld [vmem:[#allocation2 + $0x82] sm:$0xff]  ;;  %v622_v37 = vld [vmem:[#allocation2 + $0xaa] sm:$0xff] }
  0x87   : > { %682 = vrot.lane.b32.xlu1 %v3188_v39, %s2666_s23  ;;  %688 = vrot.lane.b32.xlu0 %v616_v46, %s2666_s23  ;;  %v624_v39 = vld [vmem:[#allocation2 + $0xc2] sm:$0xff]  ;;  %v623_v46 = vld [vmem:[#allocation2 + $0xb2] sm:$0xff] }
  0x8b   : > { %686 = vrot.lane.b32.xlu1 %v615_v29, %s2666_s23  ;;  %692 = vrot.lane.b32.xlu0 %v618_v45, %s2666_s23  ;;  %v3203_v29 = vld [vmem:[#allocation2 + $0xda] sm:$0xff]  ;;  %v625_v45 = vld [vmem:[#allocation2 + $0xca] sm:$0xff] }
  0x8c   : > { %3947 = vst [vmem:[#allocation15_spill] sm:$0xff] %v3203_v29 }
  0x8f   : > { %690 = vrot.lane.b32.xlu1 %v617_v36, %s2666_s23  ;;  %696 = vrot.lane.b32.xlu0 %v620_v34, %s2666_s23  ;;  %v3208_v34 = vld [vmem:[#allocation2 + $0xf2] sm:$0xff]  ;;  %v632_v36 = vld [vmem:[#allocation2 + $0x122] sm:$0xff] }
  0x90   : > { %3948 = vst [vmem:[#allocation16_spill] sm:$0xff] %v3208_v34 }
  0x93   : > { %694 = vrot.lane.b32.xlu1 %v619_v35, %s2666_s23  ;;  %700 = vrot.lane.b32.xlu0 %v622_v37, %s2666_s23  ;;  %v3211_v35 = vld [vmem:[#allocation2 + $0xe2] sm:$0xff]  ;;  %v3219_v37 = vld [vmem:[#allocation2 + $0xfa] sm:$0xff] }
  0x94   : > { %3949 = vst [vmem:[#allocation17_spill] sm:$0xff] %v3211_v35  ;;  %3951 = vst [vmem:[#allocation19_spill] sm:$0xff] %v3219_v37 }
  0x97   : > { %698 = vrot.lane.b32.xlu1 %v621_v33, %s2666_s23  ;;  %704 = vrot.lane.b32.xlu0 %v624_v39, %s2666_s23  ;;  %v3215_v33 = vld [vmem:[#allocation2 + $0x10a] sm:$0xff]  ;;  %v3225_v39 = vld [vmem:[#allocation2 + $0x112] sm:$0xff] }
  0x98   : > { %3950 = vst [vmem:[#allocation18_spill] sm:$0xff] %v3215_v33 }
  0x9b   : > { %702 = vrot.lane.b32.xlu1 %v623_v46, %s2666_s23  ;;  %708 = vrot.lane.b32.xlu0 %v3203_v29, %s2666_s23  ;;  %v634_v46 = vld [vmem:[#allocation2 + $0x13a] sm:$0xff]  ;;  %v638_v29 = vld [vmem:[#allocation2 + $0x16a] sm:$0xff] }
  0x9f   : > { %706 = vrot.lane.b32.xlu1 %v625_v45, %s2666_s23  ;;  %712 = vrot.lane.b32.xlu0 %v3208_v34, %s2666_s23  ;;  %v480_v45 = vpop.permute.xlu0 %479  ;;  %v633_v34 = vld [vmem:[#allocation2 + $0x12a] sm:$0xff] }
  0xa0   : > { %576 = vst.msk [vmem:[#allocation3] sm:$0xff] %vm575_vm2, %v480_v45  ;;  %v637_v45 = vld [vmem:[#allocation2 + $0x15a] sm:$0xff] }
  0xa3   : > { %710 = vrot.lane.b32.xlu1 %v3211_v35, %s2666_s23  ;;  %716 = vrot.lane.b32.xlu0 %v3215_v33, %s2666_s23  ;;  %v636_v33 = vld [vmem:[#allocation2 + $0x152] sm:$0xff] }
  0xa7   : > { %714 = vrot.lane.b32.xlu1 %v3219_v37, %s2666_s23  ;;  %720 = vrot.lane.b32.xlu0 %v632_v36, %s2666_s23  ;;  %v635_v37 = vld [vmem:[#allocation2 + $0x142] sm:$0xff] }
  0xa8   : > { %v482_v35 = vpop.permute.xlu0 %481 }
  0xa9   : > { %577 = vst.msk [vmem:[#allocation3 + $0x8] sm:$0xff] %vm575_vm2, %v482_v35  ;;  %v639_v35 = vld [vmem:[#allocation2 + $0x172] sm:$0xff] }
  0xab   : > { %718 = vrot.lane.b32.xlu1 %v3225_v39, %s2666_s23  ;;  %724 = vrot.lane.b32.xlu0 %v634_v46, %s2666_s23 }
  0xaf   : > { %722 = vrot.lane.b32.xlu1 %v633_v34, %s2666_s23  ;;  %728 = vrot.lane.b32.xlu0 %v636_v33, %s2666_s23 }
  0xb1   : > { %v484_v36 = vpop.permute.xlu1 %483  ;;  %v488_v24 = vpop.permute.xlu0 %487 }
  0xb2   : > { %578 = vst.msk [vmem:[#allocation3 + $0x10] sm:$0xff] %vm575_vm2, %v484_v36  ;;  %580 = vst.msk [vmem:[#allocation3 + $0x20] sm:$0xff] %vm575_vm2, %v488_v24 }
  0xb3   : > { %726 = vrot.lane.b32.xlu1 %v635_v37, %s2666_s23  ;;  %732 = vrot.lane.b32.xlu0 %v638_v29, %s2666_s23 }
  0xb5   : > { %v486_v46 = vpop.permute.xlu1 %485  ;;  %v492_v34 = vpop.permute.xlu0 %491 }
  0xb6   : > { %579 = vst.msk [vmem:[#allocation3 + $0x18] sm:$0xff] %vm575_vm2, %v486_v46  ;;  %582 = vst.msk [vmem:[#allocation3 + $0x30] sm:$0xff] %vm575_vm2, %v492_v34 }
  0xb7   : > { %730 = vrot.lane.b32.xlu1 %v637_v45, %s2666_s23  ;;  %865 = vrot.lane.b32.xlu0 %v2976_v48, %s2667_s24 }
  0xb9   : > { %v490_v33 = vpop.permute.xlu1 %489  ;;  %v496_v24 = vpop.permute.xlu0 %495 }
  0xba   : > { %581 = vst.msk [vmem:[#allocation3 + $0x28] sm:$0xff] %vm575_vm2, %v490_v33  ;;  %584 = vst.msk [vmem:[#allocation3 + $0x40] sm:$0xff] %vm575_vm2, %v496_v24 }
  0xbb   : > { %734 = vrot.lane.b32.xlu1 %v639_v35, %s2666_s23  ;;  %869 = vrot.lane.b32.xlu0 %v2982_v49, %s2667_s24 }
  0xbd   : > { %v494_v29 = vpop.permute.xlu1 %493  ;;  %v500_v37 = vpop.permute.xlu0 %499 }
  0xbe   : > { %583 = vst.msk [vmem:[#allocation3 + $0x38] sm:$0xff] %vm575_vm2, %v494_v29  ;;  %586 = vst.msk [vmem:[#allocation3 + $0x50] sm:$0xff] %vm575_vm2, %v500_v37 }
  0xbf   : > { %867 = vrot.lane.b32.xlu1 %v2988_v51, %s2667_s24  ;;  %873 = vrot.lane.b32.xlu0 %v2990_v52, %s2667_s24 }
  0xc1   : > { %v498_v48 = vpop.permute.xlu1 %497  ;;  %v504_v36 = vpop.permute.xlu0 %503 }
  0xc2   : > { %585 = vst.msk [vmem:[#allocation3 + $0x48] sm:$0xff] %vm575_vm2, %v498_v48  ;;  %588 = vst.msk [vmem:[#allocation3 + $0x60] sm:$0xff] %vm575_vm2, %v504_v36 }
  0xc3   : > { %871 = vrot.lane.b32.xlu1 %v3000_v54, %s2667_s24  ;;  %877 = vrot.lane.b32.xlu0 %v3002_v55, %s2667_s24 }
  0xc5   : > { %v502_v45 = vpop.permute.xlu1 %501  ;;  %v508_v51 = vpop.permute.xlu0 %507 }
  0xc6   : > { %587 = vst.msk [vmem:[#allocation3 + $0x58] sm:$0xff] %vm575_vm2, %v502_v45  ;;  %590 = vst.msk [vmem:[#allocation3 + $0x70] sm:$0xff] %vm575_vm2, %v508_v51 }
  0xc7   : > { %875 = vrot.lane.b32.xlu1 %v3010_v57, %s2667_s24  ;;  %881 = vrot.lane.b32.xlu0 %v3012_v58, %s2667_s24 }
  0xc9   : > { %v506_v46 = vpop.permute.xlu1 %505  ;;  %v512_v34 = vpop.permute.xlu0 %511 }
  0xca   : > { %589 = vst.msk [vmem:[#allocation3 + $0x68] sm:$0xff] %vm575_vm2, %v506_v46  ;;  %592 = vst.msk [vmem:[#allocation3 + $0x80] sm:$0xff] %vm575_vm2, %v512_v34 }
  0xcb   : > { %879 = vrot.lane.b32.xlu1 %v3014_v59, %s2667_s24  ;;  %885 = vrot.lane.b32.xlu0 %v3024_v60, %s2667_s24 }
  0xcd   : > { %v510_v35 = vpop.permute.xlu1 %509  ;;  %v516_v33 = vpop.permute.xlu0 %515 }
  0xce   : > { %591 = vst.msk [vmem:[#allocation3 + $0x78] sm:$0xff] %vm575_vm2, %v510_v35  ;;  %594 = vst.msk [vmem:[#allocation3 + $0x90] sm:$0xff] %vm575_vm2, %v516_v33  ;;  %v831_v35 = vld [vmem:[#allocation2 + $0x180] sm:$0xff] }
  0xcf   : > { %883 = vrot.lane.b32.xlu1 %v3026_v61, %s2667_s24  ;;  %889 = vrot.lane.b32.xlu0 %v3028_v62, %s2667_s24 }
  0xd1   : > { %v514_v24 = vpop.permute.xlu1 %513  ;;  %v520_v29 = vpop.permute.xlu0 %519 }
  0xd2   : > { %593 = vst.msk [vmem:[#allocation3 + $0x88] sm:$0xff] %vm575_vm2, %v514_v24  ;;  %596 = vst.msk [vmem:[#allocation3 + $0xa0] sm:$0xff] %vm575_vm2, %v520_v29 }
  0xd3   : > { %887 = vrot.lane.b32.xlu1 %v3038_v0, %s2667_s24  ;;  %893 = vrot.lane.b32.xlu0 %v3040_v1, %s2667_s24 }
  0xd5   : > { %v518_v60 = vpop.permute.xlu1 %517  ;;  %v524_v37 = vpop.permute.xlu0 %523 }
  0xd6   : > { %595 = vst.msk [vmem:[#allocation3 + $0x98] sm:$0xff] %vm575_vm2, %v518_v60  ;;  %598 = vst.msk [vmem:[#allocation3 + $0xb0] sm:$0xff] %vm575_vm2, %v524_v37 }
  0xd7   : > { %891 = vrot.lane.b32.xlu1 %v3042_v2, %s2667_s24  ;;  %897 = vrot.lane.b32.xlu0 %v3052_v3, %s2667_s24 }
  0xd9   : > { %v522_v62 = vpop.permute.xlu1 %521  ;;  %v528_v0 = vpop.permute.xlu0 %527 }
  0xda   : > { %597 = vst.msk [vmem:[#allocation3 + $0xa8] sm:$0xff] %vm575_vm2, %v522_v62  ;;  %600 = vst.msk [vmem:[#allocation3 + $0xc0] sm:$0xff] %vm575_vm2, %v528_v0 }
  0xdb   : > { %895 = vrot.lane.b32.xlu1 %v3054_v4, %s2667_s24  ;;  %901 = vrot.lane.b32.xlu0 %v3056_v5, %s2667_s24 }
  0xdd   : > { %v526_v1 = vpop.permute.xlu1 %525  ;;  %v532_v2 = vpop.permute.xlu0 %531 }
  0xde   : > { %599 = vst.msk [vmem:[#allocation3 + $0xb8] sm:$0xff] %vm575_vm2, %v526_v1  ;;  %602 = vst.msk [vmem:[#allocation3 + $0xd0] sm:$0xff] %vm575_vm2, %v532_v2  ;;  %v3952_v1 = vld [vmem:[#allocation4_spill] sm:$0xff] }
  0xdf   : > { %899 = vrot.lane.b32.xlu1 %v3064_v6, %s2667_s24  ;;  %905 = vrot.lane.b32.xlu0 %v3066_v7, %s2667_s24 }
  0xe1   : > { %v530_v3 = vpop.permute.xlu1 %529  ;;  %v536_v4 = vpop.permute.xlu0 %535 }
  0xe2   : > { %601 = vst.msk [vmem:[#allocation3 + $0xc8] sm:$0xff] %vm575_vm2, %v530_v3  ;;  %604 = vst.msk [vmem:[#allocation3 + $0xe0] sm:$0xff] %vm575_vm2, %v536_v4  ;;  %v3954_v3 = vld [vmem:[#allocation6_spill] sm:$0xff] }
  0xe3   : > { %903 = vrot.lane.b32.xlu1 %v3068_v8, %s2667_s24  ;;  %909 = vrot.lane.b32.xlu0 %v3078_v9, %s2667_s24 }
  0xe5   : > { %v534_v48 = vpop.permute.xlu1 %533  ;;  %v540_v6 = vpop.permute.xlu0 %539 }
  0xe6   : > { %603 = vst.msk [vmem:[#allocation3 + $0xd8] sm:$0xff] %vm575_vm2, %v534_v48  ;;  %606 = vst.msk [vmem:[#allocation3 + $0xf0] sm:$0xff] %vm575_vm2, %v540_v6  ;;  %v1024_v48 = vld [vmem:[#allocation2 + $0x181] sm:$0xff] }
  0xe7   : > { %907 = vrot.lane.b32.xlu1 %v3080_v10, %s2667_s24  ;;  %913 = vrot.lane.b32.xlu0 %v3088_v12, %s2667_s24 }
  0xe9   : > { %v538_v36 = vpop.permute.xlu1 %537  ;;  %v673_v45 = vpop.permute.xlu0 %672 }
  0xea   : > { %605 = vst.msk [vmem:[#allocation3 + $0xe8] sm:$0xff] %vm575_vm2, %v538_v36  ;;  %v3956_v36 = vld [vmem:[#allocation8_spill] sm:$0xff] }
  0xeb   : > { %911 = vrot.lane.b32.xlu1 %v3096_v14, %s2667_s24  ;;  %769 = vst.msk [vmem:[#allocation3] sm:$0xff] %vm768_vm3, %v673_v45  ;;  %917 = vrot.lane.b32.xlu0 %v3104_v16, %s2667_s24  ;;  %v2007_v45 = vld [vmem:[%s3910_s1 + $0x78] sm:$0xff] }
  0xec   : > { %2527 = vmatprep.subr.mxu0 %v2007_v45  ;;  %2607 = vmatprep.subr.mxu1 %v2007_v45 }
  0xed   : > { %v542_v51 = vpop.permute.xlu1 %541  ;;  %v677_v46 = vpop.permute.xlu0 %676  ;;  %2528 = vmatpush3.msra.mxu0 %v2007_v45  ;;  %2623 = vmatpush3.msra.mxu1 %v2007_v45 }
  0xee   : > { %607 = vst.msk [vmem:[#allocation3 + $0xf8] sm:$0xff] %vm575_vm2, %v542_v51 }
  0xef   : > { %915 = vrot.lane.b32.xlu1 %v3112_v18, %s2667_s24  ;;  %771 = vst.msk [vmem:[#allocation3 + $0x10] sm:$0xff] %vm768_vm3, %v677_v46  ;;  %921 = vrot.lane.b32.xlu0 %v3120_v20, %s2667_s24  ;;  %v832_v20 = vld [vmem:[#allocation2 + $0x188] sm:$0xff]  ;;  %v2006_v46 = vld [vmem:[%s3910_s1 + $0x70] sm:$0xff] }
  0xf0   : > { %2529 = vmatprep.subr.mxu0 %v2006_v46  ;;  %2608 = vmatprep.subr.mxu1 %v2006_v46 }
  0xf1   : > { %v675_v34 = vpop.permute.xlu1 %674  ;;  %v681_v33 = vpop.permute.xlu0 %680  ;;  %2530 = vmatpush3.msra.mxu0 %v2006_v46  ;;  %2624 = vmatpush3.msra.mxu1 %v2006_v46  ;;  %v1576_v46 = vld [vmem:[#allocation2 + $0x49] sm:$0xff] }
  0xf2   : > { %770 = vst.msk [vmem:[#allocation3 + $0x8] sm:$0xff] %vm768_vm3, %v675_v34  ;;  %773 = vst.msk [vmem:[#allocation3 + $0x20] sm:$0xff] %vm768_vm3, %v681_v33  ;;  %v2005_v33 = vld [vmem:[%s3910_s1 + $0x68] sm:$0xff] }
  0xf3   : > { %919 = vrot.lane.b32.xlu1 %v3128_v22, %s2667_s24  ;;  %925 = vrot.lane.b32.xlu0 %v831_v35, %s2667_s24  ;;  %v3957_v35 = vld [vmem:[#allocation9_spill] sm:$0xff] }
  0xf4   : > { %2531 = vmatprep.subr.mxu0 %v2005_v33  ;;  %2609 = vmatprep.subr.mxu1 %v2005_v33 }
  0xf5   : > { %v679_v16 = vpop.permute.xlu1 %678  ;;  %v685_v24 = vpop.permute.xlu0 %684  ;;  %2532 = vmatpush3.msra.mxu0 %v2005_v33  ;;  %2625 = vmatpush3.msra.mxu1 %v2005_v33 }
  0xf6   : > { %772 = vst.msk [vmem:[#allocation3 + $0x18] sm:$0xff] %vm768_vm3, %v679_v16  ;;  %775 = vst.msk [vmem:[#allocation3 + $0x30] sm:$0xff] %vm768_vm3, %v685_v24  ;;  %v1025_v16 = vld [vmem:[#allocation2 + $0x189] sm:$0xff]  ;;  %v3958_v24 = vld [vmem:[#allocation10_spill] sm:$0xff] }
  0xf7   : > { %923 = vrot.lane.b32.xlu1 %v3140_v28, %s2667_s24  ;;  %1058 = vrot.lane.b32.xlu0 %v2907_v25, %s2668_s25 }
  0xf9   : > { %v683_v29 = vpop.permute.xlu1 %682  ;;  %v689_v22 = vpop.permute.xlu0 %688 }
  0xfa   : > { %774 = vst.msk [vmem:[#allocation3 + $0x28] sm:$0xff] %vm768_vm3, %v683_v29  ;;  %777 = vst.msk [vmem:[#allocation3 + $0x40] sm:$0xff] %vm768_vm3, %v689_v22  ;;  %v2004_v29 = vld [vmem:[%s3910_s1 + $0x60] sm:$0xff] }
  0xfb   : > { %927 = vrot.lane.b32.xlu1 %v832_v20, %s2667_s24  ;;  %1062 = vrot.lane.b32.xlu0 %v2909_v26, %s2668_s25 }
  0xfc   : > { %2533 = vmatprep.subr.mxu0 %v2004_v29  ;;  %2610 = vmatprep.subr.mxu1 %v2004_v29 }
  0xfd   : > { %v687_v60 = vpop.permute.xlu1 %686  ;;  %v693_v28 = vpop.permute.xlu0 %692  ;;  %2534 = vmatpush3.msra.mxu0 %v2004_v29  ;;  %2626 = vmatpush3.msra.mxu1 %v2004_v29 }
  0xfe   : > { %776 = vst.msk [vmem:[#allocation3 + $0x38] sm:$0xff] %vm768_vm3, %v687_v60  ;;  %779 = vst.msk [vmem:[#allocation3 + $0x50] sm:$0xff] %vm768_vm3, %v693_v28  ;;  %v2003_v60 = vld [vmem:[%s3910_s1 + $0x58] sm:$0xff]  ;;  %v3959_v28 = vld [vmem:[#allocation12_spill] sm:$0xff] }
  0xff   : > { %1060 = vrot.lane.b32.xlu1 %v2916_v27, %s2668_s25  ;;  %1066 = vrot.lane.b32.xlu0 %v2924_v30, %s2668_s25 }
 0x100   : > { %2535 = vmatprep.subr.mxu0 %v2003_v60  ;;  %2611 = vmatprep.subr.mxu1 %v2003_v60 }
 0x101   : > { %v691_v25 = vpop.permute.xlu1 %690  ;;  %v697_v37 = vpop.permute.xlu0 %696  ;;  %2536 = vmatpush3.msra.mxu0 %v2003_v60  ;;  %2627 = vmatpush3.msra.mxu1 %v2003_v60 }
 0x102   : > { %778 = vst.msk [vmem:[#allocation3 + $0x48] sm:$0xff] %vm768_vm3, %v691_v25  ;;  %781 = vst.msk [vmem:[#allocation3 + $0x60] sm:$0xff] %vm768_vm3, %v697_v37  ;;  %v2002_v37 = vld [vmem:[%s3910_s1 + $0x50] sm:$0xff] }
 0x103   : > { %1064 = vrot.lane.b32.xlu1 %v2928_v31, %s2668_s25  ;;  %1070 = vrot.lane.b32.xlu0 %v2932_v32, %s2668_s25 }
 0x104   : > { %2537 = vmatprep.subr.mxu0 %v2002_v37  ;;  %2612 = vmatprep.subr.mxu1 %v2002_v37 }
 0x105   : > { %v695_v26 = vpop.permute.xlu1 %694  ;;  %v701_v27 = vpop.permute.xlu0 %700  ;;  %2538 = vmatpush3.msra.mxu0 %v2002_v37  ;;  %2628 = vmatpush3.msra.mxu1 %v2002_v37  ;;  %v3967_v37 = vld [vmem:[#allocation18_spill] sm:$0xff] }
 0x106   : > { %780 = vst.msk [vmem:[#allocation3 + $0x58] sm:$0xff] %vm768_vm3, %v695_v26  ;;  %783 = vst.msk [vmem:[#allocation3 + $0x70] sm:$0xff] %vm768_vm3, %v701_v27  ;;  %v3960_v27 = vld [vmem:[#allocation15_spill] sm:$0xff] }
 0x107   : > { %1068 = vrot.lane.b32.xlu1 %v2944_v38, %s2668_s25  ;;  %1074 = vrot.lane.b32.xlu0 %v2952_v40, %s2668_s25 }
 0x109   : > { %v699_v30 = vpop.permute.xlu1 %698  ;;  %v705_v31 = vpop.permute.xlu0 %704 }
 0x10a   : > { %782 = vst.msk [vmem:[#allocation3 + $0x68] sm:$0xff] %vm768_vm3, %v699_v30  ;;  %785 = vst.msk [vmem:[#allocation3 + $0x80] sm:$0xff] %vm768_vm3, %v705_v31  ;;  %v2001_v30 = vld [vmem:[%s3910_s1 + $0x48] sm:$0xff] }
 0x10b   : > { %1072 = vrot.lane.b32.xlu1 %v2956_v41, %s2668_s25  ;;  %1078 = vrot.lane.b32.xlu0 %v2960_v42, %s2668_s25 }
 0x10c   : > { %2539 = vmatprep.subr.mxu0 %v2001_v30  ;;  %2613 = vmatprep.subr.mxu1 %v2001_v30 }
 0x10d   : > { %v703_v32 = vpop.permute.xlu1 %702  ;;  %v709_v38 = vpop.permute.xlu0 %708  ;;  %2540 = vmatpush3.msra.mxu0 %v2001_v30  ;;  %2629 = vmatpush3.msra.mxu1 %v2001_v30 }
 0x10e   : > { %784 = vst.msk [vmem:[#allocation3 + $0x78] sm:$0xff] %vm768_vm3, %v703_v32  ;;  %787 = vst.msk [vmem:[#allocation3 + $0x90] sm:$0xff] %vm768_vm3, %v709_v38  ;;  %v2000_v32 = vld [vmem:[%s3910_s1 + $0x40] sm:$0xff] }
 0x10f   : > { %1076 = vrot.lane.b32.xlu1 %v2964_v43, %s2668_s25  ;;  %1082 = vrot.lane.b32.xlu0 %v2968_v44, %s2668_s25 }
 0x110   : > { %2541 = vmatprep.subr.mxu0 %v2000_v32  ;;  %2614 = vmatprep.subr.mxu1 %v2000_v32 }
 0x111   : > { %v707_v40 = vpop.permute.xlu1 %706  ;;  %v713_v41 = vpop.permute.xlu0 %712  ;;  %2542 = vmatpush3.msra.mxu0 %v2000_v32  ;;  %2630 = vmatpush3.msra.mxu1 %v2000_v32 }
 0x112   : > { %786 = vst.msk [vmem:[#allocation3 + $0x88] sm:$0xff] %vm768_vm3, %v707_v40  ;;  %789 = vst.msk [vmem:[#allocation3 + $0xa0] sm:$0xff] %vm768_vm3, %v713_v41  ;;  %v3961_v40 = vld [vmem:[#allocation17_spill] sm:$0xff] }
 0x113   : > { %1080 = vrot.lane.b32.xlu1 %v2973_v47, %s2668_s25  ;;  %1086 = vrot.lane.b32.xlu0 %v2984_v50, %s2668_s25  ;;  %v1999_v41 = vld [vmem:[%s3910_s1 + $0x38] sm:$0xff] }
 0x114   : > { %2543 = vmatprep.subr.mxu0 %v1999_v41  ;;  %2615 = vmatprep.subr.mxu1 %v1999_v41 }
 0x115   : > { %v711_v42 = vpop.permute.xlu1 %710  ;;  %v717_v43 = vpop.permute.xlu0 %716  ;;  %2544 = vmatpush3.msra.mxu0 %v1999_v41  ;;  %2631 = vmatpush3.msra.mxu1 %v1999_v41  ;;  %v1578_v41 = vld [vmem:[#allocation2 + $0x61] sm:$0xff] }
 0x116   : > { %788 = vst.msk [vmem:[#allocation3 + $0x98] sm:$0xff] %vm768_vm3, %v711_v42  ;;  %791 = vst.msk [vmem:[#allocation3 + $0xb0] sm:$0xff] %vm768_vm3, %v717_v43  ;;  %v1998_v42 = vld [vmem:[%s3910_s1 + $0x30] sm:$0xff] }
 0x117   : > { %1084 = vrot.lane.b32.xlu1 %v2994_v53, %s2668_s25  ;;  %1090 = vrot.lane.b32.xlu0 %v3004_v56, %s2668_s25  ;;  %v1574_v43 = vld [vmem:[#allocation2 + $0x31] sm:$0xff] }
 0x118   : > { %2545 = vmatprep.subr.mxu0 %v1998_v42  ;;  %2616 = vmatprep.subr.mxu1 %v1998_v42 }
 0x119   : > { %v715_v44 = vpop.permute.xlu1 %714  ;;  %v721_v47 = vpop.permute.xlu0 %720  ;;  %2546 = vmatpush3.msra.mxu0 %v1998_v42  ;;  %2632 = vmatpush3.msra.mxu1 %v1998_v42 }
 0x11a   : > { %790 = vst.msk [vmem:[#allocation3 + $0xa8] sm:$0xff] %vm768_vm3, %v715_v44  ;;  %793 = vst.msk [vmem:[#allocation3 + $0xc0] sm:$0xff] %vm768_vm3, %v721_v47 }
 0x11b   : > { %1088 = vrot.lane.b32.xlu1 %v3030_v63, %s2668_s25  ;;  %1094 = vrot.lane.b32.xlu0 %v3082_v11, %s2668_s25 }
 0x11d   : > { %v719_v50 = vpop.permute.xlu1 %718  ;;  %v725_v53 = vpop.permute.xlu0 %724 }
 0x11e   : > { %792 = vst.msk [vmem:[#allocation3 + $0xb8] sm:$0xff] %vm768_vm3, %v719_v50  ;;  %795 = vst.msk [vmem:[#allocation3 + $0xd0] sm:$0xff] %vm768_vm3, %v725_v53  ;;  %v1575_v50 = vld [vmem:[#allocation2 + $0x39] sm:$0xff] }
 0x11f   : > { %1092 = vrot.lane.b32.xlu1 %v3094_v13, %s2668_s25  ;;  %1098 = vrot.lane.b32.xlu0 %v3102_v15, %s2668_s25  ;;  %v1996_v53 = vld [vmem:[%s3910_s1 + $0x20] sm:$0xff] }
 0x121   : > { %v723_v56 = vpop.permute.xlu1 %722  ;;  %v729_v63 = vpop.permute.xlu0 %728 }
 0x122   : > { %794 = vst.msk [vmem:[#allocation3 + $0xc8] sm:$0xff] %vm768_vm3, %v723_v56  ;;  %797 = vst.msk [vmem:[#allocation3 + $0xe0] sm:$0xff] %vm768_vm3, %v729_v63  ;;  %v1995_v63 = vld [vmem:[%s3910_s1 + $0x18] sm:$0xff] }
 0x123   : > { %1096 = vrot.lane.b32.xlu1 %v3110_v17, %s2668_s25  ;;  %1102 = vrot.lane.b32.xlu0 %v3118_v19, %s2668_s25  ;;  %v3953_v19 = vld [vmem:[#allocation5_spill] sm:$0xff] }
 0x125   : > { %v727_v62 = vpop.permute.xlu1 %726  ;;  %v733_v13 = vpop.permute.xlu0 %732 }
 0x126   : > { %796 = vst.msk [vmem:[#allocation3 + $0xd8] sm:$0xff] %vm768_vm3, %v727_v62  ;;  %799 = vst.msk [vmem:[#allocation3 + $0xf0] sm:$0xff] %vm768_vm3, %v733_v13  ;;  %v1994_v62 = vld [vmem:[%s3910_s1 + $0x10] sm:$0xff]  ;;  %v3962_v13 = vld [vmem:[#allocation11_spill] sm:$0xff] }
 0x127   : > { %1100 = vrot.lane.b32.xlu1 %v3126_v21, %s2668_s25  ;;  %1106 = vrot.lane.b32.xlu0 %v3134_v23, %s2668_s25  ;;  %v3955_v23 = vld [vmem:[#allocation7_spill] sm:$0xff] }
 0x129   : > { %v731_v15 = vpop.permute.xlu1 %730  ;;  %v866_v0 = vpop.permute.xlu0 %865 }
 0x12a   : > { %798 = vst.msk [vmem:[#allocation3 + $0xe8] sm:$0xff] %vm768_vm3, %v731_v15 }
 0x12b   : > { %1104 = vrot.lane.b32.xlu1 %v3952_v1, %s2668_s25  ;;  %962 = vst.msk [vmem:[#allocation3] sm:$0xff] %vm961_vm4, %v866_v0  ;;  %1110 = vrot.lane.b32.xlu0 %v3953_v19, %s2668_s25  ;;  %v1993_v0 = vld [vmem:[%s3910_s1 + $0x8] sm:$0xff]  ;;  %v1992_v19 = vld [vmem:[%s3910_s1] sm:$0xff] }
 0x12d   : > { %v735_v2 = vpop.permute.xlu1 %734  ;;  %v870_v21 = vpop.permute.xlu0 %869 }
 0x12e   : > { %800 = vst.msk [vmem:[#allocation3 + $0xf8] sm:$0xff] %vm768_vm3, %v735_v2  ;;  %v3963_v2 = vld [vmem:[#allocation16_spill] sm:$0xff] }
 0x12f   : > { %1108 = vrot.lane.b32.xlu1 %v3954_v3, %s2668_s25  ;;  %964 = vst.msk [vmem:[#allocation3 + $0x10] sm:$0xff] %vm961_vm4, %v870_v21  ;;  %1114 = vrot.lane.b32.xlu0 %v3955_v23, %s2668_s25  ;;  %v3964_v21 = vld [vmem:[#allocation14_spill] sm:$0xff] }
 0x131   : > { %v868_v4 = vpop.permute.xlu1 %867  ;;  %v874_v6 = vpop.permute.xlu0 %873 }
 0x132   : > { %963 = vst.msk [vmem:[#allocation3 + $0x8] sm:$0xff] %vm961_vm4, %v868_v4  ;;  %966 = vst.msk [vmem:[#allocation3 + $0x20] sm:$0xff] %vm961_vm4, %v874_v6  ;;  %v3965_v6 = vld [vmem:[#allocation19_spill] sm:$0xff] }
 0x133   : > { %1112 = vrot.lane.b32.xlu1 %v3956_v36, %s2668_s25  ;;  %1118 = vrot.lane.b32.xlu0 %v1024_v48, %s2668_s25 }
 0x135   : > { %v872_v51 = vpop.permute.xlu1 %871  ;;  %v878_v34 = vpop.permute.xlu0 %877 }
 0x136   : > { %965 = vst.msk [vmem:[#allocation3 + $0x18] sm:$0xff] %vm961_vm4, %v872_v51  ;;  %968 = vst.msk [vmem:[#allocation3 + $0x30] sm:$0xff] %vm961_vm4, %v878_v34 }
 0x137   : > { %1116 = vrot.lane.b32.xlu1 %v3957_v35, %s2668_s25  ;;  %1251 = vrot.lane.b32.xlu0 %v3958_v24, %s2669_s6  ;;  %v1577_v35 = vld [vmem:[#allocation2 + $0x51] sm:$0xff] }
 0x138   : > { %v1593_v24 = vld [vmem:[#allocation2 + $0x111] sm:$0xff] }
 0x139   : > { %v876_v20 = vpop.permute.xlu1 %875  ;;  %v882_v22 = vpop.permute.xlu0 %881 }
 0x13a   : > { %967 = vst.msk [vmem:[#allocation3 + $0x28] sm:$0xff] %vm961_vm4, %v876_v20  ;;  %970 = vst.msk [vmem:[#allocation3 + $0x40] sm:$0xff] %vm961_vm4, %v882_v22  ;;  %v3966_v20 = vld [vmem:[#allocation13_spill] sm:$0xff] }
 0x13b   : > { %1120 = vrot.lane.b32.xlu1 %v1025_v16, %s2668_s25  ;;  %1253 = vrot.lane.b32.xlu0 %v3959_v28, %s2669_s6  ;;  %v1770_v28 = vld [vmem:[#allocation2 + $0x52] sm:$0xff] }
 0x13d   : > { %v880_v25 = vpop.permute.xlu1 %879  ;;  %v886_v26 = vpop.permute.xlu0 %885 }
 0x13e   : > { %969 = vst.msk [vmem:[#allocation3 + $0x38] sm:$0xff] %vm961_vm4, %v880_v25  ;;  %972 = vst.msk [vmem:[#allocation3 + $0x50] sm:$0xff] %vm961_vm4, %v886_v26 }
 0x13f   : > { %1283 = vrot.lane.b32.xlu1 %v3960_v27, %s2669_s6  ;;  %1445 = vrot.lane.b32.xlu0 %v2982_v49, %s2670_s17 }
 0x141   : > { %v884_v31 = vpop.permute.xlu1 %883  ;;  %v890_v38 = vpop.permute.xlu0 %889 }
 0x142   : > { %971 = vst.msk [vmem:[#allocation3 + $0x48] sm:$0xff] %vm961_vm4, %v884_v31  ;;  %974 = vst.msk [vmem:[#allocation3 + $0x60] sm:$0xff] %vm961_vm4, %v890_v38 }
 0x143   : > { %1285 = vrot.lane.b32.xlu1 %v3961_v40, %s2669_s6  ;;  %1447 = vrot.lane.b32.xlu0 %v3000_v54, %s2670_s17  ;;  %v1997_v54 = vld [vmem:[%s3910_s1 + $0x28] sm:$0xff] }
 0x144   : > { %2547 = vmatprep.subr.mxu0 %v1997_v54  ;;  %2617 = vmatprep.subr.mxu1 %v1997_v54 }
 0x145   : > { %v888_v49 = vpop.permute.xlu1 %887  ;;  %v894_v44 = vpop.permute.xlu0 %893  ;;  %2548 = vmatpush3.msra.mxu0 %v1997_v54  ;;  %2633 = vmatpush3.msra.mxu1 %v1997_v54  ;;  %v1595_v54 = vld [vmem:[#allocation2 + $0x129] sm:$0xff] }
 0x146   : > { %973 = vst.msk [vmem:[#allocation3 + $0x58] sm:$0xff] %vm961_vm4, %v888_v49  ;;  %976 = vst.msk [vmem:[#allocation3 + $0x70] sm:$0xff] %vm961_vm4, %v894_v44  ;;  %2549 = vmatprep.subr.mxu0 %v1996_v53  ;;  %2618 = vmatprep.subr.mxu1 %v1996_v53 }
 0x147   : > { %1477 = vrot.lane.b32.xlu1 %v3056_v5, %s2670_s17  ;;  %1638 = vrot.lane.b32.xlu0 %v1574_v43, %s2671_s26 }
 0x148   : > { %2550 = vmatpush3.msra.mxu0 %v1996_v53  ;;  %2634 = vmatpush3.msra.mxu1 %v1996_v53  ;;  %v1772_v53 = vld [vmem:[#allocation2 + $0x6a] sm:$0xff] }
 0x149   : > { %v892_v47 = vpop.permute.xlu1 %891  ;;  %v898_v5 = vpop.permute.xlu0 %897  ;;  %2551 = vmatprep.subr.mxu0 %v1995_v63  ;;  %2619 = vmatprep.subr.mxu1 %v1995_v63 }
 0x14a   : > { %975 = vst.msk [vmem:[#allocation3 + $0x68] sm:$0xff] %vm961_vm4, %v892_v47  ;;  %978 = vst.msk [vmem:[#allocation3 + $0x80] sm:$0xff] %vm961_vm4, %v898_v5  ;;  %2552 = vmatpush3.msra.mxu0 %v1995_v63  ;;  %2635 = vmatpush3.msra.mxu1 %v1995_v63 }
 0x14b   : > { %1479 = vrot.lane.b32.xlu1 %v3068_v8, %s2670_s17  ;;  %1640 = vrot.lane.b32.xlu0 %v1575_v50, %s2671_s26  ;;  %v1787_v50 = vld [vmem:[#allocation2 + $0x122] sm:$0xff] }
 0x14c   : > { %2553 = vmatprep.subr.mxu0 %v1994_v62  ;;  %2620 = vmatprep.subr.mxu1 %v1994_v62 }
 0x14d   : > { %v896_v56 = vpop.permute.xlu1 %895  ;;  %v902_v8 = vpop.permute.xlu0 %901  ;;  %2554 = vmatpush3.msra.mxu0 %v1994_v62  ;;  %2636 = vmatpush3.msra.mxu1 %v1994_v62  ;;  %v1788_v62 = vld [vmem:[#allocation2 + $0x12a] sm:$0xff] }
 0x14e   : > { %977 = vst.msk [vmem:[#allocation3 + $0x78] sm:$0xff] %vm961_vm4, %v896_v56  ;;  %980 = vst.msk [vmem:[#allocation3 + $0x90] sm:$0xff] %vm961_vm4, %v902_v8  ;;  %2555 = vmatprep.subr.mxu0 %v1993_v0  ;;  %2621 = vmatprep.subr.mxu1 %v1993_v0 }
 0x14f   : > { %1670 = vrot.lane.b32.xlu1 %v3082_v11, %s2671_s26  ;;  %1831 = vrot.lane.b32.xlu0 %v3962_v13, %s2672_s8 }
 0x150   : > { %2556 = vmatpush3.msra.mxu0 %v1993_v0  ;;  %2637 = vmatpush3.msra.mxu1 %v1993_v0 }
 0x151   : > { %v900_v15 = vpop.permute.xlu1 %899  ;;  %v906_v11 = vpop.permute.xlu0 %905  ;;  %2557 = vmatprep.subr.mxu0 %v1992_v19  ;;  %2622 = vmatprep.subr.mxu1 %v1992_v19 }
 0x152   : > { %979 = vst.msk [vmem:[#allocation3 + $0x88] sm:$0xff] %vm961_vm4, %v900_v15  ;;  %982 = vst.msk [vmem:[#allocation3 + $0xa0] sm:$0xff] %vm961_vm4, %v906_v11  ;;  %2558 = vmatpush3.msra.mxu0 %v1992_v19  ;;  %2638 = vmatpush3.msra.mxu1 %v1992_v19  ;;  %v1580_v19 = vld [vmem:[#allocation2 + $0x79] sm:$0xff] }
 0x153   : > { %1672 = vrot.lane.b32.xlu1 %v3110_v17, %s2671_s26  ;;  %1255 = vrot.lane.b32.xlu0 %v3962_v13, %s2669_s6 }
 0x155   : > { %v904_v1 = vpop.permute.xlu1 %903  ;;  %v910_v17 = vpop.permute.xlu0 %909 }
 0x156   : > { %981 = vst.msk [vmem:[#allocation3 + $0x98] sm:$0xff] %vm961_vm4, %v904_v1  ;;  %984 = vst.msk [vmem:[#allocation3 + $0xb0] sm:$0xff] %vm961_vm4, %v910_v17 }
 0x157   : > { %1863 = vrot.lane.b32.xlu1 %v3963_v2, %s2672_s8  ;;  %1833 = vrot.lane.b32.xlu0 %v3964_v21, %s2672_s8 }
 0x159   : > { %v908_v3 = vpop.permute.xlu1 %907  ;;  %v914_v23 = vpop.permute.xlu0 %913 }
 0x15a   : > { %983 = vst.msk [vmem:[#allocation3 + $0xa8] sm:$0xff] %vm961_vm4, %v908_v3  ;;  %986 = vst.msk [vmem:[#allocation3 + $0xc0] sm:$0xff] %vm961_vm4, %v914_v23 }
 0x15b   : > { %1287 = vrot.lane.b32.xlu1 %v3963_v2, %s2669_s6  ;;  %1257 = vrot.lane.b32.xlu0 %v3964_v21, %s2669_s6  ;;  %v1581_v2 = vld [vmem:[#allocation2 + $0x81] sm:$0xff] }
 0x15d   : > { %v912_v4 = vpop.permute.xlu1 %911  ;;  %v918_v48 = vpop.permute.xlu0 %917 }
 0x15e   : > { %985 = vst.msk [vmem:[#allocation3 + $0xb8] sm:$0xff] %vm961_vm4, %v912_v4  ;;  %988 = vst.msk [vmem:[#allocation3 + $0xd0] sm:$0xff] %vm961_vm4, %v918_v48  ;;  %v1597_v4 = vld [vmem:[#allocation2 + $0x141] sm:$0xff] }
 0x15f   : > { %1865 = vrot.lane.b32.xlu1 %v3965_v6, %s2672_s8  ;;  %1449 = vrot.lane.b32.xlu0 %v2990_v52, %s2670_s17 }
 0x161   : > { %v916_v36 = vpop.permute.xlu1 %915  ;;  %v922_v45 = vpop.permute.xlu0 %921 }
 0x162   : > { %987 = vst.msk [vmem:[#allocation3 + $0xc8] sm:$0xff] %vm961_vm4, %v916_v36  ;;  %990 = vst.msk [vmem:[#allocation3 + $0xe0] sm:$0xff] %vm961_vm4, %v922_v45  ;;  %v1774_v45 = vld [vmem:[#allocation2 + $0x82] sm:$0xff] }
 0x163   : > { %1289 = vrot.lane.b32.xlu1 %v3965_v6, %s2669_s6  ;;  %1451 = vrot.lane.b32.xlu0 %v3010_v57, %s2670_s17  ;;  %v1592_v57 = vld [vmem:[#allocation2 + $0x109] sm:$0xff]  ;;  %v1789_v6 = vld [vmem:[#allocation2 + $0x13a] sm:$0xff] }
 0x165   : > { %v920_v51 = vpop.permute.xlu1 %919  ;;  %v926_v34 = vpop.permute.xlu0 %925 }
 0x166   : > { %989 = vst.msk [vmem:[#allocation3 + $0xd8] sm:$0xff] %vm961_vm4, %v920_v51  ;;  %992 = vst.msk [vmem:[#allocation3 + $0xf0] sm:$0xff] %vm961_vm4, %v926_v34 }
 0x167   : > { %1481 = vrot.lane.b32.xlu1 %v3066_v7, %s2670_s17  ;;  %1642 = vrot.lane.b32.xlu0 %v1576_v46, %s2671_s26 }
 0x169   : > { %v924_v52 = vpop.permute.xlu1 %923  ;;  %v1059_v33 = vpop.permute.xlu0 %1058 }
 0x16a   : > { %991 = vst.msk [vmem:[#allocation3 + $0xe8] sm:$0xff] %vm961_vm4, %v924_v52  ;;  %v1790_v52 = vld [vmem:[#allocation2 + $0x142] sm:$0xff] }
 0x16b   : > { %1483 = vrot.lane.b32.xlu1 %v3080_v10, %s2670_s17  ;;  %1155 = vst.msk [vmem:[#allocation3] sm:$0xff] %vm1154_vm5, %v1059_v33  ;;  %1644 = vrot.lane.b32.xlu0 %v1577_v35, %s2671_s26  ;;  %v1191_v10 = vld [vmem:[#allocation2 + $0x4a] sm:$0xff] }
 0x16c   : > { %v1389_v33 = vld [vmem:[#allocation2 + $0x90] sm:$0xff] }
 0x16d   : > { %v928_v16 = vpop.permute.xlu1 %927  ;;  %v1063_v7 = vpop.permute.xlu0 %1062 }
 0x16e   : > { %993 = vst.msk [vmem:[#allocation3 + $0xf8] sm:$0xff] %vm961_vm4, %v928_v16 }
 0x16f   : > { %1674 = vrot.lane.b32.xlu1 %v1592_v57, %s2671_s26  ;;  %1157 = vst.msk [vmem:[#allocation3 + $0x10] sm:$0xff] %vm1154_vm5, %v1063_v7  ;;  %1835 = vrot.lane.b32.xlu0 %v3966_v20, %s2672_s8  ;;  %v1390_v7 = vld [vmem:[#allocation2 + $0x98] sm:$0xff]  ;;  %v1405_v20 = vld [vmem:[#allocation2 + $0x150] sm:$0xff] }
 0x171   : > { %v1061_v29 = vpop.permute.xlu1 %1060  ;;  %v1067_v22 = vpop.permute.xlu0 %1066 }
 0x172   : > { %1156 = vst.msk [vmem:[#allocation3 + $0x8] sm:$0xff] %vm1154_vm5, %v1061_v29  ;;  %1159 = vst.msk [vmem:[#allocation3 + $0x20] sm:$0xff] %vm1154_vm5, %v1067_v22 }
 0x173   : > { %1676 = vrot.lane.b32.xlu1 %v1593_v24, %s2671_s26  ;;  %1259 = vrot.lane.b32.xlu0 %v1191_v10, %s2669_s6  ;;  %v1582_v10 = vld [vmem:[#allocation2 + $0x91] sm:$0xff] }
 0x175   : > { %v1065_v60 = vpop.permute.xlu1 %1064  ;;  %v1071_v25 = vpop.permute.xlu0 %1070 }
 0x176   : > { %1158 = vst.msk [vmem:[#allocation3 + $0x18] sm:$0xff] %vm1154_vm5, %v1065_v60  ;;  %1161 = vst.msk [vmem:[#allocation3 + $0x30] sm:$0xff] %vm1154_vm5, %v1071_v25  ;;  %v1406_v60 = vld [vmem:[#allocation2 + $0x158] sm:$0xff] }
 0x177   : > { %1867 = vrot.lane.b32.xlu1 %v3967_v37, %s2672_s8  ;;  %1837 = vrot.lane.b32.xlu0 %v1770_v28, %s2672_s8  ;;  %v1583_v25 = vld [vmem:[#allocation2 + $0x99] sm:$0xff] }
 0x179   : > { %v1069_v26 = vpop.permute.xlu1 %1068  ;;  %v1075_v27 = vpop.permute.xlu0 %1074 }
 0x17a   : > { %1160 = vst.msk [vmem:[#allocation3 + $0x28] sm:$0xff] %vm1154_vm5, %v1069_v26  ;;  %1163 = vst.msk [vmem:[#allocation3 + $0x40] sm:$0xff] %vm1154_vm5, %v1075_v27  ;;  %v1598_v27 = vld [vmem:[#allocation2 + $0x151] sm:$0xff] }
 0x17b   : > { %1291 = vrot.lane.b32.xlu1 %v3967_v37, %s2669_s6  ;;  %1261 = vrot.lane.b32.xlu0 %v1770_v28, %s2669_s6 }
 0x17d   : > { %v1073_v30 = vpop.permute.xlu1 %1072  ;;  %v1079_v31 = vpop.permute.xlu0 %1078 }
 0x17e   : > { %1162 = vst.msk [vmem:[#allocation3 + $0x38] sm:$0xff] %vm1154_vm5, %v1073_v30  ;;  %1165 = vst.msk [vmem:[#allocation3 + $0x50] sm:$0xff] %vm1154_vm5, %v1079_v31  ;;  %v1775_v31 = vld [vmem:[#allocation2 + $0x92] sm:$0xff] }
 0x17f   : > { %1869 = vrot.lane.b32.xlu1 %v3225_v39, %s2672_s8  ;;  %1453 = vrot.lane.b32.xlu0 %v3002_v55, %s2670_s17 }
 0x181   : > { %v1077_v32 = vpop.permute.xlu1 %1076  ;;  %v1083_v38 = vpop.permute.xlu0 %1082 }
 0x182   : > { %1164 = vst.msk [vmem:[#allocation3 + $0x48] sm:$0xff] %vm1154_vm5, %v1077_v32  ;;  %1167 = vst.msk [vmem:[#allocation3 + $0x60] sm:$0xff] %vm1154_vm5, %v1083_v38  ;;  %v1599_v38 = vld [vmem:[#allocation2 + $0x159] sm:$0xff] }
 0x183   : > { %1293 = vrot.lane.b32.xlu1 %v3225_v39, %s2669_s6  ;;  %1455 = vrot.lane.b32.xlu0 %v3014_v59, %s2670_s17  ;;  %v1579_v39 = vld [vmem:[#allocation2 + $0x69] sm:$0xff]  ;;  %v1594_v59 = vld [vmem:[#allocation2 + $0x121] sm:$0xff] }
 0x185   : > { %v1081_v40 = vpop.permute.xlu1 %1080  ;;  %v1087_v49 = vpop.permute.xlu0 %1086 }
 0x186   : > { %1166 = vst.msk [vmem:[#allocation3 + $0x58] sm:$0xff] %vm1154_vm5, %v1081_v40  ;;  %1169 = vst.msk [vmem:[#allocation3 + $0x70] sm:$0xff] %vm1154_vm5, %v1087_v49 }
 0x187   : > { %1485 = vrot.lane.b32.xlu1 %v3078_v9, %s2670_s17  ;;  %1646 = vrot.lane.b32.xlu0 %v1578_v41, %s2671_s26  ;;  %v1771_v9 = vld [vmem:[#allocation2 + $0x62] sm:$0xff] }
 0x189   : > { %v1085_v55 = vpop.permute.xlu1 %1084  ;;  %v1091_v42 = vpop.permute.xlu0 %1090 }
 0x18a   : > { %1168 = vst.msk [vmem:[#allocation3 + $0x68] sm:$0xff] %vm1154_vm5, %v1085_v55  ;;  %1171 = vst.msk [vmem:[#allocation3 + $0x80] sm:$0xff] %vm1154_vm5, %v1091_v42 }
 0x18b   : > { %1487 = vrot.lane.b32.xlu1 %v3096_v14, %s2670_s17  ;;  %1648 = vrot.lane.b32.xlu0 %v1579_v39, %s2671_s26  ;;  %v1791_v39 = vld [vmem:[#allocation2 + $0x152] sm:$0xff] }
 0x18d   : > { %v1089_v43 = vpop.permute.xlu1 %1088  ;;  %v1095_v44 = vpop.permute.xlu0 %1094 }
 0x18e   : > { %1170 = vst.msk [vmem:[#allocation3 + $0x78] sm:$0xff] %vm1154_vm5, %v1089_v43  ;;  %1173 = vst.msk [vmem:[#allocation3 + $0x90] sm:$0xff] %vm1154_vm5, %v1095_v44 }
 0x18f   : > { %1678 = vrot.lane.b32.xlu1 %v1594_v59, %s2671_s26  ;;  %1839 = vrot.lane.b32.xlu0 %v1771_v9, %s2672_s8  ;;  %v1776_v59 = vld [vmem:[#allocation2 + $0x9a] sm:$0xff] }
 0x191   : > { %v1093_v47 = vpop.permute.xlu1 %1092  ;;  %v1099_v14 = vpop.permute.xlu0 %1098 }
 0x192   : > { %1172 = vst.msk [vmem:[#allocation3 + $0x88] sm:$0xff] %vm1154_vm5, %v1093_v47  ;;  %1175 = vst.msk [vmem:[#allocation3 + $0xa0] sm:$0xff] %vm1154_vm5, %v1099_v14  ;;  %v1792_v47 = vld [vmem:[#allocation2 + $0x15a] sm:$0xff] }
 0x193   : > { %1680 = vrot.lane.b32.xlu1 %v1595_v54, %s2671_s26  ;;  %1263 = vrot.lane.b32.xlu0 %v1771_v9, %s2669_s6 }
 0x195   : > { %v1097_v5 = vpop.permute.xlu1 %1096  ;;  %v1103_v56 = vpop.permute.xlu0 %1102 }
 0x196   : > { %1174 = vst.msk [vmem:[#allocation3 + $0x98] sm:$0xff] %vm1154_vm5, %v1097_v5  ;;  %1177 = vst.msk [vmem:[#allocation3 + $0xb0] sm:$0xff] %vm1154_vm5, %v1103_v56  ;;  %v1392_v56 = vld [vmem:[#allocation2 + $0xb0] sm:$0xff] }
 0x197   : > { %1871 = vrot.lane.b32.xlu1 %v1787_v50, %s2672_s8  ;;  %1841 = vrot.lane.b32.xlu0 %v1772_v53, %s2672_s8 }
 0x199   : > { %v1101_v63 = vpop.permute.xlu1 %1100  ;;  %v1107_v8 = vpop.permute.xlu0 %1106 }
 0x19a   : > { %1176 = vst.msk [vmem:[#allocation3 + $0xa8] sm:$0xff] %vm1154_vm5, %v1101_v63  ;;  %1179 = vst.msk [vmem:[#allocation3 + $0xc0] sm:$0xff] %vm1154_vm5, %v1107_v8  ;;  %v1407_v8 = vld [vmem:[#allocation2 + $0x168] sm:$0xff] }
 0x19b   : > { %1295 = vrot.lane.b32.xlu1 %v1787_v50, %s2669_s6  ;;  %1265 = vrot.lane.b32.xlu0 %v1772_v53, %s2669_s6  ;;  %v1391_v50 = vld [vmem:[#allocation2 + $0xa8] sm:$0xff] }
 0x19d   : > { %v1105_v13 = vpop.permute.xlu1 %1104  ;;  %v1111_v15 = vpop.permute.xlu0 %1110 }
 0x19e   : > { %1178 = vst.msk [vmem:[#allocation3 + $0xb8] sm:$0xff] %vm1154_vm5, %v1105_v13  ;;  %1181 = vst.msk [vmem:[#allocation3 + $0xd0] sm:$0xff] %vm1154_vm5, %v1111_v15  ;;  %v1584_v13 = vld [vmem:[#allocation2 + $0xa9] sm:$0xff] }
 0x19f   : > { %1873 = vrot.lane.b32.xlu1 %v1788_v62, %s2672_s8  ;;  %1457 = vrot.lane.b32.xlu0 %v3012_v58, %s2670_s17 }
 0x1a1   : > { %v1109_v11 = vpop.permute.xlu1 %1108  ;;  %v1115_v0 = vpop.permute.xlu0 %1114 }
 0x1a2   : > { %1180 = vst.msk [vmem:[#allocation3 + $0xc8] sm:$0xff] %vm1154_vm5, %v1109_v11  ;;  %1183 = vst.msk [vmem:[#allocation3 + $0xe0] sm:$0xff] %vm1154_vm5, %v1115_v0  ;;  %v1408_v11 = vld [vmem:[#allocation2 + $0x170] sm:$0xff] }
 0x1a3   : > { %1297 = vrot.lane.b32.xlu1 %v1788_v62, %s2669_s6  ;;  %1459 = vrot.lane.b32.xlu0 %v3026_v61, %s2670_s17  ;;  %v1596_v61 = vld [vmem:[#allocation2 + $0x139] sm:$0xff] }
 0x1a5   : > { %v1113_v1 = vpop.permute.xlu1 %1112  ;;  %v1119_v17 = vpop.permute.xlu0 %1118 }
 0x1a6   : > { %1182 = vst.msk [vmem:[#allocation3 + $0xd8] sm:$0xff] %vm1154_vm5, %v1113_v1  ;;  %1185 = vst.msk [vmem:[#allocation3 + $0xf0] sm:$0xff] %vm1154_vm5, %v1119_v17  ;;  %v1585_v1 = vld [vmem:[#allocation2 + $0xb1] sm:$0xff] }
 0x1a7   : > { %1489 = vrot.lane.b32.xlu1 %v3088_v12, %s2670_s17  ;;  %1650 = vrot.lane.b32.xlu0 %v1580_v19, %s2671_s26  ;;  %v1773_v12 = vld [vmem:[#allocation2 + $0x7a] sm:$0xff] }
 0x1a9   : > { %v1117_v58 = vpop.permute.xlu1 %1116  ;;  %v1252_v21 = vpop.permute.xlu0 %1251 }
 0x1aa   : > { %1184 = vst.msk [vmem:[#allocation3 + $0xe8] sm:$0xff] %vm1154_vm5, %v1117_v58  ;;  %v1600_v58 = vld [vmem:[#allocation2 + $0x169] sm:$0xff] }
 0x1ab   : > { %1491 = vrot.lane.b32.xlu1 %v3112_v18, %s2670_s17  ;;  %1348 = vst.msk [vmem:[#allocation3] sm:$0xff] %vm1347_vm6, %v1252_v21  ;;  %1652 = vrot.lane.b32.xlu0 %v1581_v2, %s2671_s26  ;;  %v1777_v21 = vld [vmem:[#allocation2 + $0xaa] sm:$0xff] }
 0x1ad   : > { %v1121_v3 = vpop.permute.xlu1 %1120  ;;  %v1254_v23 = vpop.permute.xlu0 %1253 }
 0x1ae   : > { %1186 = vst.msk [vmem:[#allocation3 + $0xf8] sm:$0xff] %vm1154_vm5, %v1121_v3  ;;  %v1601_v3 = vld [vmem:[#allocation2 + $0x171] sm:$0xff] }
 0x1af   : > { %1682 = vrot.lane.b32.xlu1 %v1596_v61, %s2671_s26  ;;  %1349 = vst.msk [vmem:[#allocation3 + $0x8] sm:$0xff] %vm1347_vm6, %v1254_v23  ;;  %1843 = vrot.lane.b32.xlu0 %v1773_v12, %s2672_s8 }
 0x1b1   : > { %v1284_v48 = vpop.permute.xlu1 %1283  ;;  %v1446_v18 = vpop.permute.xlu0 %1445 }
 0x1b2   : > { %1364 = vst.msk [vmem:[#allocation3 + $0x80] sm:$0xff] %vm1347_vm6, %v1284_v48 }
 0x1b3   : > { %1684 = vrot.lane.b32.xlu1 %v1597_v4, %s2671_s26  ;;  %1542 = vst.msk [vmem:[#allocation3] sm:$0xff] %vm1541_vm7, %v1446_v18  ;;  %1267 = vrot.lane.b32.xlu0 %v1773_v12, %s2669_s6  ;;  %v1793_v18 = vld [vmem:[#allocation2 + $0x16a] sm:$0xff] }
 0x1b5   : > { %v1286_v36 = vpop.permute.xlu1 %1285  ;;  %v1448_v51 = vpop.permute.xlu0 %1447 }
 0x1b6   : > { %1365 = vst.msk [vmem:[#allocation3 + $0x88] sm:$0xff] %vm1347_vm6, %v1286_v36  ;;  %v1778_v36 = vld [vmem:[#allocation2 + $0xb2] sm:$0xff] }
 0x1b7   : > { %1875 = vrot.lane.b32.xlu1 %v1789_v6, %s2672_s8  ;;  %1543 = vst.msk [vmem:[#allocation3 + $0x8] sm:$0xff] %vm1541_vm7, %v1448_v51  ;;  %1845 = vrot.lane.b32.xlu0 %v1774_v45, %s2672_s8 }
 0x1b9   : > { %v1478_v46 = vpop.permute.xlu1 %1477  ;;  %v1639_v34 = vpop.permute.xlu0 %1638 }
 0x1ba   : > { %1558 = vst.msk [vmem:[#allocation3 + $0x80] sm:$0xff] %vm1541_vm7, %v1478_v46 }
 0x1bb   : > { %1299 = vrot.lane.b32.xlu1 %v1789_v6, %s2669_s6  ;;  %1735 = vst.msk [vmem:[#allocation3] sm:$0xff] %vm1734_vm8, %v1639_v34  ;;  %1269 = vrot.lane.b32.xlu0 %v1774_v45, %s2669_s6 }
 0x1bd   : > { %v1480_v35 = vpop.permute.xlu1 %1479  ;;  %v1641_v57 = vpop.permute.xlu0 %1640 }
 0x1be   : > { %1559 = vst.msk [vmem:[#allocation3 + $0x88] sm:$0xff] %vm1541_vm7, %v1480_v35 }
 0x1bf   : > { %1877 = vrot.lane.b32.xlu1 %v1790_v52, %s2672_s8  ;;  %1736 = vst.msk [vmem:[#allocation3 + $0x8] sm:$0xff] %vm1734_vm8, %v1641_v57  ;;  %1461 = vrot.lane.b32.xlu0 %v1389_v33, %s2670_s17  ;;  %v1393_v33 = vld [vmem:[#allocation2 + $0xc0] sm:$0xff] }
 0x1c1   : > { %v1671_v16 = vpop.permute.xlu1 %1670  ;;  %v1832_v24 = vpop.permute.xlu0 %1831 }
 0x1c2   : > { %1751 = vst.msk [vmem:[#allocation3 + $0x80] sm:$0xff] %vm1734_vm8, %v1671_v16 }
 0x1c3   : > { %1301 = vrot.lane.b32.xlu1 %v1790_v52, %s2669_s6  ;;  %1928 = vst.msk [vmem:[#allocation3] sm:$0xff] %vm1927_vm9, %v1832_v24  ;;  %1463 = vrot.lane.b32.xlu0 %v1390_v7, %s2670_s17  ;;  %v1794_v52 = vld [vmem:[#allocation2 + $0x172] sm:$0xff]  ;;  %v1394_v7 = vld [vmem:[#allocation2 + $0xc8] sm:$0xff] }
 0x1c5   : > { %v1673_v29 = vpop.permute.xlu1 %1672  ;;  %v1256_v22 = vpop.permute.xlu0 %1255 }
 0x1c6   : > { %1752 = vst.msk [vmem:[#allocation3 + $0x88] sm:$0xff] %vm1734_vm8, %v1673_v29 }
 0x1c7   : > { %1493 = vrot.lane.b32.xlu1 %v1405_v20, %s2670_s17  ;;  %1350 = vst.msk [vmem:[#allocation3 + $0x10] sm:$0xff] %vm1347_vm6, %v1256_v22  ;;  %1654 = vrot.lane.b32.xlu0 %v1582_v10, %s2671_s26  ;;  %v1409_v20 = vld [vmem:[#allocation2 + $0x180] sm:$0xff] }
 0x1c8   : > { %v1586_v10 = vld [vmem:[#allocation2 + $0xc1] sm:$0xff] }
 0x1c9   : > { %v1864_v28 = vpop.permute.xlu1 %1863  ;;  %v1834_v37 = vpop.permute.xlu0 %1833 }
 0x1ca   : > { %1944 = vst.msk [vmem:[#allocation3 + $0x80] sm:$0xff] %vm1927_vm9, %v1864_v28  ;;  %v1960_v26 = vld [vmem:[#allocation3] sm:$0xff]  ;;  %1929 = vst.msk [vmem:[#allocation3 + $0x8] sm:$0xff] %vm1927_vm9, %v1834_v37 }
 0x1cb   : > { %1495 = vrot.lane.b32.xlu1 %v1406_v60, %s2670_s17  ;;  %2559 = vmatprep.mubr.f32.mxu0 %v1960_v26  ;;  %v1410_v60 = vld [vmem:[#allocation2 + $0x188] sm:$0xff] }
 0x1cc   : > { %1656 = vrot.lane.b32.xlu0 %v1583_v25, %s2671_s26  ;;  %v1587_v25 = vld [vmem:[#allocation2 + $0xc9] sm:$0xff] }
 0x1cd   : > { %v1288_v30 = vpop.permute.xlu1 %1287  ;;  %v1258_v32 = vpop.permute.xlu0 %1257 }
 0x1ce   : > { %1366 = vst.msk [vmem:[#allocation3 + $0x90] sm:$0xff] %vm1347_vm6, %v1288_v30  ;;  %1351 = vst.msk [vmem:[#allocation3 + $0x18] sm:$0xff] %vm1347_vm6, %v1258_v32 }
 0x1cf   : > { %1686 = vrot.lane.b32.xlu1 %v1598_v27, %s2671_s26  ;;  %v1602_v27 = vld [vmem:[#allocation2 + $0x181] sm:$0xff] }
 0x1d0   : > { %1847 = vrot.lane.b32.xlu0 %v1775_v31, %s2672_s8 }
 0x1d1   : > { %v1866_v40 = vpop.permute.xlu1 %1865  ;;  %v1976_v41 = vld [vmem:[#allocation3 + $0x80] sm:$0xff]  ;;  %v1450_v49 = vpop.permute.xlu0 %1449  ;;  %v1961_v55 = vld [vmem:[#allocation3 + $0x8] sm:$0xff] }
 0x1d2   : > { %1945 = vst.msk [vmem:[#allocation3 + $0x88] sm:$0xff] %vm1927_vm9, %v1866_v40  ;;  %2583 = vmatprep.mubr.f32.mxu1 %v1976_v41  ;;  %2560 = vmatmul.mubr.f32.vlgmr.msra.gmra.mxu0 %v1961_v55 }
 0x1d3   : > { %1688 = vrot.lane.b32.xlu1 %v1599_v38, %s2671_s26  ;;  %1544 = vst.msk [vmem:[#allocation3 + $0x10] sm:$0xff] %vm1541_vm7, %v1450_v49  ;;  %v1603_v38 = vld [vmem:[#allocation2 + $0x189] sm:$0xff] }
 0x1d4   : > { %1271 = vrot.lane.b32.xlu0 %v1775_v31, %s2669_s6  ;;  %v1779_v31 = vld [vmem:[#allocation2 + $0xc2] sm:$0xff] }
 0x1d5   : > { %v1290_v42 = vpop.permute.xlu1 %1289  ;;  %v1452_v43 = vpop.permute.xlu0 %1451 }
 0x1d6   : > { %1367 = vst.msk [vmem:[#allocation3 + $0x98] sm:$0xff] %vm1347_vm6, %v1290_v42 }
 0x1d7   : > { %1879 = vrot.lane.b32.xlu1 %v1791_v39, %s2672_s8  ;;  %1545 = vst.msk [vmem:[#allocation3 + $0x18] sm:$0xff] %vm1541_vm7, %v1452_v43 }
 0x1d8   : > { %1849 = vrot.lane.b32.xlu0 %v1776_v59, %s2672_s8 }
 0x1d9   : > { %v1482_v9 = vpop.permute.xlu1 %1481  ;;  %v1977_v44 = vld [vmem:[#allocation3 + $0x88] sm:$0xff]  ;;  %v1643_v54 = vpop.permute.xlu0 %1642 }
 0x1da   : > { %1560 = vst.msk [vmem:[#allocation3 + $0x90] sm:$0xff] %vm1541_vm7, %v1482_v9  ;;  %2584 = vmatmul.mubr.f32.vlgmr.msra.gmra.mxu1 %v1977_v44 }
 0x1db   : > { %1303 = vrot.lane.b32.xlu1 %v1791_v39, %s2669_s6  ;;  %1737 = vst.msk [vmem:[#allocation3 + $0x10] sm:$0xff] %vm1734_vm8, %v1643_v54  ;;  %v1795_v39 = vld [vmem:[#allocation2 + $0x182] sm:$0xff] }
 0x1dc   : > { %1273 = vrot.lane.b32.xlu0 %v1776_v59, %s2669_s6  ;;  %v1780_v59 = vld [vmem:[#allocation2 + $0xca] sm:$0xff] }
 0x1dd   : > { %v1484_v14 = vpop.permute.xlu1 %1483  ;;  %v1645_v5 = vpop.permute.xlu0 %1644 }
 0x1de   : > { %1561 = vst.msk [vmem:[#allocation3 + $0x98] sm:$0xff] %vm1541_vm7, %v1484_v14 }
 0x1df   : > { %1881 = vrot.lane.b32.xlu1 %v1792_v47, %s2672_s8  ;;  %1738 = vst.msk [vmem:[#allocation3 + $0x18] sm:$0xff] %vm1734_vm8, %v1645_v5 }
 0x1e0   : > { %1465 = vrot.lane.b32.xlu0 %v1391_v50, %s2670_s17  ;;  %v1395_v50 = vld [vmem:[#allocation2 + $0xd8] sm:$0xff] }
 0x1e1   : > { %v1675_v53 = vpop.permute.xlu1 %1674  ;;  %v1836_v63 = vpop.permute.xlu0 %1835 }
 0x1e2   : > { %1753 = vst.msk [vmem:[#allocation3 + $0x90] sm:$0xff] %vm1734_vm8, %v1675_v53 }
 0x1e3   : > { %1305 = vrot.lane.b32.xlu1 %v1792_v47, %s2669_s6  ;;  %1930 = vst.msk [vmem:[#allocation3 + $0x10] sm:$0xff] %vm1927_vm9, %v1836_v63  ;;  %v1796_v47 = vld [vmem:[#allocation2 + $0x18a] sm:$0xff] }
 0x1e4   : > { %1467 = vrot.lane.b32.xlu0 %v1392_v56, %s2670_s17  ;;  %v1396_v56 = vld [vmem:[#allocation2 + $0xe0] sm:$0xff] }
 0x1e5   : > { %v1677_v62 = vpop.permute.xlu1 %1676  ;;  %v1260_v15 = vpop.permute.xlu0 %1259 }
 0x1e6   : > { %1754 = vst.msk [vmem:[#allocation3 + $0x98] sm:$0xff] %vm1734_vm8, %v1677_v62 }
 0x1e7   : > { %1497 = vrot.lane.b32.xlu1 %v1407_v8, %s2670_s17  ;;  %1352 = vst.msk [vmem:[#allocation3 + $0x20] sm:$0xff] %vm1347_vm6, %v1260_v15  ;;  %v1411_v8 = vld [vmem:[#allocation2 + $0x198] sm:$0xff] }
 0x1e8   : > { %1658 = vrot.lane.b32.xlu0 %v1584_v13, %s2671_s26  ;;  %v1588_v13 = vld [vmem:[#allocation2 + $0xd9] sm:$0xff] }
 0x1e9   : > { %v1868_v0 = vpop.permute.xlu1 %1867  ;;  %v1838_v19 = vpop.permute.xlu0 %1837 }
 0x1ea   : > { %1946 = vst.msk [vmem:[#allocation3 + $0x90] sm:$0xff] %vm1927_vm9, %v1868_v0  ;;  %v1962_v17 = vld [vmem:[#allocation3 + $0x10] sm:$0xff]  ;;  %1931 = vst.msk [vmem:[#allocation3 + $0x18] sm:$0xff] %vm1927_vm9, %v1838_v19 }
 0x1eb   : > { %1499 = vrot.lane.b32.xlu1 %v1408_v11, %s2670_s17  ;;  %2562 = vmatprep.mubr.f32.mxu0 %v1962_v17  ;;  %v1412_v11 = vld [vmem:[#allocation2 + $0x1a0] sm:$0xff] }
 0x1ec   : > { %1660 = vrot.lane.b32.xlu0 %v1585_v1, %s2671_s26  ;;  %v1589_v1 = vld [vmem:[#allocation2 + $0xe1] sm:$0xff] }
 0x1ed   : > { %v1292_v2 = vpop.permute.xlu1 %1291  ;;  %v1262_v61 = vpop.permute.xlu0 %1261 }
 0x1ee   : > { %1368 = vst.msk [vmem:[#allocation3 + $0xa0] sm:$0xff] %vm1347_vm6, %v1292_v2  ;;  %1353 = vst.msk [vmem:[#allocation3 + $0x28] sm:$0xff] %vm1347_vm6, %v1262_v61 }
 0x1ef   : > { %1690 = vrot.lane.b32.xlu1 %v1600_v58, %s2671_s26  ;;  %v1604_v58 = vld [vmem:[#allocation2 + $0x199] sm:$0xff] }
 0x1f0   : > { %1851 = vrot.lane.b32.xlu0 %v1777_v21, %s2672_s8 }
 0x1f1   : > { %v1870_v12 = vpop.permute.xlu1 %1869  ;;  %v1978_v23 = vld [vmem:[#allocation3 + $0x90] sm:$0xff]  ;;  %v1454_v4 = vpop.permute.xlu0 %1453  ;;  %v1963_v48 = vld [vmem:[#allocation3 + $0x18] sm:$0xff] }
 0x1f2   : > { %1947 = vst.msk [vmem:[#allocation3 + $0x98] sm:$0xff] %vm1927_vm9, %v1870_v12  ;;  %2586 = vmatprep.mubr.f32.mxu1 %v1978_v23  ;;  %2563 = vmatmul.mubr.f32.gmra.mxu0 %v1963_v48 }
 0x1f3   : > { %1692 = vrot.lane.b32.xlu1 %v1601_v3, %s2671_s26  ;;  %1546 = vst.msk [vmem:[#allocation3 + $0x20] sm:$0xff] %vm1541_vm7, %v1454_v4  ;;  %v1605_v3 = vld [vmem:[#allocation2 + $0x1a1] sm:$0xff] }
 0x1f4   : > { %1275 = vrot.lane.b32.xlu0 %v1777_v21, %s2669_s6  ;;  %v1781_v21 = vld [vmem:[#allocation2 + $0xda] sm:$0xff]  ;;  %v1782_v4 = vld [vmem:[#allocation2 + $0xe2] sm:$0xff] }
 0x1f5   : > { %v1294_v6 = vpop.permute.xlu1 %1293  ;;  %v1456_v45 = vpop.permute.xlu0 %1455 }
 0x1f6   : > { %1369 = vst.msk [vmem:[#allocation3 + $0xa8] sm:$0xff] %vm1347_vm6, %v1294_v6  ;;  %v1797_v6 = vld [vmem:[#allocation2 + $0x19a] sm:$0xff] }
 0x1f7   : > { %1883 = vrot.lane.b32.xlu1 %v1793_v18, %s2672_s8  ;;  %1547 = vst.msk [vmem:[#allocation3 + $0x28] sm:$0xff] %vm1541_vm7, %v1456_v45 }
 0x1f8   : > { %1853 = vrot.lane.b32.xlu0 %v1778_v36, %s2672_s8 }
 0x1f9   : > { %v1486_v51 = vpop.permute.xlu1 %1485  ;;  %v1979_v46 = vld [vmem:[#allocation3 + $0x98] sm:$0xff]  ;;  %v1647_v34 = vpop.permute.xlu0 %1646 }
 0x1fa   : > { %1562 = vst.msk [vmem:[#allocation3 + $0xa0] sm:$0xff] %vm1541_vm7, %v1486_v51  ;;  %2587 = vmatmul.mubr.f32.gmra.mxu1 %v1979_v46  ;;  %v1798_v51 = vld [vmem:[#allocation2 + $0x1a2] sm:$0xff] }
 0x1fb   : > { %1307 = vrot.lane.b32.xlu1 %v1793_v18, %s2669_s6  ;;  %1739 = vst.msk [vmem:[#allocation3 + $0x20] sm:$0xff] %vm1734_vm8, %v1647_v34 }
 0x1fc   : > { %1277 = vrot.lane.b32.xlu0 %v1778_v36, %s2669_s6 }
 0x1fd   : > { %v1488_v35 = vpop.permute.xlu1 %1487  ;;  %v1649_v57 = vpop.permute.xlu0 %1648 }
 0x1fe   : > { %1563 = vst.msk [vmem:[#allocation3 + $0xa8] sm:$0xff] %vm1541_vm7, %v1488_v35 }
 0x1ff   : > { %1885 = vrot.lane.b32.xlu1 %v1794_v52, %s2672_s8  ;;  %1740 = vst.msk [vmem:[#allocation3 + $0x28] sm:$0xff] %vm1734_vm8, %v1649_v57 }
 0x200   : > { %1469 = vrot.lane.b32.xlu0 %v1393_v33, %s2670_s17 }
 0x201   : > { %v1679_v16 = vpop.permute.xlu1 %1678  ;;  %v1840_v24 = vpop.permute.xlu0 %1839 }
 0x202   : > { %1755 = vst.msk [vmem:[#allocation3 + $0xa0] sm:$0xff] %vm1734_vm8, %v1679_v16 }
 0x203   : > { %1309 = vrot.lane.b32.xlu1 %v1794_v52, %s2669_s6  ;;  %1932 = vst.msk [vmem:[#allocation3 + $0x20] sm:$0xff] %vm1927_vm9, %v1840_v24 }
 0x204   : > { %1471 = vrot.lane.b32.xlu0 %v1394_v7, %s2670_s17 }
 0x205   : > { %v1681_v29 = vpop.permute.xlu1 %1680  ;;  %v1264_v22 = vpop.permute.xlu0 %1263 }
 0x206   : > { %1756 = vst.msk [vmem:[#allocation3 + $0xa8] sm:$0xff] %vm1734_vm8, %v1681_v29 }
 0x207   : > { %1501 = vrot.lane.b32.xlu1 %v1409_v20, %s2670_s17  ;;  %1354 = vst.msk [vmem:[#allocation3 + $0x30] sm:$0xff] %vm1347_vm6, %v1264_v22 }
 0x208   : > { %1662 = vrot.lane.b32.xlu0 %v1586_v10, %s2671_s26 }
 0x209   : > { %v1872_v28 = vpop.permute.xlu1 %1871  ;;  %v1842_v37 = vpop.permute.xlu0 %1841 }
 0x20a   : > { %1948 = vst.msk [vmem:[#allocation3 + $0xa0] sm:$0xff] %vm1927_vm9, %v1872_v28  ;;  %v1964_v26 = vld [vmem:[#allocation3 + $0x20] sm:$0xff]  ;;  %1933 = vst.msk [vmem:[#allocation3 + $0x28] sm:$0xff] %vm1927_vm9, %v1842_v37 }
 0x20b   : > { %1503 = vrot.lane.b32.xlu1 %v1410_v60, %s2670_s17  ;;  %2565 = vmatprep.mubr.f32.mxu0 %v1964_v26 }
 0x20c   : > { %1664 = vrot.lane.b32.xlu0 %v1587_v25, %s2671_s26 }
 0x20d   : > { %v1296_v30 = vpop.permute.xlu1 %1295  ;;  %v1266_v32 = vpop.permute.xlu0 %1265 }
 0x20e   : > { %1370 = vst.msk [vmem:[#allocation3 + $0xb0] sm:$0xff] %vm1347_vm6, %v1296_v30  ;;  %1355 = vst.msk [vmem:[#allocation3 + $0x38] sm:$0xff] %vm1347_vm6, %v1266_v32 }
 0x20f   : > { %1694 = vrot.lane.b32.xlu1 %v1602_v27, %s2671_s26 }
 0x210   : > { %1855 = vrot.lane.b32.xlu0 %v1779_v31, %s2672_s8 }
 0x211   : > { %v1874_v40 = vpop.permute.xlu1 %1873  ;;  %v1980_v41 = vld [vmem:[#allocation3 + $0xa0] sm:$0xff]  ;;  %v1458_v49 = vpop.permute.xlu0 %1457  ;;  %v1965_v55 = vld [vmem:[#allocation3 + $0x28] sm:$0xff] }
 0x212   : > { %1949 = vst.msk [vmem:[#allocation3 + $0xa8] sm:$0xff] %vm1927_vm9, %v1874_v40  ;;  %2589 = vmatprep.mubr.f32.mxu1 %v1980_v41  ;;  %2566 = vmatmul.mubr.f32.gmra.mxu0 %v1965_v55 }
 0x213   : > { %1696 = vrot.lane.b32.xlu1 %v1603_v38, %s2671_s26  ;;  %1548 = vst.msk [vmem:[#allocation3 + $0x30] sm:$0xff] %vm1541_vm7, %v1458_v49 }
 0x214   : > { %1279 = vrot.lane.b32.xlu0 %v1779_v31, %s2669_s6 }
 0x215   : > { %v1298_v42 = vpop.permute.xlu1 %1297  ;;  %v1460_v43 = vpop.permute.xlu0 %1459 }
 0x216   : > { %1371 = vst.msk [vmem:[#allocation3 + $0xb8] sm:$0xff] %vm1347_vm6, %v1298_v42 }
 0x217   : > { %1887 = vrot.lane.b32.xlu1 %v1795_v39, %s2672_s8  ;;  %1549 = vst.msk [vmem:[#allocation3 + $0x38] sm:$0xff] %vm1541_vm7, %v1460_v43 }
 0x218   : > { %1857 = vrot.lane.b32.xlu0 %v1780_v59, %s2672_s8 }
 0x219   : > { %v1490_v9 = vpop.permute.xlu1 %1489  ;;  %v1981_v44 = vld [vmem:[#allocation3 + $0xa8] sm:$0xff]  ;;  %v1651_v54 = vpop.permute.xlu0 %1650 }
 0x21a   : > { %1564 = vst.msk [vmem:[#allocation3 + $0xb0] sm:$0xff] %vm1541_vm7, %v1490_v9  ;;  %2590 = vmatmul.mubr.f32.gmra.mxu1 %v1981_v44 }
 0x21b   : > { %1311 = vrot.lane.b32.xlu1 %v1795_v39, %s2669_s6  ;;  %1741 = vst.msk [vmem:[#allocation3 + $0x30] sm:$0xff] %vm1734_vm8, %v1651_v54 }
 0x21c   : > { %1281 = vrot.lane.b32.xlu0 %v1780_v59, %s2669_s6 }
 0x21d   : > { %v1492_v14 = vpop.permute.xlu1 %1491  ;;  %v1653_v5 = vpop.permute.xlu0 %1652 }
 0x21e   : > { %1565 = vst.msk [vmem:[#allocation3 + $0xb8] sm:$0xff] %vm1541_vm7, %v1492_v14 }
 0x21f   : > { %1889 = vrot.lane.b32.xlu1 %v1796_v47, %s2672_s8  ;;  %1742 = vst.msk [vmem:[#allocation3 + $0x38] sm:$0xff] %vm1734_vm8, %v1653_v5 }
 0x220   : > { %1473 = vrot.lane.b32.xlu0 %v1395_v50, %s2670_s17 }
 0x221   : > { %v1683_v53 = vpop.permute.xlu1 %1682  ;;  %v1844_v63 = vpop.permute.xlu0 %1843 }
 0x222   : > { %1757 = vst.msk [vmem:[#allocation3 + $0xb0] sm:$0xff] %vm1734_vm8, %v1683_v53 }
 0x223   : > { %1313 = vrot.lane.b32.xlu1 %v1796_v47, %s2669_s6  ;;  %1934 = vst.msk [vmem:[#allocation3 + $0x30] sm:$0xff] %vm1927_vm9, %v1844_v63 }
 0x224   : > { %1475 = vrot.lane.b32.xlu0 %v1396_v56, %s2670_s17 }
 0x225   : > { %v1685_v62 = vpop.permute.xlu1 %1684  ;;  %v1268_v15 = vpop.permute.xlu0 %1267 }
 0x226   : > { %1758 = vst.msk [vmem:[#allocation3 + $0xb8] sm:$0xff] %vm1734_vm8, %v1685_v62 }
 0x227   : > { %1505 = vrot.lane.b32.xlu1 %v1411_v8, %s2670_s17  ;;  %1356 = vst.msk [vmem:[#allocation3 + $0x40] sm:$0xff] %vm1347_vm6, %v1268_v15 }
 0x228   : > { %1666 = vrot.lane.b32.xlu0 %v1588_v13, %s2671_s26 }
 0x229   : > { %v1876_v0 = vpop.permute.xlu1 %1875  ;;  %v1846_v19 = vpop.permute.xlu0 %1845 }
 0x22a   : > { %1950 = vst.msk [vmem:[#allocation3 + $0xb0] sm:$0xff] %vm1927_vm9, %v1876_v0  ;;  %v1966_v17 = vld [vmem:[#allocation3 + $0x30] sm:$0xff]  ;;  %1935 = vst.msk [vmem:[#allocation3 + $0x38] sm:$0xff] %vm1927_vm9, %v1846_v19 }
 0x22b   : > { %1507 = vrot.lane.b32.xlu1 %v1412_v11, %s2670_s17  ;;  %2568 = vmatprep.mubr.f32.mxu0 %v1966_v17 }
 0x22c   : > { %1668 = vrot.lane.b32.xlu0 %v1589_v1, %s2671_s26 }
 0x22d   : > { %v1300_v2 = vpop.permute.xlu1 %1299  ;;  %v1270_v61 = vpop.permute.xlu0 %1269 }
 0x22e   : > { %1372 = vst.msk [vmem:[#allocation3 + $0xc0] sm:$0xff] %vm1347_vm6, %v1300_v2  ;;  %1357 = vst.msk [vmem:[#allocation3 + $0x48] sm:$0xff] %vm1347_vm6, %v1270_v61 }
 0x22f   : > { %1698 = vrot.lane.b32.xlu1 %v1604_v58, %s2671_s26 }
 0x230   : > { %1859 = vrot.lane.b32.xlu0 %v1781_v21, %s2672_s8 }
 0x231   : > { %v1878_v12 = vpop.permute.xlu1 %1877  ;;  %v1982_v23 = vld [vmem:[#allocation3 + $0xb0] sm:$0xff]  ;;  %v1462_v48 = vpop.permute.xlu0 %1461  ;;  %v1967_v18 = vld [vmem:[#allocation3 + $0x38] sm:$0xff] }
 0x232   : > { %1951 = vst.msk [vmem:[#allocation3 + $0xb8] sm:$0xff] %vm1927_vm9, %v1878_v12  ;;  %2592 = vmatprep.mubr.f32.mxu1 %v1982_v23  ;;  %2569 = vmatmul.mubr.f32.gmra.mxu0 %v1967_v18  ;;  %v3819_v18 = vld [vmem:[%s3911_s2] ss:$0 sm:$0xff] }
 0x233   : > { %1700 = vrot.lane.b32.xlu1 %v1605_v3, %s2671_s26  ;;  %1550 = vst.msk [vmem:[#allocation3 + $0x40] sm:$0xff] %vm1541_vm7, %v1462_v48 }
 0x234   : > { %1861 = vrot.lane.b32.xlu0 %v1782_v4, %s2672_s8 }
 0x235   : > { %v1302_v36 = vpop.permute.xlu1 %1301  ;;  %v1464_v45 = vpop.permute.xlu0 %1463 }
 0x236   : > { %1373 = vst.msk [vmem:[#allocation3 + $0xc8] sm:$0xff] %vm1347_vm6, %v1302_v36 }
 0x237   : > { %1891 = vrot.lane.b32.xlu1 %v1797_v6, %s2672_s8  ;;  %1551 = vst.msk [vmem:[#allocation3 + $0x48] sm:$0xff] %vm1541_vm7, %v1464_v45  ;;  %v3825_v45 = vld [vmem:[%s3912_s3] ss:$0 sm:$0xff] }
 0x239   : > { %v1494_v46 = vpop.permute.xlu1 %1493  ;;  %v1983_v34 = vld [vmem:[#allocation3 + $0xb8] sm:$0xff]  ;;  %v1655_v52 = vpop.permute.xlu0 %1654 }
 0x23a   : > { %1566 = vst.msk [vmem:[#allocation3 + $0xc0] sm:$0xff] %vm1541_vm7, %v1494_v46  ;;  %2593 = vmatmul.mubr.f32.gmra.mxu1 %v1983_v34 }
 0x23b   : > { %1893 = vrot.lane.b32.xlu1 %v1798_v51, %s2672_s8  ;;  %1743 = vst.msk [vmem:[#allocation3 + $0x40] sm:$0xff] %vm1734_vm8, %v1655_v52 }
 0x23d   : > { %v1496_v35 = vpop.permute.xlu1 %1495 }
 0x23e   : > { %1567 = vst.msk [vmem:[#allocation3 + $0xc8] sm:$0xff] %vm1541_vm7, %v1496_v35  ;;  %v1657_v33 = vpop.permute.xlu0 %1656 }
 0x23f   : > { %1744 = vst.msk [vmem:[#allocation3 + $0x48] sm:$0xff] %vm1734_vm8, %v1657_v33 }
 0x241   : > { %v1687_v57 = vpop.permute.xlu1 %1686 }
 0x242   : > { %1759 = vst.msk [vmem:[#allocation3 + $0xc0] sm:$0xff] %vm1734_vm8, %v1687_v57  ;;  %v1848_v16 = vpop.permute.xlu0 %1847 }
 0x243   : > { %1936 = vst.msk [vmem:[#allocation3 + $0x40] sm:$0xff] %vm1927_vm9, %v1848_v16 }
 0x245   : > { %v1689_v7 = vpop.permute.xlu1 %1688 }
 0x246   : > { %1760 = vst.msk [vmem:[#allocation3 + $0xc8] sm:$0xff] %vm1734_vm8, %v1689_v7  ;;  %v1272_v24 = vpop.permute.xlu0 %1271 }
 0x247   : > { %1358 = vst.msk [vmem:[#allocation3 + $0x50] sm:$0xff] %vm1347_vm6, %v1272_v24 }
 0x249   : > { %v1880_v20 = vpop.permute.xlu1 %1879 }
 0x24a   : > { %1952 = vst.msk [vmem:[#allocation3 + $0xc0] sm:$0xff] %vm1927_vm9, %v1880_v20  ;;  %v1850_v29 = vpop.permute.xlu0 %1849  ;;  %v1968_v10 = vld [vmem:[#allocation3 + $0x40] sm:$0xff] }
 0x24b   : > { %1937 = vst.msk [vmem:[#allocation3 + $0x48] sm:$0xff] %vm1927_vm9, %v1850_v29  ;;  %2571 = vmatprep.mubr.f32.mxu0 %v1968_v10 }
 0x24d   : > { %v1304_v22 = vpop.permute.xlu1 %1303 }
 0x24e   : > { %1374 = vst.msk [vmem:[#allocation3 + $0xd0] sm:$0xff] %vm1347_vm6, %v1304_v22  ;;  %v1274_v60 = vpop.permute.xlu0 %1273 }
 0x24f   : > { %1359 = vst.msk [vmem:[#allocation3 + $0x58] sm:$0xff] %vm1347_vm6, %v1274_v60 }
 0x251   : > { %v1882_v28 = vpop.permute.xlu1 %1881  ;;  %v1984_v25 = vld [vmem:[#allocation3 + $0xc0] sm:$0xff] }
 0x252   : > { %1953 = vst.msk [vmem:[#allocation3 + $0xc8] sm:$0xff] %vm1927_vm9, %v1882_v28  ;;  %2595 = vmatprep.mubr.f32.mxu1 %v1984_v25  ;;  %v1466_v37 = vpop.permute.xlu0 %1465  ;;  %v1969_v26 = vld [vmem:[#allocation3 + $0x48] sm:$0xff] }
 0x253   : > { %1552 = vst.msk [vmem:[#allocation3 + $0x50] sm:$0xff] %vm1541_vm7, %v1466_v37  ;;  %2572 = vmatmul.mubr.f32.gmra.mxu0 %v1969_v26 }
 0x255   : > { %v1306_v27 = vpop.permute.xlu1 %1305 }
 0x256   : > { %1375 = vst.msk [vmem:[#allocation3 + $0xd8] sm:$0xff] %vm1347_vm6, %v1306_v27  ;;  %v1468_v30 = vpop.permute.xlu0 %1467 }
 0x257   : > { %1553 = vst.msk [vmem:[#allocation3 + $0x58] sm:$0xff] %vm1541_vm7, %v1468_v30 }
 0x259   : > { %v1498_v31 = vpop.permute.xlu1 %1497  ;;  %v1985_v32 = vld [vmem:[#allocation3 + $0xc8] sm:$0xff] }
 0x25a   : > { %1568 = vst.msk [vmem:[#allocation3 + $0xd0] sm:$0xff] %vm1541_vm7, %v1498_v31  ;;  %2596 = vmatmul.mubr.f32.gmra.mxu1 %v1985_v32  ;;  %v1659_v38 = vpop.permute.xlu0 %1658 }
 0x25b   : > { %1745 = vst.msk [vmem:[#allocation3 + $0x50] sm:$0xff] %vm1734_vm8, %v1659_v38 }
 0x25d   : > { %v1500_v40 = vpop.permute.xlu1 %1499 }
 0x25e   : > { %1569 = vst.msk [vmem:[#allocation3 + $0xd8] sm:$0xff] %vm1541_vm7, %v1500_v40  ;;  %v1661_v41 = vpop.permute.xlu0 %1660 }
 0x25f   : > { %1746 = vst.msk [vmem:[#allocation3 + $0x58] sm:$0xff] %vm1734_vm8, %v1661_v41 }
 0x261   : > { %v1691_v49 = vpop.permute.xlu1 %1690 }
 0x262   : > { %1761 = vst.msk [vmem:[#allocation3 + $0xd0] sm:$0xff] %vm1734_vm8, %v1691_v49  ;;  %v1852_v55 = vpop.permute.xlu0 %1851 }
 0x263   : > { %1938 = vst.msk [vmem:[#allocation3 + $0x50] sm:$0xff] %vm1927_vm9, %v1852_v55 }
 0x265   : > { %v1693_v39 = vpop.permute.xlu1 %1692 }
 0x266   : > { %1762 = vst.msk [vmem:[#allocation3 + $0xd8] sm:$0xff] %vm1734_vm8, %v1693_v39  ;;  %v1276_v42 = vpop.permute.xlu0 %1275 }
 0x267   : > { %1360 = vst.msk [vmem:[#allocation3 + $0x60] sm:$0xff] %vm1347_vm6, %v1276_v42 }
 0x269   : > { %v1884_v59 = vpop.permute.xlu1 %1883 }
 0x26a   : > { %1954 = vst.msk [vmem:[#allocation3 + $0xd0] sm:$0xff] %vm1927_vm9, %v1884_v59  ;;  %v1854_v43 = vpop.permute.xlu0 %1853  ;;  %v1970_v9 = vld [vmem:[#allocation3 + $0x50] sm:$0xff] }
 0x26b   : > { %1939 = vst.msk [vmem:[#allocation3 + $0x58] sm:$0xff] %vm1927_vm9, %v1854_v43  ;;  %2574 = vmatprep.mubr.f32.mxu0 %v1970_v9 }
 0x26d   : > { %v1308_v44 = vpop.permute.xlu1 %1307 }
 0x26e   : > { %1376 = vst.msk [vmem:[#allocation3 + $0xe0] sm:$0xff] %vm1347_vm6, %v1308_v44  ;;  %v1278_v54 = vpop.permute.xlu0 %1277 }
 0x26f   : > { %1361 = vst.msk [vmem:[#allocation3 + $0x68] sm:$0xff] %vm1347_vm6, %v1278_v54 }
 0x271   : > { %v1886_v47 = vpop.permute.xlu1 %1885  ;;  %v1986_v14 = vld [vmem:[#allocation3 + $0xd0] sm:$0xff] }
 0x272   : > { %1955 = vst.msk [vmem:[#allocation3 + $0xd8] sm:$0xff] %vm1927_vm9, %v1886_v47  ;;  %2598 = vmatprep.mubr.f32.mxu1 %v1986_v14  ;;  %v1470_v50 = vpop.permute.xlu0 %1469  ;;  %v1971_v5 = vld [vmem:[#allocation3 + $0x58] sm:$0xff] }
 0x273   : > { %1554 = vst.msk [vmem:[#allocation3 + $0x60] sm:$0xff] %vm1541_vm7, %v1470_v50  ;;  %2575 = vmatmul.mubr.f32.gmra.mxu0 %v1971_v5 }
 0x275   : > { %v1310_v53 = vpop.permute.xlu1 %1309 }
 0x276   : > { %1377 = vst.msk [vmem:[#allocation3 + $0xe8] sm:$0xff] %vm1347_vm6, %v1310_v53  ;;  %v1472_v56 = vpop.permute.xlu0 %1471 }
 0x277   : > { %1555 = vst.msk [vmem:[#allocation3 + $0x68] sm:$0xff] %vm1541_vm7, %v1472_v56 }
 0x279   : > { %v1502_v63 = vpop.permute.xlu1 %1501  ;;  %v1987_v8 = vld [vmem:[#allocation3 + $0xd8] sm:$0xff] }
 0x27a   : > { %1570 = vst.msk [vmem:[#allocation3 + $0xe0] sm:$0xff] %vm1541_vm7, %v1502_v63  ;;  %2599 = vmatmul.mubr.f32.gmra.mxu1 %v1987_v8  ;;  %v1663_v62 = vpop.permute.xlu0 %1662 }
 0x27b   : > { %1747 = vst.msk [vmem:[#allocation3 + $0x60] sm:$0xff] %vm1734_vm8, %v1663_v62 }
 0x27d   : > { %v1504_v13 = vpop.permute.xlu1 %1503 }
 0x27e   : > { %1571 = vst.msk [vmem:[#allocation3 + $0xe8] sm:$0xff] %vm1541_vm7, %v1504_v13  ;;  %v1665_v15 = vpop.permute.xlu0 %1664 }
 0x27f   : > { %1748 = vst.msk [vmem:[#allocation3 + $0x68] sm:$0xff] %vm1734_vm8, %v1665_v15 }
 0x281   : > { %v1695_v11 = vpop.permute.xlu1 %1694 }
 0x282   : > { %1763 = vst.msk [vmem:[#allocation3 + $0xe0] sm:$0xff] %vm1734_vm8, %v1695_v11  ;;  %v1856_v0 = vpop.permute.xlu0 %1855 }
 0x283   : > { %1940 = vst.msk [vmem:[#allocation3 + $0x60] sm:$0xff] %vm1927_vm9, %v1856_v0 }
 0x285   : > { %v1697_v1 = vpop.permute.xlu1 %1696 }
 0x286   : > { %1764 = vst.msk [vmem:[#allocation3 + $0xe8] sm:$0xff] %vm1734_vm8, %v1697_v1  ;;  %v1280_v19 = vpop.permute.xlu0 %1279 }
 0x287   : > { %1362 = vst.msk [vmem:[#allocation3 + $0x70] sm:$0xff] %vm1347_vm6, %v1280_v19 }
 0x289   : > { %v1888_v17 = vpop.permute.xlu1 %1887 }
 0x28a   : > { %1956 = vst.msk [vmem:[#allocation3 + $0xe0] sm:$0xff] %vm1927_vm9, %v1888_v17  ;;  %v1858_v58 = vpop.permute.xlu0 %1857  ;;  %v1972_v2 = vld [vmem:[#allocation3 + $0x60] sm:$0xff] }
 0x28b   : > { %1941 = vst.msk [vmem:[#allocation3 + $0x68] sm:$0xff] %vm1927_vm9, %v1858_v58  ;;  %2577 = vmatprep.mubr.f32.mxu0 %v1972_v2 }
 0x28d   : > { %v1312_v21 = vpop.permute.xlu1 %1311 }
 0x28e   : > { %1378 = vst.msk [vmem:[#allocation3 + $0xf0] sm:$0xff] %vm1347_vm6, %v1312_v21  ;;  %v1282_v61 = vpop.permute.xlu0 %1281 }
 0x28f   : > { %1363 = vst.msk [vmem:[#allocation3 + $0x78] sm:$0xff] %vm1347_vm6, %v1282_v61 }
 0x291   : > { %v1890_v3 = vpop.permute.xlu1 %1889  ;;  %v1988_v12 = vld [vmem:[#allocation3 + $0xe0] sm:$0xff] }
 0x292   : > { %1957 = vst.msk [vmem:[#allocation3 + $0xe8] sm:$0xff] %vm1927_vm9, %v1890_v3  ;;  %2601 = vmatprep.mubr.f32.mxu1 %v1988_v12  ;;  %v1474_v23 = vpop.permute.xlu0 %1473  ;;  %v1973_v4 = vld [vmem:[#allocation3 + $0x68] sm:$0xff]  ;;  %v2561_v48 = vpop.f32.mrf.mxu0 }
 0x293   : > { %1556 = vst.msk [vmem:[#allocation3 + $0x70] sm:$0xff] %vm1541_vm7, %v1474_v23  ;;  %2578 = vmatmul.mubr.f32.gmra.mxu0 %v1973_v4  ;;  %v2241_v6 = vmul.f32 %v2561_v48, %v3819_v18 }
 0x294   : > { %v2074_v51 = vpop.f32.mrf.mxu0 }
 0x295   : > { %v1314_v36 = vpop.permute.xlu1 %1313  ;;  %v2240_v46 = vmul.f32 %v3819_v18, %v2074_v51  ;;  %v2280_v52 = vadd.f32 %v3825_v45, %v2241_v6 }
 0x296   : > { %1379 = vst.msk [vmem:[#allocation3 + $0xf8] sm:$0xff] %vm1347_vm6, %v1314_v36  ;;  %v1476_v34 = vpop.permute.xlu0 %1475 }
 0x297   : > { %1557 = vst.msk [vmem:[#allocation3 + $0x78] sm:$0xff] %vm1541_vm7, %v1476_v34  ;;  %v2279_v35 = vadd.f32 %v3825_v45, %v2240_v46  ;;  %v2312_v29 = vmax.f32 %v2280_v52, 0.0 }
 0x299   : > { %v1506_v33 = vpop.permute.xlu1 %1505  ;;  %v1989_v57 = vld [vmem:[#allocation3 + $0xe8] sm:$0xff]  ;;  %v2311_v7 = vmax.f32 %v2279_v35, 0.0 }
 0x29a   : > { %1572 = vst.msk [vmem:[#allocation3 + $0xf0] sm:$0xff] %vm1541_vm7, %v1506_v33  ;;  %v2585_v16 = vpop.f32.mrf.mxu1  ;;  %2602 = vmatmul.mubr.f32.gmra.mxu1 %v1989_v57  ;;  %v1667_v24 = vpop.permute.xlu0 %1666 }
 0x29b   : > { %1749 = vst.msk [vmem:[#allocation3 + $0x70] sm:$0xff] %vm1734_vm8, %v1667_v24  ;;  %v2257_v10 = vmul.f32 %v2585_v16, %v3819_v18  ;;  %2343 = vxpose.xlu0.b32.start [1/16] (narrow) %v2311_v7, 8 }
 0x29c   : > { %v2154_v20 = vpop.f32.mrf.mxu1 }
 0x29d   : > { %v2256_v22 = vmul.f32 %v3819_v18, %v2154_v20  ;;  %v1508_v60 = vpop.permute.xlu1 %1507  ;;  %v2296_v37 = vadd.f32 %v3825_v45, %v2257_v10 }
 0x29e   : > { %1573 = vst.msk [vmem:[#allocation3 + $0xf8] sm:$0xff] %vm1541_vm7, %v1508_v60  ;;  %v1669_v25 = vpop.permute.xlu0 %1668 }
 0x29f   : > { %v2295_v28 = vadd.f32 %v3825_v45, %v2256_v22  ;;  %1750 = vst.msk [vmem:[#allocation3 + $0x78] sm:$0xff] %vm1734_vm8, %v1669_v25  ;;  %2344 = vxpose.xlu0.b32.cont [2/16] (narrow) %v2312_v29, 8  ;;  %v2328_v31 = vmax.f32 %v2296_v37, 0.0 }
 0x2a1   : > { %v2327_v26 = vmax.f32 %v2295_v28, 0.0  ;;  %v1699_v27 = vpop.permute.xlu1 %1698 }
 0x2a2   : > { %1765 = vst.msk [vmem:[#allocation3 + $0xf0] sm:$0xff] %vm1734_vm8, %v1699_v27  ;;  %v1860_v30 = vpop.permute.xlu0 %1859 }
 0x2a3   : > { %2375 = vxpose.xlu1.b32.start [1/16] (narrow) %v2327_v26, 8  ;;  %1942 = vst.msk [vmem:[#allocation3 + $0x70] sm:$0xff] %vm1927_vm9, %v1860_v30 }
 0x2a5   : > { %v1701_v32 = vpop.permute.xlu1 %1700 }
 0x2a6   : > { %1766 = vst.msk [vmem:[#allocation3 + $0xf8] sm:$0xff] %vm1734_vm8, %v1701_v32  ;;  %v1862_v38 = vpop.permute.xlu0 %1861 }
 0x2a7   : > { %2376 = vxpose.xlu1.b32.cont [2/16] (narrow) %v2328_v31, 8  ;;  %1943 = vst.msk [vmem:[#allocation3 + $0x78] sm:$0xff] %vm1927_vm9, %v1862_v38 }
 0x2a9   : > { %v1892_v40 = vpop.permute.xlu1 %1891 }
 0x2aa   : > { %1958 = vst.msk [vmem:[#allocation3 + $0xf0] sm:$0xff] %vm1927_vm9, %v1892_v40  ;;  %v1974_v41 = vld [vmem:[#allocation3 + $0x70] sm:$0xff] }
 0x2ab   : > { %2580 = vmatprep.mubr.f32.mxu0 %v1974_v41 }
 0x2ad   : > { %v1894_v49 = vpop.permute.xlu1 %1893 }
 0x2ae   : > { %1959 = vst.msk [vmem:[#allocation3 + $0xf8] sm:$0xff] %vm1927_vm9, %v1894_v49  ;;  %v1975_v55 = vld [vmem:[#allocation3 + $0x78] sm:$0xff] }
 0x2af   : > { %2581 = vmatmul.mubr.f32.gmra.mxu0 %v1975_v55 }
 0x2b1   : > { %v1990_v39 = vld [vmem:[#allocation3 + $0xf0] sm:$0xff] }
 0x2b2   : > { %2604 = vmatprep.mubr.f32.mxu1 %v1990_v39  ;;  %v2564_v42 = vpop.f32.mrf.mxu0 }
 0x2b3   : > { %v2243_v59 = vmul.f32 %v2564_v42, %v3819_v18 }
 0x2b4   : > { %v2084_v9 = vpop.f32.mrf.mxu0 }
 0x2b5   : > { %v1991_v43 = vld [vmem:[#allocation3 + $0xf8] sm:$0xff]  ;;  %v2242_v44 = vmul.f32 %v3819_v18, %v2084_v9  ;;  %v2282_v54 = vadd.f32 %v3825_v45, %v2243_v59 }
 0x2b6   : > { %2605 = vmatmul.mubr.f32.gmra.mxu1 %v1991_v43 }
 0x2b7   : > { %v2281_v47 = vadd.f32 %v3825_v45, %v2242_v44  ;;  %v2314_v53 = vmax.f32 %v2282_v54, 0.0 }
 0x2b9   : > { %v2313_v50 = vmax.f32 %v2281_v47, 0.0 }
 0x2ba   : > { %v2588_v14 = vpop.f32.mrf.mxu1 }
 0x2bb   : > { %v2259_v56 = vmul.f32 %v2588_v14, %v3819_v18  ;;  %2345 = vxpose.xlu0.b32.cont [3/16] (narrow) %v2313_v50, 8 }
 0x2bc   : > { %v2164_v5 = vpop.f32.mrf.mxu1 }
 0x2bd   : > { %v2258_v63 = vmul.f32 %v3819_v18, %v2164_v5  ;;  %v2298_v62 = vadd.f32 %v3825_v45, %v2259_v56 }
 0x2bf   : > { %v2297_v8 = vadd.f32 %v3825_v45, %v2258_v63  ;;  %2346 = vxpose.xlu0.b32.cont [4/16] (narrow) %v2314_v53, 8  ;;  %v2330_v15 = vmax.f32 %v2298_v62, 0.0 }
 0x2c1   : > { %v2329_v13 = vmax.f32 %v2297_v8, 0.0 }
 0x2c3   : > { %2377 = vxpose.xlu1.b32.cont [3/16] (narrow) %v2329_v13, 8 }
 0x2c7   : > { %2378 = vxpose.xlu1.b32.cont [4/16] (narrow) %v2330_v15, 8 }
 0x2d2   : > { %v2567_v11 = vpop.f32.mrf.mxu0 }
 0x2d3   : > { %v2245_v0 = vmul.f32 %v2567_v11, %v3819_v18 }
 0x2d4   : > { %v2094_v1 = vpop.f32.mrf.mxu0 }
 0x2d5   : > { %v2244_v19 = vmul.f32 %v3819_v18, %v2094_v1  ;;  %v2284_v17 = vadd.f32 %v3825_v45, %v2245_v0 }
 0x2d7   : > { %v2283_v58 = vadd.f32 %v3825_v45, %v2244_v19  ;;  %v2316_v3 = vmax.f32 %v2284_v17, 0.0 }
 0x2d9   : > { %v2315_v21 = vmax.f32 %v2283_v58, 0.0 }
 0x2da   : > { %v2591_v2 = vpop.f32.mrf.mxu1 }
 0x2db   : > { %v2261_v12 = vmul.f32 %v2591_v2, %v3819_v18  ;;  %2347 = vxpose.xlu0.b32.cont [5/16] (narrow) %v2315_v21, 8 }
 0x2dc   : > { %v2174_v61 = vpop.f32.mrf.mxu1 }
 0x2dd   : > { %v2260_v23 = vmul.f32 %v3819_v18, %v2174_v61  ;;  %v2300_v48 = vadd.f32 %v3825_v45, %v2261_v12 }
 0x2df   : > { %v2299_v4 = vadd.f32 %v3825_v45, %v2260_v23  ;;  %2348 = vxpose.xlu0.b32.cont [6/16] (narrow) %v2316_v3, 8  ;;  %v2332_v36 = vmax.f32 %v2300_v48, 0.0 }
 0x2e1   : > { %v2331_v6 = vmax.f32 %v2299_v4, 0.0 }
 0x2e3   : > { %2379 = vxpose.xlu1.b32.cont [5/16] (narrow) %v2331_v6, 8 }
 0x2e7   : > { %2380 = vxpose.xlu1.b32.cont [6/16] (narrow) %v2332_v36, 8 }
 0x2f2   : > { %v2570_v51 = vpop.f32.mrf.mxu0 }
 0x2f3   : > { %v2247_v46 = vmul.f32 %v2570_v51, %v3819_v18 }
 0x2f4   : > { %v2104_v34 = vpop.f32.mrf.mxu0 }
 0x2f5   : > { %v2246_v52 = vmul.f32 %v3819_v18, %v2104_v34  ;;  %v2286_v35 = vadd.f32 %v3825_v45, %v2247_v46 }
 0x2f7   : > { %v2285_v33 = vadd.f32 %v3825_v45, %v2246_v52  ;;  %v2318_v24 = vmax.f32 %v2286_v35, 0.0 }
 0x2f9   : > { %v2317_v16 = vmax.f32 %v2285_v33, 0.0 }
 0x2fa   : > { %v2594_v57 = vpop.f32.mrf.mxu1 }
 0x2fb   : > { %v2263_v20 = vmul.f32 %v2594_v57, %v3819_v18  ;;  %2349 = vxpose.xlu0.b32.cont [7/16] (narrow) %v2317_v16, 8 }
 0x2fc   : > { %v2184_v7 = vpop.f32.mrf.mxu1 }
 0x2fd   : > { %v2262_v29 = vmul.f32 %v3819_v18, %v2184_v7  ;;  %v2302_v22 = vadd.f32 %v3825_v45, %v2263_v20 }
 0x2ff   : > { %v2301_v10 = vadd.f32 %v3825_v45, %v2262_v29  ;;  %2350 = vxpose.xlu0.b32.cont [8/16] (narrow) %v2318_v24, 8  ;;  %v2334_v28 = vmax.f32 %v2302_v22, 0.0 }
 0x301   : > { %v2333_v60 = vmax.f32 %v2301_v10, 0.0 }
 0x303   : > { %2381 = vxpose.xlu1.b32.cont [7/16] (narrow) %v2333_v60, 8 }
 0x307   : > { %2382 = vxpose.xlu1.b32.cont [8/16] (narrow) %v2334_v28, 8 }
 0x313   : > { %v2573_v25 = vpop.f32.mrf.mxu0 }
 0x314   : > { %v2249_v37 = vmul.f32 %v2573_v25, %v3819_v18 }
 0x315   : > { %v2114_v26 = vpop.f32.mrf.mxu0 }
 0x316   : > { %v2248_v27 = vmul.f32 %v3819_v18, %v2114_v26  ;;  %v2288_v30 = vadd.f32 %v3825_v45, %v2249_v37 }
 0x318   : > { %v2287_v31 = vadd.f32 %v3825_v45, %v2248_v27  ;;  %v2320_v41 = vmax.f32 %v2288_v30, 0.0 }
 0x31a   : > { %v2597_v32 = vpop.f32.mrf.mxu1  ;;  %v2319_v38 = vmax.f32 %v2287_v31, 0.0 }
 0x31b   : > { %v2265_v49 = vmul.f32 %v2597_v32, %v3819_v18 }
 0x31c   : > { %v2194_v40 = vpop.f32.mrf.mxu1  ;;  %2351 = vxpose.xlu0.b32.cont [9/16] (narrow) %v2319_v38, 8 }
 0x31d   : > { %v2264_v55 = vmul.f32 %v3819_v18, %v2194_v40  ;;  %v2304_v42 = vadd.f32 %v3825_v45, %v2265_v49 }
 0x31f   : > { %v2303_v39 = vadd.f32 %v3825_v45, %v2264_v55  ;;  %v2336_v43 = vmax.f32 %v2304_v42, 0.0 }
 0x320   : > { %2352 = vxpose.xlu0.b32.cont [10/16] (narrow) %v2320_v41, 8 }
 0x321   : > { %v2335_v59 = vmax.f32 %v2303_v39, 0.0 }
 0x323   : > { %2383 = vxpose.xlu1.b32.cont [9/16] (narrow) %v2335_v59, 8 }
 0x327   : > { %2384 = vxpose.xlu1.b32.cont [10/16] (narrow) %v2336_v43, 8 }
 0x333   : > { %v2576_v9 = vpop.f32.mrf.mxu0 }
 0x334   : > { %v2251_v44 = vmul.f32 %v2576_v9, %v3819_v18 }
 0x335   : > { %v2124_v54 = vpop.f32.mrf.mxu0 }
 0x336   : > { %v2250_v47 = vmul.f32 %v3819_v18, %v2124_v54  ;;  %v2290_v14 = vadd.f32 %v3825_v45, %v2251_v44 }
 0x338   : > { %v2289_v50 = vadd.f32 %v3825_v45, %v2250_v47  ;;  %v2322_v63 = vmax.f32 %v2290_v14, 0.0 }
 0x33a   : > { %v2600_v5 = vpop.f32.mrf.mxu1  ;;  %v2321_v53 = vmax.f32 %v2289_v50, 0.0 }
 0x33b   : > { %v2267_v8 = vmul.f32 %v2600_v5, %v3819_v18 }
 0x33c   : > { %v2204_v56 = vpop.f32.mrf.mxu1  ;;  %2353 = vxpose.xlu0.b32.cont [11/16] (narrow) %v2321_v53, 8 }
 0x33d   : > { %v2266_v62 = vmul.f32 %v3819_v18, %v2204_v56  ;;  %v2306_v15 = vadd.f32 %v3825_v45, %v2267_v8 }
 0x33f   : > { %v2305_v13 = vadd.f32 %v3825_v45, %v2266_v62  ;;  %v2338_v0 = vmax.f32 %v2306_v15, 0.0 }
 0x340   : > { %2354 = vxpose.xlu0.b32.cont [12/16] (narrow) %v2322_v63, 8 }
 0x341   : > { %v2337_v11 = vmax.f32 %v2305_v13, 0.0 }
 0x343   : > { %2385 = vxpose.xlu1.b32.cont [11/16] (narrow) %v2337_v11, 8 }
 0x347   : > { %2386 = vxpose.xlu1.b32.cont [12/16] (narrow) %v2338_v0, 8 }
 0x353   : > { %v2579_v1 = vpop.f32.mrf.mxu0 }
 0x354   : > { %v2253_v19 = vmul.f32 %v2579_v1, %v3819_v18 }
 0x355   : > { %v2134_v17 = vpop.f32.mrf.mxu0 }
 0x356   : > { %v2252_v58 = vmul.f32 %v3819_v18, %v2134_v17  ;;  %v2292_v2 = vadd.f32 %v3825_v45, %v2253_v19 }
 0x358   : > { %v2291_v21 = vadd.f32 %v3825_v45, %v2252_v58  ;;  %v2324_v23 = vmax.f32 %v2292_v2, 0.0 }
 0x35a   : > { %v2603_v61 = vpop.f32.mrf.mxu1  ;;  %v2323_v3 = vmax.f32 %v2291_v21, 0.0 }
 0x35b   : > { %v2269_v4 = vmul.f32 %v2603_v61, %v3819_v18 }
 0x35c   : > { %v2214_v12 = vpop.f32.mrf.mxu1  ;;  %2355 = vxpose.xlu0.b32.cont [13/16] (narrow) %v2323_v3, 8 }
 0x35d   : > { %v2268_v48 = vmul.f32 %v3819_v18, %v2214_v12  ;;  %v2308_v36 = vadd.f32 %v3825_v45, %v2269_v4 }
 0x35f   : > { %v2307_v6 = vadd.f32 %v3825_v45, %v2268_v48  ;;  %v2340_v46 = vmax.f32 %v2308_v36, 0.0 }
 0x360   : > { %2356 = vxpose.xlu0.b32.cont [14/16] (narrow) %v2324_v23, 8 }
 0x361   : > { %v2339_v51 = vmax.f32 %v2307_v6, 0.0 }
 0x363   : > { %2387 = vxpose.xlu1.b32.cont [13/16] (narrow) %v2339_v51, 8 }
 0x367   : > { %2388 = vxpose.xlu1.b32.cont [14/16] (narrow) %v2340_v46, 8 }
 0x36f   : > { %v2582_v34 = vpop.f32.mrf.mxu0 }
 0x370   : > { %v2255_v52 = vmul.f32 %v2582_v34, %v3819_v18 }
 0x371   : > { %v2144_v35 = vpop.f32.mrf.mxu0 }
 0x372   : > { %v2254_v33 = vmul.f32 %v3819_v18, %v2144_v35  ;;  %v2294_v57 = vadd.f32 %v3825_v45, %v2255_v52 }
 0x374   : > { %v2293_v16 = vadd.f32 %v3825_v45, %v2254_v33  ;;  %v2326_v29 = vmax.f32 %v2294_v57, 0.0 }
 0x376   : > { %v2606_v7 = vpop.f32.mrf.mxu1  ;;  %v2325_v24 = vmax.f32 %v2293_v16, 0.0 }
 0x377   : > { %v2271_v10 = vmul.f32 %v2606_v7, %v3819_v18 }
 0x378   : > { %v2224_v20 = vpop.f32.mrf.mxu1  ;;  %2357 = vxpose.xlu0.b32.cont [15/16] (narrow) %v2325_v24, 8 }
 0x379   : > { %v2270_v22 = vmul.f32 %v3819_v18, %v2224_v20  ;;  %v2310_v28 = vadd.f32 %v3825_v45, %v2271_v10 }
 0x37b   : > { %v2309_v60 = vadd.f32 %v3825_v45, %v2270_v22  ;;  %v2342_v37 = vmax.f32 %v2310_v28, 0.0 }
 0x37c   : > { %2358 = vxpose.xlu0.b32.end [16/16] (narrow) %v2326_v29, 8 }
 0x37d   : > { %v2341_v25 = vmax.f32 %v2309_v60, 0.0 }
 0x37f   : > { %2389 = vxpose.xlu1.b32.cont [15/16] (narrow) %v2341_v25, 8 }
 0x383   : > { %2390 = vxpose.xlu1.b32.end [16/16] (narrow) %v2342_v37, 8 }
 0x3bc   : > { %v2359_v26 = vpop.trf.xlu0 }
 0x3bd   : > { %2407 = vst [vmem:[%s197_s21] sm:$0xff] %v2359_v26 }
 0x3c3   : > { %v2391_v27 = vpop.trf.xlu1 }
 0x3c4   : > { %2408 = vst [vmem:[%s197_s21 + $0x8] sm:$0xff] %v2391_v27 }
 0x3c5 PF: > { %s14_s15 = sadd.s32 1, %s2662_s15  }
 0x3c6   : > { %p11_p4 = scmp.ge.s32.totalorder %s14_s15, 4  }
 0x3c8   :  { %13 = sbr.rel (!%p11_p4) target bundleno = 1 (0x1), region = 68 }

</bundles_post_ra>
